<compile_context>
chip_gen: v7x
topology: tpu7x:2x2x1
jax: 0.10.0
libtpu: 0.0.40
codegen_flags: <defaults>
</compile_context>

<pallas_src>
import numpy as np
import jax
import jax.numpy as jnp
from jax.experimental import pallas as pl
from jax.experimental.pallas import tpu as pltpu

LN_EPS = 1e-5
_INV_SQRT2 = 0.7071067811865476


def _gelu_exact(x):
    # PyTorch nn.GELU() default: exact erf formulation.
    return 0.5 * x * (1.0 + jax.lax.erf(x * _INV_SQRT2))


def _roll_lanes(x, shift, t):
    """Circular roll along the time (lane) axis; static shift."""
    s = shift % t
    if s == 0:
        return x
    return pltpu.roll(x, shift=s, axis=1)


def _conv_ln_gelu(x, w_ref, gamma, beta, kernel_size):
    """Conv1d(padding='same', bias=False) + LayerNorm(C_out) + exact GELU, (C, T) layout.

    x:           (C_in, T) f32          time on lanes, channels on sublanes
    w_ref:       (K, C_out, C_in) ref   matmul dtype (bf16 by default)
    gamma, beta: (C_out, 1) f32         LayerNorm affine
    """
    c_in, t = x.shape
    _, c_out, _ = w_ref.shape
    pad_left = (kernel_size - 1) // 2                 # PyTorch 'same': left = (K-1)//2
    lane = jax.lax.broadcasted_iota(jnp.int32, (c_in, t), 1)

    acc = None
    for k in range(kernel_size):
        d = k - pad_left                              # out[:, i] += W_k @ x[:, i + d]
        if d == 0:
            xd = x
        else:
            rolled = _roll_lanes(x, -d, t)            # rolled[:, i] = x[:, (i + d) % T]
            mask = (lane >= -d) & (lane < t - d)      # 'same' zero padding
            xd = jnp.where(mask, rolled, 0.0)
        wk = w_ref[k]                                 # (C_out, C_in), static tap index
        p = jnp.dot(wk, xd.astype(wk.dtype), preferred_element_type=jnp.float32)
        acc = p if acc is None else acc + p

    # LayerNorm over channels (sublane axis); one-pass stats kept in f32.
    inv_c = 1.0 / float(c_out)
    s1 = jnp.sum(acc, axis=0, keepdims=True)
    s2 = jnp.sum(acc * acc, axis=0, keepdims=True)
    mu = s1 * inv_c
    var = jnp.maximum(s2 * inv_c - mu * mu, 0.0)
    y = (acc - mu) * jax.lax.rsqrt(var + LN_EPS)
    y = y * gamma + beta
    # nn.Dropout: identity in eval mode.
    return _gelu_exact(y)


def _maxpool_time(y, pool, select_mat):
    """MaxPool1d(kernel_size=pool, stride=pool) along the lane (time) axis.

    Windowed max via XLU rolls, then decimation as a matmul with a constant 0/1
    selection matrix (T, T//pool) on the otherwise idle MXU.
    """
    if pool <= 1:
        return y
    _, t = y.shape
    m = y
    for r in range(1, pool):
        m = jnp.maximum(m, _roll_lanes(y, -r, t))
    # Wrapped-around columns of the rolls are never selected (only i = q*pool with
    # q < T//pool, and q*pool + pool - 1 <= T - 1), so no masking is needed.
    return jnp.dot(m, select_mat, preferred_element_type=jnp.float32)


def _upsample_linear(y, upsample_mat):
    """nn.Upsample(mode='linear', align_corners=False) == matmul with a constant matrix."""
    return jnp.dot(y, upsample_mat, preferred_element_type=jnp.float32)


# ------------------------- host-built constant matrices ----------------------


def _maxpool_select_matrix(t_in, pool):
    t_out = t_in // pool
    s = np.zeros((t_in, t_out), np.float32)
    s[np.arange(t_out) * pool, np.arange(t_out)] = 1.0
    return jnp.asarray(s)


def _upsample_linear_matrix(t_in, scale):
    """Exact PyTorch linear / align_corners=False interpolation as a (T_in, T_in*scale) matrix."""
    t_out = t_in * scale
    j = np.arange(t_out)
    src = np.maximum((j + 0.5) / float(scale) - 0.5, 0.0)   # PyTorch clamps negative src to 0
    i0 = np.minimum(np.floor(src).astype(np.int64), t_in - 1)
    lam = (src - i0).astype(np.float32)
    i1 = np.minimum(i0 + 1, t_in - 1)
    u = np.zeros((t_in, t_out), np.float32)
    u[i0, j] += 1.0 - lam
    u[i1, j] += lam
    return jnp.asarray(u)


def _padded_nbytes(a):
    """Rough VMEM footprint of an array after (sublane, 128)-tile padding."""
    shape = a.shape
    itemsize = a.dtype.itemsize
    sub = {1: 32, 2: 16}.get(itemsize, 8)
    if len(shape) < 2:
        n = shape[0] if shape else 1
        return sub * (-(-max(n, 1) // 128) * 128) * itemsize
    lead = 1
    for d in shape[:-2]:
        lead *= d
    s = -(-shape[-2] // sub) * sub
    l = -(-shape[-1] // 128) * 128
    return lead * s * l * itemsize


# ------------------------------ fused kernel ---------------------------------


def _make_fused_kernel(stage_cfg):
    """stage_cfg: tuple of (kind, kernel_size, factor); kind in {'conv', 'up'};
    factor = MaxPool stride for 'conv', Upsample scale for 'up'.  Stages with
    factor > 1 carry one extra (resample-matrix) input ref."""

    def kernel(*refs):
        x_ref = refs[0]
        o_ref = refs[-1]
        # One batch element per grid step (TODO(synk): pack Bt elements to amortize
        # the ~0.35 us per-step overhead when B is large).
        h = x_ref[0]                                   # (C_in, T), f32
        pos = 1
        for kind, k_sz, factor in stage_cfg:
            w_ref, g_ref, b_ref = refs[pos], refs[pos + 1], refs[pos + 2]
            pos += 3
            h = _conv_ln_gelu(h, w_ref, g_ref[...], b_ref[...], k_sz)
            if factor > 1:
                r = refs[pos][...]
                pos += 1
                if kind == "conv":
                    h = _maxpool_time(h, factor, r)
                else:
                    h = _upsample_linear(h, r)

        head_w = refs[pos][...]
        head_b = refs[pos + 1][...]
        # Conv1d(kernel_size=1, padding='same', bias=True) head == matmul + bias.
        out = jnp.dot(head_w, h.astype(head_w.dtype),
                      preferred_element_type=jnp.float32) + head_b
        o_ref[0] = out.astype(o_ref.dtype)             # (n_out, T'): lane-dense store

    return kernel


def autoencoder1d_forward(x, params, *, matmul_dtype=jnp.bfloat16):
    """x: [batch, n_electrodes, n_freqs, time] -> [batch, n_channels_out, time']."""
    b, e, fq, t = x.shape
    c_in = e * fq
    h = x.reshape(b, c_in, t).astype(jnp.float32)      # merge (E, F) only; no transpose

    stage_cfg = []
    const_inputs = []
    peak = {"elems": c_in * t}

    def add_stage(blk, kind, factor, t_in):
        w = blk["w"]                                   # (C_out, C_in, K), PyTorch layout
        c_out, c_in_w, k_sz = w.shape
        stage_cfg.append((kind, int(k_sz), int(factor)))
        const_inputs.append(jnp.transpose(w, (2, 0, 1)).astype(matmul_dtype))  # (K, C_out, C_in)
        const_inputs.append(blk["ln_w"].reshape(c_out, 1).astype(jnp.float32))
        const_inputs.append(blk["ln_b"].reshape(c_out, 1).astype(jnp.float32))
        if factor > 1:
            if kind == "conv":
                const_inputs.append(_maxpool_select_matrix(t_in, factor))
                t_next = t_in // factor
            else:
                const_inputs.append(_upsample_linear_matrix(t_in, factor))
                t_next = t_in * factor
        else:
            t_next = t_in
        peak["elems"] = max(peak["elems"], (2 * c_in_w + 3 * c_out) * max(t_in, t_next))
        return t_next

    t_cur = add_stage(params["spatial_reduce"], "conv", 1, t)   # MaxPool(k=1) == identity
    for blk in params["down"]:
        t_cur = add_stage(blk, "conv", blk["pool"], t_cur)
    for blk in params["up"]:
        t_cur = add_stage(blk, "up", blk["scale"], t_cur)
    t_out = t_cur

    head_w = params["head"]["w"].reshape(params["head"]["w"].shape[0], -1).astype(matmul_dtype)
    head_b = params["head"]["b"].reshape(-1, 1).astype(jnp.float32)
    n_out = head_w.shape[0]
    const_inputs += [head_w, head_b]

    kernel = _make_fused_kernel(tuple(stage_cfg))

    in_specs = [pl.BlockSpec((1, c_in, t), lambda i: (i, 0, 0))]
    for arr in const_inputs:
        # Constant block index: each weight / resample matrix is DMA'd once and stays
        # resident across the batch grid.
        in_specs.append(pl.BlockSpec(arr.shape, lambda i, nd=arr.ndim: (0,) * nd))
    out_specs = pl.BlockSpec((1, n_out, t_out), lambda i: (i, 0, 0))

    # Footprint-derived VMEM limit, clamped to the chip's capacity (v7x: 64 MiB/TC).
    const_bytes = sum(_padded_nbytes(a) for a in const_inputs)
    io_bytes = _padded_nbytes(jax.ShapeDtypeStruct((c_in, t), jnp.float32)) \
        + _padded_nbytes(jax.ShapeDtypeStruct((n_out, t_out), jnp.float32))
    vmem_needed = 2 * io_bytes + 2 * const_bytes + 2 * 4 * peak["elems"] + (2 << 20)
    vmem_cap = 128 << 20
    try:
        vmem_cap = int(pltpu.get_tpu_info().vmem_capacity_bytes)
    except Exception:
        pass
    vmem_limit = int(min(max(vmem_needed, 32 << 20), int(vmem_cap * 0.75)))

    out = pl.pallas_call(
        kernel,
        out_shape=jax.ShapeDtypeStruct((b, n_out, t_out), jnp.float32),
        grid=(b,),
        in_specs=in_specs,
        out_specs=out_specs,
        compiler_params=pltpu.CompilerParams(
            dimension_semantics=("parallel",),
            vmem_limit_bytes=vmem_limit,
        ),
    )(h, *const_inputs)

    return out                                          # already [B, n_channels_out, T']


# ------------------------------ params --------------------------------------


def init_params(key, n_electrodes, n_freqs, n_channels_out, channels,
                kernel_sizes, strides, decoder_reduce=1):
    """Parameters in PyTorch layouts: conv (C_out, C_in, K); LN (C,); head ((n_out, C0, 1), (n_out,))."""
    n_inp = n_electrodes * n_freqs
    depth = len(channels) - 1
    keys = iter(jax.random.split(key, 64))

    def conv_block(cin, cout, k):
        w = jax.random.normal(next(keys), (cout, cin, k), jnp.float32) / jnp.sqrt(float(cin * k))
        ln_w = 1.0 + 0.1 * jax.random.normal(next(keys), (cout,), jnp.float32)
        ln_b = 0.01 * jax.random.normal(next(keys), (cout,), jnp.float32)
        return {"w": w, "ln_w": ln_w, "ln_b": ln_b}

    params = {"spatial_reduce": conv_block(n_inp, channels[0], 3)}

    down = []
    for i in range(depth):
        blk = conv_block(channels[i], channels[i + 1], kernel_sizes[i])
        blk["pool"] = strides[i]
        down.append(blk)
    params["down"] = down

    ch_dec = [c // decoder_reduce for c in channels[:-1]] + channels[-1:]
    up = []
    for i in range(depth - 1, -1, -1):
        blk = conv_block(ch_dec[i + 1], ch_dec[i], kernel_sizes[i])
        blk["scale"] = strides[i]
        up.append(blk)
    params["up"] = up

    params["head"] = {
        "w": jax.random.normal(next(keys), (n_channels_out, ch_dec[0], 1), jnp.float32)
             / jnp.sqrt(float(ch_dec[0])),
        "b": 0.01 * jax.random.normal(next(keys), (n_channels_out,), jnp.float32),
    }
    return params


if __name__ == "__main__":
    key = jax.random.PRNGKey(0)
    k_params, k_x = jax.random.split(key)

    # Small, forward-consistent shapes.
    B, E, Fq, T = 2, 4, 4, 16            # time divisible by prod(strides) = 8
    channels = [8, 16, 32, 32]
    kernel_sizes = [3, 3, 3]
    strides = [2, 2, 2]
    n_channels_out = 5

    params = init_params(k_params, E, Fq, n_channels_out, channels,
                         kernel_sizes, strides, decoder_reduce=1)
    x = jax.random.normal(k_x, (B, E, Fq, T), jnp.float32)

    out = autoencoder1d_forward(x, params)
    jax.block_until_ready(out)
    assert out.shape == (B, n_channels_out, T), out.shape
    assert bool(jnp.all(jnp.isfinite(out)))
    print("KERNEL_OK")
</pallas_src>

<mosaic_0001>
module attributes {stable_mosaic.version = 11 : i64} {
  func.func @kernel(%arg0: i32, %arg1: memref<1x16x16xf32, #tpu.memory_space<vmem>>, %arg2: memref<3x8x16xbf16, #tpu.memory_space<vmem>>, %arg3: memref<8x1xf32, #tpu.memory_space<vmem>>, %arg4: memref<8x1xf32, #tpu.memory_space<vmem>>, %arg5: memref<3x16x8xbf16, #tpu.memory_space<vmem>>, %arg6: memref<16x1xf32, #tpu.memory_space<vmem>>, %arg7: memref<16x1xf32, #tpu.memory_space<vmem>>, %arg8: memref<16x8xf32, #tpu.memory_space<vmem>>, %arg9: memref<3x32x16xbf16, #tpu.memory_space<vmem>>, %arg10: memref<32x1xf32, #tpu.memory_space<vmem>>, %arg11: memref<32x1xf32, #tpu.memory_space<vmem>>, %arg12: memref<8x4xf32, #tpu.memory_space<vmem>>, %arg13: memref<3x32x32xbf16, #tpu.memory_space<vmem>>, %arg14: memref<32x1xf32, #tpu.memory_space<vmem>>, %arg15: memref<32x1xf32, #tpu.memory_space<vmem>>, %arg16: memref<4x2xf32, #tpu.memory_space<vmem>>, %arg17: memref<3x32x32xbf16, #tpu.memory_space<vmem>>, %arg18: memref<32x1xf32, #tpu.memory_space<vmem>>, %arg19: memref<32x1xf32, #tpu.memory_space<vmem>>, %arg20: memref<2x4xf32, #tpu.memory_space<vmem>>, %arg21: memref<3x16x32xbf16, #tpu.memory_space<vmem>>, %arg22: memref<16x1xf32, #tpu.memory_space<vmem>>, %arg23: memref<16x1xf32, #tpu.memory_space<vmem>>, %arg24: memref<4x8xf32, #tpu.memory_space<vmem>>, %arg25: memref<3x8x16xbf16, #tpu.memory_space<vmem>>, %arg26: memref<8x1xf32, #tpu.memory_space<vmem>>, %arg27: memref<8x1xf32, #tpu.memory_space<vmem>>, %arg28: memref<8x16xf32, #tpu.memory_space<vmem>>, %arg29: memref<5x8xbf16, #tpu.memory_space<vmem>>, %arg30: memref<5x1xf32, #tpu.memory_space<vmem>>, %arg31: memref<1x5x16xf32, #tpu.memory_space<vmem>>) attributes {dimension_semantics = [#tpu.dimension_semantics<parallel>], iteration_bounds = array<i64: 2>, scalar_prefetch = 0 : i64, scratch_operands = 0 : i64, tpu.core_type = #tpu.core_type<tc>, window_params = [{transform_indices = @transform_0, window_bounds = array<i64: 1, 16, 16>}, {pipeline_mode = #tpu.pipeline_mode<synchronous>, transform_indices = @transform_1, window_bounds = array<i64: 3, 8, 16>}, {pipeline_mode = #tpu.pipeline_mode<synchronous>, transform_indices = @transform_2, window_bounds = array<i64: 8, 1>}, {pipeline_mode = #tpu.pipeline_mode<synchronous>, transform_indices = @transform_3, window_bounds = array<i64: 8, 1>}, {pipeline_mode = #tpu.pipeline_mode<synchronous>, transform_indices = @transform_4, window_bounds = array<i64: 3, 16, 8>}, {pipeline_mode = #tpu.pipeline_mode<synchronous>, transform_indices = @transform_5, window_bounds = array<i64: 16, 1>}, {pipeline_mode = #tpu.pipeline_mode<synchronous>, transform_indices = @transform_6, window_bounds = array<i64: 16, 1>}, {pipeline_mode = #tpu.pipeline_mode<synchronous>, transform_indices = @transform_7, window_bounds = array<i64: 16, 8>}, {pipeline_mode = #tpu.pipeline_mode<synchronous>, transform_indices = @transform_8, window_bounds = array<i64: 3, 32, 16>}, {pipeline_mode = #tpu.pipeline_mode<synchronous>, transform_indices = @transform_9, window_bounds = array<i64: 32, 1>}, {pipeline_mode = #tpu.pipeline_mode<synchronous>, transform_indices = @transform_10, window_bounds = array<i64: 32, 1>}, {pipeline_mode = #tpu.pipeline_mode<synchronous>, transform_indices = @transform_11, window_bounds = array<i64: 8, 4>}, {pipeline_mode = #tpu.pipeline_mode<synchronous>, transform_indices = @transform_12, window_bounds = array<i64: 3, 32, 32>}, {pipeline_mode = #tpu.pipeline_mode<synchronous>, transform_indices = @transform_13, window_bounds = array<i64: 32, 1>}, {pipeline_mode = #tpu.pipeline_mode<synchronous>, transform_indices = @transform_14, window_bounds = array<i64: 32, 1>}, {pipeline_mode = #tpu.pipeline_mode<synchronous>, transform_indices = @transform_15, window_bounds = array<i64: 4, 2>}, {pipeline_mode = #tpu.pipeline_mode<synchronous>, transform_indices = @transform_16, window_bounds = array<i64: 3, 32, 32>}, {pipeline_mode = #tpu.pipeline_mode<synchronous>, transform_indices = @transform_17, window_bounds = array<i64: 32, 1>}, {pipeline_mode = #tpu.pipeline_mode<synchronous>, transform_indices = @transform_18, window_bounds = array<i64: 32, 1>}, {pipeline_mode = #tpu.pipeline_mode<synchronous>, transform_indices = @transform_19, window_bounds = array<i64: 2, 4>}, {pipeline_mode = #tpu.pipeline_mode<synchronous>, transform_indices = @transform_20, window_bounds = array<i64: 3, 16, 32>}, {pipeline_mode = #tpu.pipeline_mode<synchronous>, transform_indices = @transform_21, window_bounds = array<i64: 16, 1>}, {pipeline_mode = #tpu.pipeline_mode<synchronous>, transform_indices = @transform_22, window_bounds = array<i64: 16, 1>}, {pipeline_mode = #tpu.pipeline_mode<synchronous>, transform_indices = @transform_23, window_bounds = array<i64: 4, 8>}, {pipeline_mode = #tpu.pipeline_mode<synchronous>, transform_indices = @transform_24, window_bounds = array<i64: 3, 8, 16>}, {pipeline_mode = #tpu.pipeline_mode<synchronous>, transform_indices = @transform_25, window_bounds = array<i64: 8, 1>}, {pipeline_mode = #tpu.pipeline_mode<synchronous>, transform_indices = @transform_26, window_bounds = array<i64: 8, 1>}, {pipeline_mode = #tpu.pipeline_mode<synchronous>, transform_indices = @transform_27, window_bounds = array<i64: 8, 16>}, {pipeline_mode = #tpu.pipeline_mode<synchronous>, transform_indices = @transform_28, window_bounds = array<i64: 5, 8>}, {pipeline_mode = #tpu.pipeline_mode<synchronous>, transform_indices = @transform_29, window_bounds = array<i64: 5, 1>}, {transform_indices = @transform_30, window_bounds = array<i64: 1, 5, 16>}]} {
    %c0 = arith.constant 0 : index
    %c0_0 = arith.constant 0 : index
    %c0_1 = arith.constant 0 : index
    %0 = vector.load %arg1[%c0, %c0_0, %c0_1] : memref<1x16x16xf32, #tpu.memory_space<vmem>>, vector<1x16x16xf32>
    %1 = vector.shape_cast %0 : vector<1x16x16xf32> to vector<16x16xf32>
    %c0_2 = arith.constant 0 : index
    %c0_3 = arith.constant 0 : index
    %2 = vector.load %arg3[%c0_2, %c0_3] : memref<8x1xf32, #tpu.memory_space<vmem>>, vector<8x1xf32>
    %c0_4 = arith.constant 0 : index
    %c0_5 = arith.constant 0 : index
    %3 = vector.load %arg4[%c0_4, %c0_5] : memref<8x1xf32, #tpu.memory_space<vmem>>, vector<8x1xf32>
    %4 = tpu.iota {dimensions = array<i32: 1>} : vector<16x16xi32>
    %c1_i32 = arith.constant 1 : i32
    %5 = tpu.dynamic_rotate %1 by %c1_i32 dim 1 : vector<16x16xf32>, i32 -> vector<16x16xf32>
    %c1_i32_6 = arith.constant 1 : i32
    %6 = vector.broadcast %c1_i32_6 : i32 to vector<16x16xi32>
    %7 = arith.cmpi sge, %4, %6 : vector<16x16xi32>
    %c17_i32 = arith.constant 17 : i32
    %8 = vector.broadcast %c17_i32 : i32 to vector<16x16xi32>
    %9 = arith.cmpi slt, %4, %8 : vector<16x16xi32>
    %10 = arith.andi %7, %9 : vector<16x16xi1>
    %cst = arith.constant 0.000000e+00 : f32
    %11 = vector.broadcast %cst : f32 to vector<16x16xf32>
    %12 = arith.select %10, %5, %11 : vector<16x16xi1>, vector<16x16xf32>
    %c0_7 = arith.constant 0 : index
    %c0_8 = arith.constant 0 : index
    %c0_9 = arith.constant 0 : index
    %13 = vector.load %arg2[%c0_7, %c0_8, %c0_9] : memref<3x8x16xbf16, #tpu.memory_space<vmem>>, vector<1x8x16xbf16>
    %14 = vector.shape_cast %13 : vector<1x8x16xbf16> to vector<8x16xbf16>
    %15 = arith.truncf %12 : vector<16x16xf32> to vector<16x16xbf16>
    %cst_10 = arith.constant dense<0.000000e+00> : vector<8x16xf32>
    %16 = tpu.matmul %14, %15, %cst_10 {dimension_numbers = #tpu.dot_dimension_numbers<[1], [0], [0], [1], [0, 0, 1, 1], [], []>} : vector<8x16xbf16>, vector<16x16xbf16>, vector<8x16xf32> -> vector<8x16xf32>
    %c1 = arith.constant 1 : index
    %c0_11 = arith.constant 0 : index
    %c0_12 = arith.constant 0 : index
    %17 = vector.load %arg2[%c1, %c0_11, %c0_12] : memref<3x8x16xbf16, #tpu.memory_space<vmem>>, vector<1x8x16xbf16>
    %18 = vector.shape_cast %17 : vector<1x8x16xbf16> to vector<8x16xbf16>
    %19 = arith.truncf %1 : vector<16x16xf32> to vector<16x16xbf16>
    %cst_13 = arith.constant dense<0.000000e+00> : vector<8x16xf32>
    %20 = tpu.matmul %18, %19, %cst_13 {dimension_numbers = #tpu.dot_dimension_numbers<[1], [0], [0], [1], [0, 0, 1, 1], [], []>} : vector<8x16xbf16>, vector<16x16xbf16>, vector<8x16xf32> -> vector<8x16xf32>
    %21 = arith.addf %16, %20 : vector<8x16xf32>
    %c15_i32 = arith.constant 15 : i32
    %22 = tpu.dynamic_rotate %1 by %c15_i32 dim 1 : vector<16x16xf32>, i32 -> vector<16x16xf32>
    %c-1_i32 = arith.constant -1 : i32
    %23 = vector.broadcast %c-1_i32 : i32 to vector<16x16xi32>
    %24 = arith.cmpi sge, %4, %23 : vector<16x16xi32>
    %c15_i32_14 = arith.constant 15 : i32
    %25 = vector.broadcast %c15_i32_14 : i32 to vector<16x16xi32>
    %26 = arith.cmpi slt, %4, %25 : vector<16x16xi32>
    %27 = arith.andi %24, %26 : vector<16x16xi1>
    %cst_15 = arith.constant 0.000000e+00 : f32
    %28 = vector.broadcast %cst_15 : f32 to vector<16x16xf32>
    %29 = arith.select %27, %22, %28 : vector<16x16xi1>, vector<16x16xf32>
    %c2 = arith.constant 2 : index
    %c0_16 = arith.constant 0 : index
    %c0_17 = arith.constant 0 : index
    %30 = vector.load %arg2[%c2, %c0_16, %c0_17] : memref<3x8x16xbf16, #tpu.memory_space<vmem>>, vector<1x8x16xbf16>
    %31 = vector.shape_cast %30 : vector<1x8x16xbf16> to vector<8x16xbf16>
    %32 = arith.truncf %29 : vector<16x16xf32> to vector<16x16xbf16>
    %cst_18 = arith.constant dense<0.000000e+00> : vector<8x16xf32>
    %33 = tpu.matmul %31, %32, %cst_18 {dimension_numbers = #tpu.dot_dimension_numbers<[1], [0], [0], [1], [0, 0, 1, 1], [], []>} : vector<8x16xbf16>, vector<16x16xbf16>, vector<8x16xf32> -> vector<8x16xf32>
    %34 = arith.addf %21, %33 : vector<8x16xf32>
    %cst_19 = arith.constant dense<0.000000e+00> : vector<16xf32>
    %35 = vector.multi_reduction <add>, %34, %cst_19 [0] : vector<8x16xf32> to vector<16xf32>
    %36 = vector.shape_cast %35 : vector<16xf32> to vector<1x16xf32>
    %37 = arith.mulf %34, %34 : vector<8x16xf32>
    %cst_20 = arith.constant dense<0.000000e+00> : vector<16xf32>
    %38 = vector.multi_reduction <add>, %37, %cst_20 [0] : vector<8x16xf32> to vector<16xf32>
    %39 = vector.shape_cast %38 : vector<16xf32> to vector<1x16xf32>
    %cst_21 = arith.constant 1.250000e-01 : f32
    %40 = vector.broadcast %cst_21 : f32 to vector<1x16xf32>
    %41 = arith.mulf %36, %40 : vector<1x16xf32>
    %cst_22 = arith.constant 1.250000e-01 : f32
    %42 = vector.broadcast %cst_22 : f32 to vector<1x16xf32>
    %43 = arith.mulf %39, %42 : vector<1x16xf32>
    %44 = arith.mulf %41, %41 : vector<1x16xf32>
    %45 = arith.subf %43, %44 : vector<1x16xf32>
    %cst_23 = arith.constant 0.000000e+00 : f32
    %46 = vector.broadcast %cst_23 : f32 to vector<1x16xf32>
    %47 = arith.maximumf %45, %46 : vector<1x16xf32>
    %48 = vector.broadcast %41 : vector<1x16xf32> to vector<8x16xf32>
    %49 = arith.subf %34, %48 : vector<8x16xf32>
    %cst_24 = arith.constant 9.99999974E-6 : f32
    %50 = vector.broadcast %cst_24 : f32 to vector<1x16xf32>
    %51 = arith.addf %47, %50 : vector<1x16xf32>
    %52 = math.rsqrt %51 : vector<1x16xf32>
    %53 = vector.broadcast %52 : vector<1x16xf32> to vector<8x16xf32>
    %54 = arith.mulf %49, %53 : vector<8x16xf32>
    %55 = vector.broadcast %2 : vector<8x1xf32> to vector<8x16xf32>
    %56 = arith.mulf %54, %55 : vector<8x16xf32>
    %57 = vector.broadcast %3 : vector<8x1xf32> to vector<8x16xf32>
    %58 = arith.addf %56, %57 : vector<8x16xf32>
    %cst_25 = arith.constant 5.000000e-01 : f32
    %59 = vector.broadcast %cst_25 : f32 to vector<8x16xf32>
    %60 = arith.mulf %59, %58 : vector<8x16xf32>
    %cst_26 = arith.constant 0.707106769 : f32
    %61 = vector.broadcast %cst_26 : f32 to vector<8x16xf32>
    %62 = arith.mulf %58, %61 : vector<8x16xf32>
    %63 = math.erf %62 : vector<8x16xf32>
    %cst_27 = arith.constant 1.000000e+00 : f32
    %64 = vector.broadcast %cst_27 : f32 to vector<8x16xf32>
    %65 = arith.addf %64, %63 : vector<8x16xf32>
    %66 = arith.mulf %60, %65 : vector<8x16xf32>
    %c0_28 = arith.constant 0 : index
    %c0_29 = arith.constant 0 : index
    %67 = vector.load %arg6[%c0_28, %c0_29] : memref<16x1xf32, #tpu.memory_space<vmem>>, vector<16x1xf32>
    %c0_30 = arith.constant 0 : index
    %c0_31 = arith.constant 0 : index
    %68 = vector.load %arg7[%c0_30, %c0_31] : memref<16x1xf32, #tpu.memory_space<vmem>>, vector<16x1xf32>
    %69 = tpu.iota {dimensions = array<i32: 1>} : vector<8x16xi32>
    %c1_i32_32 = arith.constant 1 : i32
    %70 = tpu.dynamic_rotate %66 by %c1_i32_32 dim 1 : vector<8x16xf32>, i32 -> vector<8x16xf32>
    %c1_i32_33 = arith.constant 1 : i32
    %71 = vector.broadcast %c1_i32_33 : i32 to vector<8x16xi32>
    %72 = arith.cmpi sge, %69, %71 : vector<8x16xi32>
    %c17_i32_34 = arith.constant 17 : i32
    %73 = vector.broadcast %c17_i32_34 : i32 to vector<8x16xi32>
    %74 = arith.cmpi slt, %69, %73 : vector<8x16xi32>
    %75 = arith.andi %72, %74 : vector<8x16xi1>
    %cst_35 = arith.constant 0.000000e+00 : f32
    %76 = vector.broadcast %cst_35 : f32 to vector<8x16xf32>
    %77 = arith.select %75, %70, %76 : vector<8x16xi1>, vector<8x16xf32>
    %c0_36 = arith.constant 0 : index
    %c0_37 = arith.constant 0 : index
    %c0_38 = arith.constant 0 : index
    %78 = vector.load %arg5[%c0_36, %c0_37, %c0_38] : memref<3x16x8xbf16, #tpu.memory_space<vmem>>, vector<1x16x8xbf16>
    %79 = vector.shape_cast %78 : vector<1x16x8xbf16> to vector<16x8xbf16>
    %80 = arith.truncf %77 : vector<8x16xf32> to vector<8x16xbf16>
    %cst_39 = arith.constant dense<0.000000e+00> : vector<16x16xf32>
    %81 = tpu.matmul %79, %80, %cst_39 {dimension_numbers = #tpu.dot_dimension_numbers<[1], [0], [0], [1], [0, 0, 1, 1], [], []>} : vector<16x8xbf16>, vector<8x16xbf16>, vector<16x16xf32> -> vector<16x16xf32>
    %c1_40 = arith.constant 1 : index
    %c0_41 = arith.constant 0 : index
    %c0_42 = arith.constant 0 : index
    %82 = vector.load %arg5[%c1_40, %c0_41, %c0_42] : memref<3x16x8xbf16, #tpu.memory_space<vmem>>, vector<1x16x8xbf16>
    %83 = vector.shape_cast %82 : vector<1x16x8xbf16> to vector<16x8xbf16>
    %84 = arith.truncf %66 : vector<8x16xf32> to vector<8x16xbf16>
    %cst_43 = arith.constant dense<0.000000e+00> : vector<16x16xf32>
    %85 = tpu.matmul %83, %84, %cst_43 {dimension_numbers = #tpu.dot_dimension_numbers<[1], [0], [0], [1], [0, 0, 1, 1], [], []>} : vector<16x8xbf16>, vector<8x16xbf16>, vector<16x16xf32> -> vector<16x16xf32>
    %86 = arith.addf %81, %85 : vector<16x16xf32>
    %c15_i32_44 = arith.constant 15 : i32
    %87 = tpu.dynamic_rotate %66 by %c15_i32_44 dim 1 : vector<8x16xf32>, i32 -> vector<8x16xf32>
    %c-1_i32_45 = arith.constant -1 : i32
    %88 = vector.broadcast %c-1_i32_45 : i32 to vector<8x16xi32>
    %89 = arith.cmpi sge, %69, %88 : vector<8x16xi32>
    %c15_i32_46 = arith.constant 15 : i32
    %90 = vector.broadcast %c15_i32_46 : i32 to vector<8x16xi32>
    %91 = arith.cmpi slt, %69, %90 : vector<8x16xi32>
    %92 = arith.andi %89, %91 : vector<8x16xi1>
    %cst_47 = arith.constant 0.000000e+00 : f32
    %93 = vector.broadcast %cst_47 : f32 to vector<8x16xf32>
    %94 = arith.select %92, %87, %93 : vector<8x16xi1>, vector<8x16xf32>
    %c2_48 = arith.constant 2 : index
    %c0_49 = arith.constant 0 : index
    %c0_50 = arith.constant 0 : index
    %95 = vector.load %arg5[%c2_48, %c0_49, %c0_50] : memref<3x16x8xbf16, #tpu.memory_space<vmem>>, vector<1x16x8xbf16>
    %96 = vector.shape_cast %95 : vector<1x16x8xbf16> to vector<16x8xbf16>
    %97 = arith.truncf %94 : vector<8x16xf32> to vector<8x16xbf16>
    %cst_51 = arith.constant dense<0.000000e+00> : vector<16x16xf32>
    %98 = tpu.matmul %96, %97, %cst_51 {dimension_numbers = #tpu.dot_dimension_numbers<[1], [0], [0], [1], [0, 0, 1, 1], [], []>} : vector<16x8xbf16>, vector<8x16xbf16>, vector<16x16xf32> -> vector<16x16xf32>
    %99 = arith.addf %86, %98 : vector<16x16xf32>
    %cst_52 = arith.constant dense<0.000000e+00> : vector<16xf32>
    %100 = vector.multi_reduction <add>, %99, %cst_52 [0] : vector<16x16xf32> to vector<16xf32>
    %101 = vector.shape_cast %100 : vector<16xf32> to vector<1x16xf32>
    %102 = arith.mulf %99, %99 : vector<16x16xf32>
    %cst_53 = arith.constant dense<0.000000e+00> : vector<16xf32>
    %103 = vector.multi_reduction <add>, %102, %cst_53 [0] : vector<16x16xf32> to vector<16xf32>
    %104 = vector.shape_cast %103 : vector<16xf32> to vector<1x16xf32>
    %cst_54 = arith.constant 6.250000e-02 : f32
    %105 = vector.broadcast %cst_54 : f32 to vector<1x16xf32>
    %106 = arith.mulf %101, %105 : vector<1x16xf32>
    %cst_55 = arith.constant 6.250000e-02 : f32
    %107 = vector.broadcast %cst_55 : f32 to vector<1x16xf32>
    %108 = arith.mulf %104, %107 : vector<1x16xf32>
    %109 = arith.mulf %106, %106 : vector<1x16xf32>
    %110 = arith.subf %108, %109 : vector<1x16xf32>
    %cst_56 = arith.constant 0.000000e+00 : f32
    %111 = vector.broadcast %cst_56 : f32 to vector<1x16xf32>
    %112 = arith.maximumf %110, %111 : vector<1x16xf32>
    %113 = vector.broadcast %106 : vector<1x16xf32> to vector<16x16xf32>
    %114 = arith.subf %99, %113 : vector<16x16xf32>
    %cst_57 = arith.constant 9.99999974E-6 : f32
    %115 = vector.broadcast %cst_57 : f32 to vector<1x16xf32>
    %116 = arith.addf %112, %115 : vector<1x16xf32>
    %117 = math.rsqrt %116 : vector<1x16xf32>
    %118 = vector.broadcast %117 : vector<1x16xf32> to vector<16x16xf32>
    %119 = arith.mulf %114, %118 : vector<16x16xf32>
    %120 = vector.broadcast %67 : vector<16x1xf32> to vector<16x16xf32>
    %121 = arith.mulf %119, %120 : vector<16x16xf32>
    %122 = vector.broadcast %68 : vector<16x1xf32> to vector<16x16xf32>
    %123 = arith.addf %121, %122 : vector<16x16xf32>
    %cst_58 = arith.constant 5.000000e-01 : f32
    %124 = vector.broadcast %cst_58 : f32 to vector<16x16xf32>
    %125 = arith.mulf %124, %123 : vector<16x16xf32>
    %cst_59 = arith.constant 0.707106769 : f32
    %126 = vector.broadcast %cst_59 : f32 to vector<16x16xf32>
    %127 = arith.mulf %123, %126 : vector<16x16xf32>
    %128 = math.erf %127 : vector<16x16xf32>
    %cst_60 = arith.constant 1.000000e+00 : f32
    %129 = vector.broadcast %cst_60 : f32 to vector<16x16xf32>
    %130 = arith.addf %129, %128 : vector<16x16xf32>
    %131 = arith.mulf %125, %130 : vector<16x16xf32>
    %c0_61 = arith.constant 0 : index
    %c0_62 = arith.constant 0 : index
    %132 = vector.load %arg8[%c0_61, %c0_62] : memref<16x8xf32, #tpu.memory_space<vmem>>, vector<16x8xf32>
    %c15_i32_63 = arith.constant 15 : i32
    %133 = tpu.dynamic_rotate %131 by %c15_i32_63 dim 1 : vector<16x16xf32>, i32 -> vector<16x16xf32>
    %134 = arith.maximumf %131, %133 : vector<16x16xf32>
    %cst_64 = arith.constant dense<0.000000e+00> : vector<16x8xf32>
    %135 = tpu.matmul %134, %132, %cst_64 {dimension_numbers = #tpu.dot_dimension_numbers<[1], [0], [0], [1], [0, 0, 1, 1], [], []>} : vector<16x16xf32>, vector<16x8xf32>, vector<16x8xf32> -> vector<16x8xf32>
    %c0_65 = arith.constant 0 : index
    %c0_66 = arith.constant 0 : index
    %136 = vector.load %arg10[%c0_65, %c0_66] : memref<32x1xf32, #tpu.memory_space<vmem>>, vector<32x1xf32>
    %c0_67 = arith.constant 0 : index
    %c0_68 = arith.constant 0 : index
    %137 = vector.load %arg11[%c0_67, %c0_68] : memref<32x1xf32, #tpu.memory_space<vmem>>, vector<32x1xf32>
    %138 = tpu.iota {dimensions = array<i32: 1>} : vector<16x8xi32>
    %c1_i32_69 = arith.constant 1 : i32
    %139 = tpu.dynamic_rotate %135 by %c1_i32_69 dim 1 : vector<16x8xf32>, i32 -> vector<16x8xf32>
    %c1_i32_70 = arith.constant 1 : i32
    %140 = vector.broadcast %c1_i32_70 : i32 to vector<16x8xi32>
    %141 = arith.cmpi sge, %138, %140 : vector<16x8xi32>
    %c9_i32 = arith.constant 9 : i32
    %142 = vector.broadcast %c9_i32 : i32 to vector<16x8xi32>
    %143 = arith.cmpi slt, %138, %142 : vector<16x8xi32>
    %144 = arith.andi %141, %143 : vector<16x8xi1>
    %cst_71 = arith.constant 0.000000e+00 : f32
    %145 = vector.broadcast %cst_71 : f32 to vector<16x8xf32>
    %146 = arith.select %144, %139, %145 : vector<16x8xi1>, vector<16x8xf32>
    %c0_72 = arith.constant 0 : index
    %c0_73 = arith.constant 0 : index
    %c0_74 = arith.constant 0 : index
    %147 = vector.load %arg9[%c0_72, %c0_73, %c0_74] : memref<3x32x16xbf16, #tpu.memory_space<vmem>>, vector<1x32x16xbf16>
    %148 = vector.shape_cast %147 : vector<1x32x16xbf16> to vector<32x16xbf16>
    %149 = arith.truncf %146 : vector<16x8xf32> to vector<16x8xbf16>
    %cst_75 = arith.constant dense<0.000000e+00> : vector<32x8xf32>
    %150 = tpu.matmul %148, %149, %cst_75 {dimension_numbers = #tpu.dot_dimension_numbers<[1], [0], [0], [1], [0, 0, 1, 1], [], []>} : vector<32x16xbf16>, vector<16x8xbf16>, vector<32x8xf32> -> vector<32x8xf32>
    %c1_76 = arith.constant 1 : index
    %c0_77 = arith.constant 0 : index
    %c0_78 = arith.constant 0 : index
    %151 = vector.load %arg9[%c1_76, %c0_77, %c0_78] : memref<3x32x16xbf16, #tpu.memory_space<vmem>>, vector<1x32x16xbf16>
    %152 = vector.shape_cast %151 : vector<1x32x16xbf16> to vector<32x16xbf16>
    %153 = arith.truncf %135 : vector<16x8xf32> to vector<16x8xbf16>
    %cst_79 = arith.constant dense<0.000000e+00> : vector<32x8xf32>
    %154 = tpu.matmul %152, %153, %cst_79 {dimension_numbers = #tpu.dot_dimension_numbers<[1], [0], [0], [1], [0, 0, 1, 1], [], []>} : vector<32x16xbf16>, vector<16x8xbf16>, vector<32x8xf32> -> vector<32x8xf32>
    %155 = arith.addf %150, %154 : vector<32x8xf32>
    %c7_i32 = arith.constant 7 : i32
    %156 = tpu.dynamic_rotate %135 by %c7_i32 dim 1 : vector<16x8xf32>, i32 -> vector<16x8xf32>
    %c-1_i32_80 = arith.constant -1 : i32
    %157 = vector.broadcast %c-1_i32_80 : i32 to vector<16x8xi32>
    %158 = arith.cmpi sge, %138, %157 : vector<16x8xi32>
    %c7_i32_81 = arith.constant 7 : i32
    %159 = vector.broadcast %c7_i32_81 : i32 to vector<16x8xi32>
    %160 = arith.cmpi slt, %138, %159 : vector<16x8xi32>
    %161 = arith.andi %158, %160 : vector<16x8xi1>
    %cst_82 = arith.constant 0.000000e+00 : f32
    %162 = vector.broadcast %cst_82 : f32 to vector<16x8xf32>
    %163 = arith.select %161, %156, %162 : vector<16x8xi1>, vector<16x8xf32>
    %c2_83 = arith.constant 2 : index
    %c0_84 = arith.constant 0 : index
    %c0_85 = arith.constant 0 : index
    %164 = vector.load %arg9[%c2_83, %c0_84, %c0_85] : memref<3x32x16xbf16, #tpu.memory_space<vmem>>, vector<1x32x16xbf16>
    %165 = vector.shape_cast %164 : vector<1x32x16xbf16> to vector<32x16xbf16>
    %166 = arith.truncf %163 : vector<16x8xf32> to vector<16x8xbf16>
    %cst_86 = arith.constant dense<0.000000e+00> : vector<32x8xf32>
    %167 = tpu.matmul %165, %166, %cst_86 {dimension_numbers = #tpu.dot_dimension_numbers<[1], [0], [0], [1], [0, 0, 1, 1], [], []>} : vector<32x16xbf16>, vector<16x8xbf16>, vector<32x8xf32> -> vector<32x8xf32>
    %168 = arith.addf %155, %167 : vector<32x8xf32>
    %cst_87 = arith.constant dense<0.000000e+00> : vector<8xf32>
    %169 = vector.multi_reduction <add>, %168, %cst_87 [0] : vector<32x8xf32> to vector<8xf32>
    %170 = vector.shape_cast %169 : vector<8xf32> to vector<1x8xf32>
    %171 = arith.mulf %168, %168 : vector<32x8xf32>
    %cst_88 = arith.constant dense<0.000000e+00> : vector<8xf32>
    %172 = vector.multi_reduction <add>, %171, %cst_88 [0] : vector<32x8xf32> to vector<8xf32>
    %173 = vector.shape_cast %172 : vector<8xf32> to vector<1x8xf32>
    %cst_89 = arith.constant 3.125000e-02 : f32
    %174 = vector.broadcast %cst_89 : f32 to vector<1x8xf32>
    %175 = arith.mulf %170, %174 : vector<1x8xf32>
    %cst_90 = arith.constant 3.125000e-02 : f32
    %176 = vector.broadcast %cst_90 : f32 to vector<1x8xf32>
    %177 = arith.mulf %173, %176 : vector<1x8xf32>
    %178 = arith.mulf %175, %175 : vector<1x8xf32>
    %179 = arith.subf %177, %178 : vector<1x8xf32>
    %cst_91 = arith.constant 0.000000e+00 : f32
    %180 = vector.broadcast %cst_91 : f32 to vector<1x8xf32>
    %181 = arith.maximumf %179, %180 : vector<1x8xf32>
    %182 = vector.broadcast %175 : vector<1x8xf32> to vector<32x8xf32>
    %183 = arith.subf %168, %182 : vector<32x8xf32>
    %cst_92 = arith.constant 9.99999974E-6 : f32
    %184 = vector.broadcast %cst_92 : f32 to vector<1x8xf32>
    %185 = arith.addf %181, %184 : vector<1x8xf32>
    %186 = math.rsqrt %185 : vector<1x8xf32>
    %187 = vector.broadcast %186 : vector<1x8xf32> to vector<32x8xf32>
    %188 = arith.mulf %183, %187 : vector<32x8xf32>
    %189 = vector.broadcast %136 : vector<32x1xf32> to vector<32x8xf32>
    %190 = arith.mulf %188, %189 : vector<32x8xf32>
    %191 = vector.broadcast %137 : vector<32x1xf32> to vector<32x8xf32>
    %192 = arith.addf %190, %191 : vector<32x8xf32>
    %cst_93 = arith.constant 5.000000e-01 : f32
    %193 = vector.broadcast %cst_93 : f32 to vector<32x8xf32>
    %194 = arith.mulf %193, %192 : vector<32x8xf32>
    %cst_94 = arith.constant 0.707106769 : f32
    %195 = vector.broadcast %cst_94 : f32 to vector<32x8xf32>
    %196 = arith.mulf %192, %195 : vector<32x8xf32>
    %197 = math.erf %196 : vector<32x8xf32>
    %cst_95 = arith.constant 1.000000e+00 : f32
    %198 = vector.broadcast %cst_95 : f32 to vector<32x8xf32>
    %199 = arith.addf %198, %197 : vector<32x8xf32>
    %200 = arith.mulf %194, %199 : vector<32x8xf32>
    %c0_96 = arith.constant 0 : index
    %c0_97 = arith.constant 0 : index
    %201 = vector.load %arg12[%c0_96, %c0_97] : memref<8x4xf32, #tpu.memory_space<vmem>>, vector<8x4xf32>
    %c7_i32_98 = arith.constant 7 : i32
    %202 = tpu.dynamic_rotate %200 by %c7_i32_98 dim 1 : vector<32x8xf32>, i32 -> vector<32x8xf32>
    %203 = arith.maximumf %200, %202 : vector<32x8xf32>
    %cst_99 = arith.constant dense<0.000000e+00> : vector<32x4xf32>
    %204 = tpu.matmul %203, %201, %cst_99 {dimension_numbers = #tpu.dot_dimension_numbers<[1], [0], [0], [1], [0, 0, 1, 1], [], []>} : vector<32x8xf32>, vector<8x4xf32>, vector<32x4xf32> -> vector<32x4xf32>
    %c0_100 = arith.constant 0 : index
    %c0_101 = arith.constant 0 : index
    %205 = vector.load %arg14[%c0_100, %c0_101] : memref<32x1xf32, #tpu.memory_space<vmem>>, vector<32x1xf32>
    %c0_102 = arith.constant 0 : index
    %c0_103 = arith.constant 0 : index
    %206 = vector.load %arg15[%c0_102, %c0_103] : memref<32x1xf32, #tpu.memory_space<vmem>>, vector<32x1xf32>
    %207 = tpu.iota {dimensions = array<i32: 1>} : vector<32x4xi32>
    %c1_i32_104 = arith.constant 1 : i32
    %208 = tpu.dynamic_rotate %204 by %c1_i32_104 dim 1 : vector<32x4xf32>, i32 -> vector<32x4xf32>
    %c1_i32_105 = arith.constant 1 : i32
    %209 = vector.broadcast %c1_i32_105 : i32 to vector<32x4xi32>
    %210 = arith.cmpi sge, %207, %209 : vector<32x4xi32>
    %c5_i32 = arith.constant 5 : i32
    %211 = vector.broadcast %c5_i32 : i32 to vector<32x4xi32>
    %212 = arith.cmpi slt, %207, %211 : vector<32x4xi32>
    %213 = arith.andi %210, %212 : vector<32x4xi1>
    %cst_106 = arith.constant 0.000000e+00 : f32
    %214 = vector.broadcast %cst_106 : f32 to vector<32x4xf32>
    %215 = arith.select %213, %208, %214 : vector<32x4xi1>, vector<32x4xf32>
    %c0_107 = arith.constant 0 : index
    %c0_108 = arith.constant 0 : index
    %c0_109 = arith.constant 0 : index
    %216 = vector.load %arg13[%c0_107, %c0_108, %c0_109] : memref<3x32x32xbf16, #tpu.memory_space<vmem>>, vector<1x32x32xbf16>
    %217 = vector.shape_cast %216 : vector<1x32x32xbf16> to vector<32x32xbf16>
    %218 = arith.truncf %215 : vector<32x4xf32> to vector<32x4xbf16>
    %cst_110 = arith.constant dense<0.000000e+00> : vector<32x4xf32>
    %219 = tpu.matmul %217, %218, %cst_110 {dimension_numbers = #tpu.dot_dimension_numbers<[1], [0], [0], [1], [0, 0, 1, 1], [], []>} : vector<32x32xbf16>, vector<32x4xbf16>, vector<32x4xf32> -> vector<32x4xf32>
    %c1_111 = arith.constant 1 : index
    %c0_112 = arith.constant 0 : index
    %c0_113 = arith.constant 0 : index
    %220 = vector.load %arg13[%c1_111, %c0_112, %c0_113] : memref<3x32x32xbf16, #tpu.memory_space<vmem>>, vector<1x32x32xbf16>
    %221 = vector.shape_cast %220 : vector<1x32x32xbf16> to vector<32x32xbf16>
    %222 = arith.truncf %204 : vector<32x4xf32> to vector<32x4xbf16>
    %cst_114 = arith.constant dense<0.000000e+00> : vector<32x4xf32>
    %223 = tpu.matmul %221, %222, %cst_114 {dimension_numbers = #tpu.dot_dimension_numbers<[1], [0], [0], [1], [0, 0, 1, 1], [], []>} : vector<32x32xbf16>, vector<32x4xbf16>, vector<32x4xf32> -> vector<32x4xf32>
    %224 = arith.addf %219, %223 : vector<32x4xf32>
    %c3_i32 = arith.constant 3 : i32
    %225 = tpu.dynamic_rotate %204 by %c3_i32 dim 1 : vector<32x4xf32>, i32 -> vector<32x4xf32>
    %c-1_i32_115 = arith.constant -1 : i32
    %226 = vector.broadcast %c-1_i32_115 : i32 to vector<32x4xi32>
    %227 = arith.cmpi sge, %207, %226 : vector<32x4xi32>
    %c3_i32_116 = arith.constant 3 : i32
    %228 = vector.broadcast %c3_i32_116 : i32 to vector<32x4xi32>
    %229 = arith.cmpi slt, %207, %228 : vector<32x4xi32>
    %230 = arith.andi %227, %229 : vector<32x4xi1>
    %cst_117 = arith.constant 0.000000e+00 : f32
    %231 = vector.broadcast %cst_117 : f32 to vector<32x4xf32>
    %232 = arith.select %230, %225, %231 : vector<32x4xi1>, vector<32x4xf32>
    %c2_118 = arith.constant 2 : index
    %c0_119 = arith.constant 0 : index
    %c0_120 = arith.constant 0 : index
    %233 = vector.load %arg13[%c2_118, %c0_119, %c0_120] : memref<3x32x32xbf16, #tpu.memory_space<vmem>>, vector<1x32x32xbf16>
    %234 = vector.shape_cast %233 : vector<1x32x32xbf16> to vector<32x32xbf16>
    %235 = arith.truncf %232 : vector<32x4xf32> to vector<32x4xbf16>
    %cst_121 = arith.constant dense<0.000000e+00> : vector<32x4xf32>
    %236 = tpu.matmul %234, %235, %cst_121 {dimension_numbers = #tpu.dot_dimension_numbers<[1], [0], [0], [1], [0, 0, 1, 1], [], []>} : vector<32x32xbf16>, vector<32x4xbf16>, vector<32x4xf32> -> vector<32x4xf32>
    %237 = arith.addf %224, %236 : vector<32x4xf32>
    %cst_122 = arith.constant dense<0.000000e+00> : vector<4xf32>
    %238 = vector.multi_reduction <add>, %237, %cst_122 [0] : vector<32x4xf32> to vector<4xf32>
    %239 = vector.shape_cast %238 : vector<4xf32> to vector<1x4xf32>
    %240 = arith.mulf %237, %237 : vector<32x4xf32>
    %cst_123 = arith.constant dense<0.000000e+00> : vector<4xf32>
    %241 = vector.multi_reduction <add>, %240, %cst_123 [0] : vector<32x4xf32> to vector<4xf32>
    %242 = vector.shape_cast %241 : vector<4xf32> to vector<1x4xf32>
    %cst_124 = arith.constant 3.125000e-02 : f32
    %243 = vector.broadcast %cst_124 : f32 to vector<1x4xf32>
    %244 = arith.mulf %239, %243 : vector<1x4xf32>
    %cst_125 = arith.constant 3.125000e-02 : f32
    %245 = vector.broadcast %cst_125 : f32 to vector<1x4xf32>
    %246 = arith.mulf %242, %245 : vector<1x4xf32>
    %247 = arith.mulf %244, %244 : vector<1x4xf32>
    %248 = arith.subf %246, %247 : vector<1x4xf32>
    %cst_126 = arith.constant 0.000000e+00 : f32
    %249 = vector.broadcast %cst_126 : f32 to vector<1x4xf32>
    %250 = arith.maximumf %248, %249 : vector<1x4xf32>
    %251 = vector.broadcast %244 : vector<1x4xf32> to vector<32x4xf32>
    %252 = arith.subf %237, %251 : vector<32x4xf32>
    %cst_127 = arith.constant 9.99999974E-6 : f32
    %253 = vector.broadcast %cst_127 : f32 to vector<1x4xf32>
    %254 = arith.addf %250, %253 : vector<1x4xf32>
    %255 = math.rsqrt %254 : vector<1x4xf32>
    %256 = vector.broadcast %255 : vector<1x4xf32> to vector<32x4xf32>
    %257 = arith.mulf %252, %256 : vector<32x4xf32>
    %258 = vector.broadcast %205 : vector<32x1xf32> to vector<32x4xf32>
    %259 = arith.mulf %257, %258 : vector<32x4xf32>
    %260 = vector.broadcast %206 : vector<32x1xf32> to vector<32x4xf32>
    %261 = arith.addf %259, %260 : vector<32x4xf32>
    %cst_128 = arith.constant 5.000000e-01 : f32
    %262 = vector.broadcast %cst_128 : f32 to vector<32x4xf32>
    %263 = arith.mulf %262, %261 : vector<32x4xf32>
    %cst_129 = arith.constant 0.707106769 : f32
    %264 = vector.broadcast %cst_129 : f32 to vector<32x4xf32>
    %265 = arith.mulf %261, %264 : vector<32x4xf32>
    %266 = math.erf %265 : vector<32x4xf32>
    %cst_130 = arith.constant 1.000000e+00 : f32
    %267 = vector.broadcast %cst_130 : f32 to vector<32x4xf32>
    %268 = arith.addf %267, %266 : vector<32x4xf32>
    %269 = arith.mulf %263, %268 : vector<32x4xf32>
    %c0_131 = arith.constant 0 : index
    %c0_132 = arith.constant 0 : index
    %270 = vector.load %arg16[%c0_131, %c0_132] : memref<4x2xf32, #tpu.memory_space<vmem>>, vector<4x2xf32>
    %c3_i32_133 = arith.constant 3 : i32
    %271 = tpu.dynamic_rotate %269 by %c3_i32_133 dim 1 : vector<32x4xf32>, i32 -> vector<32x4xf32>
    %272 = arith.maximumf %269, %271 : vector<32x4xf32>
    %cst_134 = arith.constant dense<0.000000e+00> : vector<32x2xf32>
    %273 = tpu.matmul %272, %270, %cst_134 {dimension_numbers = #tpu.dot_dimension_numbers<[1], [0], [0], [1], [0, 0, 1, 1], [], []>} : vector<32x4xf32>, vector<4x2xf32>, vector<32x2xf32> -> vector<32x2xf32>
    %c0_135 = arith.constant 0 : index
    %c0_136 = arith.constant 0 : index
    %274 = vector.load %arg18[%c0_135, %c0_136] : memref<32x1xf32, #tpu.memory_space<vmem>>, vector<32x1xf32>
    %c0_137 = arith.constant 0 : index
    %c0_138 = arith.constant 0 : index
    %275 = vector.load %arg19[%c0_137, %c0_138] : memref<32x1xf32, #tpu.memory_space<vmem>>, vector<32x1xf32>
    %276 = tpu.iota {dimensions = array<i32: 1>} : vector<32x2xi32>
    %c1_i32_139 = arith.constant 1 : i32
    %277 = tpu.dynamic_rotate %273 by %c1_i32_139 dim 1 : vector<32x2xf32>, i32 -> vector<32x2xf32>
    %c1_i32_140 = arith.constant 1 : i32
    %278 = vector.broadcast %c1_i32_140 : i32 to vector<32x2xi32>
    %279 = arith.cmpi sge, %276, %278 : vector<32x2xi32>
    %c3_i32_141 = arith.constant 3 : i32
    %280 = vector.broadcast %c3_i32_141 : i32 to vector<32x2xi32>
    %281 = arith.cmpi slt, %276, %280 : vector<32x2xi32>
    %282 = arith.andi %279, %281 : vector<32x2xi1>
    %cst_142 = arith.constant 0.000000e+00 : f32
    %283 = vector.broadcast %cst_142 : f32 to vector<32x2xf32>
    %284 = arith.select %282, %277, %283 : vector<32x2xi1>, vector<32x2xf32>
    %c0_143 = arith.constant 0 : index
    %c0_144 = arith.constant 0 : index
    %c0_145 = arith.constant 0 : index
    %285 = vector.load %arg17[%c0_143, %c0_144, %c0_145] : memref<3x32x32xbf16, #tpu.memory_space<vmem>>, vector<1x32x32xbf16>
    %286 = vector.shape_cast %285 : vector<1x32x32xbf16> to vector<32x32xbf16>
    %287 = arith.truncf %284 : vector<32x2xf32> to vector<32x2xbf16>
    %cst_146 = arith.constant dense<0.000000e+00> : vector<32x2xf32>
    %288 = tpu.matmul %286, %287, %cst_146 {dimension_numbers = #tpu.dot_dimension_numbers<[1], [0], [0], [1], [0, 0, 1, 1], [], []>} : vector<32x32xbf16>, vector<32x2xbf16>, vector<32x2xf32> -> vector<32x2xf32>
    %c1_147 = arith.constant 1 : index
    %c0_148 = arith.constant 0 : index
    %c0_149 = arith.constant 0 : index
    %289 = vector.load %arg17[%c1_147, %c0_148, %c0_149] : memref<3x32x32xbf16, #tpu.memory_space<vmem>>, vector<1x32x32xbf16>
    %290 = vector.shape_cast %289 : vector<1x32x32xbf16> to vector<32x32xbf16>
    %291 = arith.truncf %273 : vector<32x2xf32> to vector<32x2xbf16>
    %cst_150 = arith.constant dense<0.000000e+00> : vector<32x2xf32>
    %292 = tpu.matmul %290, %291, %cst_150 {dimension_numbers = #tpu.dot_dimension_numbers<[1], [0], [0], [1], [0, 0, 1, 1], [], []>} : vector<32x32xbf16>, vector<32x2xbf16>, vector<32x2xf32> -> vector<32x2xf32>
    %293 = arith.addf %288, %292 : vector<32x2xf32>
    %c1_i32_151 = arith.constant 1 : i32
    %294 = tpu.dynamic_rotate %273 by %c1_i32_151 dim 1 : vector<32x2xf32>, i32 -> vector<32x2xf32>
    %c-1_i32_152 = arith.constant -1 : i32
    %295 = vector.broadcast %c-1_i32_152 : i32 to vector<32x2xi32>
    %296 = arith.cmpi sge, %276, %295 : vector<32x2xi32>
    %c1_i32_153 = arith.constant 1 : i32
    %297 = vector.broadcast %c1_i32_153 : i32 to vector<32x2xi32>
    %298 = arith.cmpi slt, %276, %297 : vector<32x2xi32>
    %299 = arith.andi %296, %298 : vector<32x2xi1>
    %cst_154 = arith.constant 0.000000e+00 : f32
    %300 = vector.broadcast %cst_154 : f32 to vector<32x2xf32>
    %301 = arith.select %299, %294, %300 : vector<32x2xi1>, vector<32x2xf32>
    %c2_155 = arith.constant 2 : index
    %c0_156 = arith.constant 0 : index
    %c0_157 = arith.constant 0 : index
    %302 = vector.load %arg17[%c2_155, %c0_156, %c0_157] : memref<3x32x32xbf16, #tpu.memory_space<vmem>>, vector<1x32x32xbf16>
    %303 = vector.shape_cast %302 : vector<1x32x32xbf16> to vector<32x32xbf16>
    %304 = arith.truncf %301 : vector<32x2xf32> to vector<32x2xbf16>
    %cst_158 = arith.constant dense<0.000000e+00> : vector<32x2xf32>
    %305 = tpu.matmul %303, %304, %cst_158 {dimension_numbers = #tpu.dot_dimension_numbers<[1], [0], [0], [1], [0, 0, 1, 1], [], []>} : vector<32x32xbf16>, vector<32x2xbf16>, vector<32x2xf32> -> vector<32x2xf32>
    %306 = arith.addf %293, %305 : vector<32x2xf32>
    %cst_159 = arith.constant dense<0.000000e+00> : vector<2xf32>
    %307 = vector.multi_reduction <add>, %306, %cst_159 [0] : vector<32x2xf32> to vector<2xf32>
    %308 = vector.shape_cast %307 : vector<2xf32> to vector<1x2xf32>
    %309 = arith.mulf %306, %306 : vector<32x2xf32>
    %cst_160 = arith.constant dense<0.000000e+00> : vector<2xf32>
    %310 = vector.multi_reduction <add>, %309, %cst_160 [0] : vector<32x2xf32> to vector<2xf32>
    %311 = vector.shape_cast %310 : vector<2xf32> to vector<1x2xf32>
    %cst_161 = arith.constant 3.125000e-02 : f32
    %312 = vector.broadcast %cst_161 : f32 to vector<1x2xf32>
    %313 = arith.mulf %308, %312 : vector<1x2xf32>
    %cst_162 = arith.constant 3.125000e-02 : f32
    %314 = vector.broadcast %cst_162 : f32 to vector<1x2xf32>
    %315 = arith.mulf %311, %314 : vector<1x2xf32>
    %316 = arith.mulf %313, %313 : vector<1x2xf32>
    %317 = arith.subf %315, %316 : vector<1x2xf32>
    %cst_163 = arith.constant 0.000000e+00 : f32
    %318 = vector.broadcast %cst_163 : f32 to vector<1x2xf32>
    %319 = arith.maximumf %317, %318 : vector<1x2xf32>
    %320 = vector.broadcast %313 : vector<1x2xf32> to vector<32x2xf32>
    %321 = arith.subf %306, %320 : vector<32x2xf32>
    %cst_164 = arith.constant 9.99999974E-6 : f32
    %322 = vector.broadcast %cst_164 : f32 to vector<1x2xf32>
    %323 = arith.addf %319, %322 : vector<1x2xf32>
    %324 = math.rsqrt %323 : vector<1x2xf32>
    %325 = vector.broadcast %324 : vector<1x2xf32> to vector<32x2xf32>
    %326 = arith.mulf %321, %325 : vector<32x2xf32>
    %327 = vector.broadcast %274 : vector<32x1xf32> to vector<32x2xf32>
    %328 = arith.mulf %326, %327 : vector<32x2xf32>
    %329 = vector.broadcast %275 : vector<32x1xf32> to vector<32x2xf32>
    %330 = arith.addf %328, %329 : vector<32x2xf32>
    %cst_165 = arith.constant 5.000000e-01 : f32
    %331 = vector.broadcast %cst_165 : f32 to vector<32x2xf32>
    %332 = arith.mulf %331, %330 : vector<32x2xf32>
    %cst_166 = arith.constant 0.707106769 : f32
    %333 = vector.broadcast %cst_166 : f32 to vector<32x2xf32>
    %334 = arith.mulf %330, %333 : vector<32x2xf32>
    %335 = math.erf %334 : vector<32x2xf32>
    %cst_167 = arith.constant 1.000000e+00 : f32
    %336 = vector.broadcast %cst_167 : f32 to vector<32x2xf32>
    %337 = arith.addf %336, %335 : vector<32x2xf32>
    %338 = arith.mulf %332, %337 : vector<32x2xf32>
    %c0_168 = arith.constant 0 : index
    %c0_169 = arith.constant 0 : index
    %339 = vector.load %arg20[%c0_168, %c0_169] : memref<2x4xf32, #tpu.memory_space<vmem>>, vector<2x4xf32>
    %cst_170 = arith.constant dense<0.000000e+00> : vector<32x4xf32>
    %340 = tpu.matmul %338, %339, %cst_170 {dimension_numbers = #tpu.dot_dimension_numbers<[1], [0], [0], [1], [0, 0, 1, 1], [], []>} : vector<32x2xf32>, vector<2x4xf32>, vector<32x4xf32> -> vector<32x4xf32>
    %c0_171 = arith.constant 0 : index
    %c0_172 = arith.constant 0 : index
    %341 = vector.load %arg22[%c0_171, %c0_172] : memref<16x1xf32, #tpu.memory_space<vmem>>, vector<16x1xf32>
    %c0_173 = arith.constant 0 : index
    %c0_174 = arith.constant 0 : index
    %342 = vector.load %arg23[%c0_173, %c0_174] : memref<16x1xf32, #tpu.memory_space<vmem>>, vector<16x1xf32>
    %343 = tpu.iota {dimensions = array<i32: 1>} : vector<32x4xi32>
    %c1_i32_175 = arith.constant 1 : i32
    %344 = tpu.dynamic_rotate %340 by %c1_i32_175 dim 1 : vector<32x4xf32>, i32 -> vector<32x4xf32>
    %c1_i32_176 = arith.constant 1 : i32
    %345 = vector.broadcast %c1_i32_176 : i32 to vector<32x4xi32>
    %346 = arith.cmpi sge, %343, %345 : vector<32x4xi32>
    %c5_i32_177 = arith.constant 5 : i32
    %347 = vector.broadcast %c5_i32_177 : i32 to vector<32x4xi32>
    %348 = arith.cmpi slt, %343, %347 : vector<32x4xi32>
    %349 = arith.andi %346, %348 : vector<32x4xi1>
    %cst_178 = arith.constant 0.000000e+00 : f32
    %350 = vector.broadcast %cst_178 : f32 to vector<32x4xf32>
    %351 = arith.select %349, %344, %350 : vector<32x4xi1>, vector<32x4xf32>
    %c0_179 = arith.constant 0 : index
    %c0_180 = arith.constant 0 : index
    %c0_181 = arith.constant 0 : index
    %352 = vector.load %arg21[%c0_179, %c0_180, %c0_181] : memref<3x16x32xbf16, #tpu.memory_space<vmem>>, vector<1x16x32xbf16>
    %353 = vector.shape_cast %352 : vector<1x16x32xbf16> to vector<16x32xbf16>
    %354 = arith.truncf %351 : vector<32x4xf32> to vector<32x4xbf16>
    %cst_182 = arith.constant dense<0.000000e+00> : vector<16x4xf32>
    %355 = tpu.matmul %353, %354, %cst_182 {dimension_numbers = #tpu.dot_dimension_numbers<[1], [0], [0], [1], [0, 0, 1, 1], [], []>} : vector<16x32xbf16>, vector<32x4xbf16>, vector<16x4xf32> -> vector<16x4xf32>
    %c1_183 = arith.constant 1 : index
    %c0_184 = arith.constant 0 : index
    %c0_185 = arith.constant 0 : index
    %356 = vector.load %arg21[%c1_183, %c0_184, %c0_185] : memref<3x16x32xbf16, #tpu.memory_space<vmem>>, vector<1x16x32xbf16>
    %357 = vector.shape_cast %356 : vector<1x16x32xbf16> to vector<16x32xbf16>
    %358 = arith.truncf %340 : vector<32x4xf32> to vector<32x4xbf16>
    %cst_186 = arith.constant dense<0.000000e+00> : vector<16x4xf32>
    %359 = tpu.matmul %357, %358, %cst_186 {dimension_numbers = #tpu.dot_dimension_numbers<[1], [0], [0], [1], [0, 0, 1, 1], [], []>} : vector<16x32xbf16>, vector<32x4xbf16>, vector<16x4xf32> -> vector<16x4xf32>
    %360 = arith.addf %355, %359 : vector<16x4xf32>
    %c3_i32_187 = arith.constant 3 : i32
    %361 = tpu.dynamic_rotate %340 by %c3_i32_187 dim 1 : vector<32x4xf32>, i32 -> vector<32x4xf32>
    %c-1_i32_188 = arith.constant -1 : i32
    %362 = vector.broadcast %c-1_i32_188 : i32 to vector<32x4xi32>
    %363 = arith.cmpi sge, %343, %362 : vector<32x4xi32>
    %c3_i32_189 = arith.constant 3 : i32
    %364 = vector.broadcast %c3_i32_189 : i32 to vector<32x4xi32>
    %365 = arith.cmpi slt, %343, %364 : vector<32x4xi32>
    %366 = arith.andi %363, %365 : vector<32x4xi1>
    %cst_190 = arith.constant 0.000000e+00 : f32
    %367 = vector.broadcast %cst_190 : f32 to vector<32x4xf32>
    %368 = arith.select %366, %361, %367 : vector<32x4xi1>, vector<32x4xf32>
    %c2_191 = arith.constant 2 : index
    %c0_192 = arith.constant 0 : index
    %c0_193 = arith.constant 0 : index
    %369 = vector.load %arg21[%c2_191, %c0_192, %c0_193] : memref<3x16x32xbf16, #tpu.memory_space<vmem>>, vector<1x16x32xbf16>
    %370 = vector.shape_cast %369 : vector<1x16x32xbf16> to vector<16x32xbf16>
    %371 = arith.truncf %368 : vector<32x4xf32> to vector<32x4xbf16>
    %cst_194 = arith.constant dense<0.000000e+00> : vector<16x4xf32>
    %372 = tpu.matmul %370, %371, %cst_194 {dimension_numbers = #tpu.dot_dimension_numbers<[1], [0], [0], [1], [0, 0, 1, 1], [], []>} : vector<16x32xbf16>, vector<32x4xbf16>, vector<16x4xf32> -> vector<16x4xf32>
    %373 = arith.addf %360, %372 : vector<16x4xf32>
    %cst_195 = arith.constant dense<0.000000e+00> : vector<4xf32>
    %374 = vector.multi_reduction <add>, %373, %cst_195 [0] : vector<16x4xf32> to vector<4xf32>
    %375 = vector.shape_cast %374 : vector<4xf32> to vector<1x4xf32>
    %376 = arith.mulf %373, %373 : vector<16x4xf32>
    %cst_196 = arith.constant dense<0.000000e+00> : vector<4xf32>
    %377 = vector.multi_reduction <add>, %376, %cst_196 [0] : vector<16x4xf32> to vector<4xf32>
    %378 = vector.shape_cast %377 : vector<4xf32> to vector<1x4xf32>
    %cst_197 = arith.constant 6.250000e-02 : f32
    %379 = vector.broadcast %cst_197 : f32 to vector<1x4xf32>
    %380 = arith.mulf %375, %379 : vector<1x4xf32>
    %cst_198 = arith.constant 6.250000e-02 : f32
    %381 = vector.broadcast %cst_198 : f32 to vector<1x4xf32>
    %382 = arith.mulf %378, %381 : vector<1x4xf32>
    %383 = arith.mulf %380, %380 : vector<1x4xf32>
    %384 = arith.subf %382, %383 : vector<1x4xf32>
    %cst_199 = arith.constant 0.000000e+00 : f32
    %385 = vector.broadcast %cst_199 : f32 to vector<1x4xf32>
    %386 = arith.maximumf %384, %385 : vector<1x4xf32>
    %387 = vector.broadcast %380 : vector<1x4xf32> to vector<16x4xf32>
    %388 = arith.subf %373, %387 : vector<16x4xf32>
    %cst_200 = arith.constant 9.99999974E-6 : f32
    %389 = vector.broadcast %cst_200 : f32 to vector<1x4xf32>
    %390 = arith.addf %386, %389 : vector<1x4xf32>
    %391 = math.rsqrt %390 : vector<1x4xf32>
    %392 = vector.broadcast %391 : vector<1x4xf32> to vector<16x4xf32>
    %393 = arith.mulf %388, %392 : vector<16x4xf32>
    %394 = vector.broadcast %341 : vector<16x1xf32> to vector<16x4xf32>
    %395 = arith.mulf %393, %394 : vector<16x4xf32>
    %396 = vector.broadcast %342 : vector<16x1xf32> to vector<16x4xf32>
    %397 = arith.addf %395, %396 : vector<16x4xf32>
    %cst_201 = arith.constant 5.000000e-01 : f32
    %398 = vector.broadcast %cst_201 : f32 to vector<16x4xf32>
    %399 = arith.mulf %398, %397 : vector<16x4xf32>
    %cst_202 = arith.constant 0.707106769 : f32
    %400 = vector.broadcast %cst_202 : f32 to vector<16x4xf32>
    %401 = arith.mulf %397, %400 : vector<16x4xf32>
    %402 = math.erf %401 : vector<16x4xf32>
    %cst_203 = arith.constant 1.000000e+00 : f32
    %403 = vector.broadcast %cst_203 : f32 to vector<16x4xf32>
    %404 = arith.addf %403, %402 : vector<16x4xf32>
    %405 = arith.mulf %399, %404 : vector<16x4xf32>
    %c0_204 = arith.constant 0 : index
    %c0_205 = arith.constant 0 : index
    %406 = vector.load %arg24[%c0_204, %c0_205] : memref<4x8xf32, #tpu.memory_space<vmem>>, vector<4x8xf32>
    %cst_206 = arith.constant dense<0.000000e+00> : vector<16x8xf32>
    %407 = tpu.matmul %405, %406, %cst_206 {dimension_numbers = #tpu.dot_dimension_numbers<[1], [0], [0], [1], [0, 0, 1, 1], [], []>} : vector<16x4xf32>, vector<4x8xf32>, vector<16x8xf32> -> vector<16x8xf32>
    %c0_207 = arith.constant 0 : index
    %c0_208 = arith.constant 0 : index
    %408 = vector.load %arg26[%c0_207, %c0_208] : memref<8x1xf32, #tpu.memory_space<vmem>>, vector<8x1xf32>
    %c0_209 = arith.constant 0 : index
    %c0_210 = arith.constant 0 : index
    %409 = vector.load %arg27[%c0_209, %c0_210] : memref<8x1xf32, #tpu.memory_space<vmem>>, vector<8x1xf32>
    %410 = tpu.iota {dimensions = array<i32: 1>} : vector<16x8xi32>
    %c1_i32_211 = arith.constant 1 : i32
    %411 = tpu.dynamic_rotate %407 by %c1_i32_211 dim 1 : vector<16x8xf32>, i32 -> vector<16x8xf32>
    %c1_i32_212 = arith.constant 1 : i32
    %412 = vector.broadcast %c1_i32_212 : i32 to vector<16x8xi32>
    %413 = arith.cmpi sge, %410, %412 : vector<16x8xi32>
    %c9_i32_213 = arith.constant 9 : i32
    %414 = vector.broadcast %c9_i32_213 : i32 to vector<16x8xi32>
    %415 = arith.cmpi slt, %410, %414 : vector<16x8xi32>
    %416 = arith.andi %413, %415 : vector<16x8xi1>
    %cst_214 = arith.constant 0.000000e+00 : f32
    %417 = vector.broadcast %cst_214 : f32 to vector<16x8xf32>
    %418 = arith.select %416, %411, %417 : vector<16x8xi1>, vector<16x8xf32>
    %c0_215 = arith.constant 0 : index
    %c0_216 = arith.constant 0 : index
    %c0_217 = arith.constant 0 : index
    %419 = vector.load %arg25[%c0_215, %c0_216, %c0_217] : memref<3x8x16xbf16, #tpu.memory_space<vmem>>, vector<1x8x16xbf16>
    %420 = vector.shape_cast %419 : vector<1x8x16xbf16> to vector<8x16xbf16>
    %421 = arith.truncf %418 : vector<16x8xf32> to vector<16x8xbf16>
    %cst_218 = arith.constant dense<0.000000e+00> : vector<8x8xf32>
    %422 = tpu.matmul %420, %421, %cst_218 {dimension_numbers = #tpu.dot_dimension_numbers<[1], [0], [0], [1], [0, 0, 1, 1], [], []>} : vector<8x16xbf16>, vector<16x8xbf16>, vector<8x8xf32> -> vector<8x8xf32>
    %c1_219 = arith.constant 1 : index
    %c0_220 = arith.constant 0 : index
    %c0_221 = arith.constant 0 : index
    %423 = vector.load %arg25[%c1_219, %c0_220, %c0_221] : memref<3x8x16xbf16, #tpu.memory_space<vmem>>, vector<1x8x16xbf16>
    %424 = vector.shape_cast %423 : vector<1x8x16xbf16> to vector<8x16xbf16>
    %425 = arith.truncf %407 : vector<16x8xf32> to vector<16x8xbf16>
    %cst_222 = arith.constant dense<0.000000e+00> : vector<8x8xf32>
    %426 = tpu.matmul %424, %425, %cst_222 {dimension_numbers = #tpu.dot_dimension_numbers<[1], [0], [0], [1], [0, 0, 1, 1], [], []>} : vector<8x16xbf16>, vector<16x8xbf16>, vector<8x8xf32> -> vector<8x8xf32>
    %427 = arith.addf %422, %426 : vector<8x8xf32>
    %c7_i32_223 = arith.constant 7 : i32
    %428 = tpu.dynamic_rotate %407 by %c7_i32_223 dim 1 : vector<16x8xf32>, i32 -> vector<16x8xf32>
    %c-1_i32_224 = arith.constant -1 : i32
    %429 = vector.broadcast %c-1_i32_224 : i32 to vector<16x8xi32>
    %430 = arith.cmpi sge, %410, %429 : vector<16x8xi32>
    %c7_i32_225 = arith.constant 7 : i32
    %431 = vector.broadcast %c7_i32_225 : i32 to vector<16x8xi32>
    %432 = arith.cmpi slt, %410, %431 : vector<16x8xi32>
    %433 = arith.andi %430, %432 : vector<16x8xi1>
    %cst_226 = arith.constant 0.000000e+00 : f32
    %434 = vector.broadcast %cst_226 : f32 to vector<16x8xf32>
    %435 = arith.select %433, %428, %434 : vector<16x8xi1>, vector<16x8xf32>
    %c2_227 = arith.constant 2 : index
    %c0_228 = arith.constant 0 : index
    %c0_229 = arith.constant 0 : index
    %436 = vector.load %arg25[%c2_227, %c0_228, %c0_229] : memref<3x8x16xbf16, #tpu.memory_space<vmem>>, vector<1x8x16xbf16>
    %437 = vector.shape_cast %436 : vector<1x8x16xbf16> to vector<8x16xbf16>
    %438 = arith.truncf %435 : vector<16x8xf32> to vector<16x8xbf16>
    %cst_230 = arith.constant dense<0.000000e+00> : vector<8x8xf32>
    %439 = tpu.matmul %437, %438, %cst_230 {dimension_numbers = #tpu.dot_dimension_numbers<[1], [0], [0], [1], [0, 0, 1, 1], [], []>} : vector<8x16xbf16>, vector<16x8xbf16>, vector<8x8xf32> -> vector<8x8xf32>
    %440 = arith.addf %427, %439 : vector<8x8xf32>
    %cst_231 = arith.constant dense<0.000000e+00> : vector<8xf32>
    %441 = vector.multi_reduction <add>, %440, %cst_231 [0] : vector<8x8xf32> to vector<8xf32>
    %442 = vector.shape_cast %441 : vector<8xf32> to vector<1x8xf32>
    %443 = arith.mulf %440, %440 : vector<8x8xf32>
    %cst_232 = arith.constant dense<0.000000e+00> : vector<8xf32>
    %444 = vector.multi_reduction <add>, %443, %cst_232 [0] : vector<8x8xf32> to vector<8xf32>
    %445 = vector.shape_cast %444 : vector<8xf32> to vector<1x8xf32>
    %cst_233 = arith.constant 1.250000e-01 : f32
    %446 = vector.broadcast %cst_233 : f32 to vector<1x8xf32>
    %447 = arith.mulf %442, %446 : vector<1x8xf32>
    %cst_234 = arith.constant 1.250000e-01 : f32
    %448 = vector.broadcast %cst_234 : f32 to vector<1x8xf32>
    %449 = arith.mulf %445, %448 : vector<1x8xf32>
    %450 = arith.mulf %447, %447 : vector<1x8xf32>
    %451 = arith.subf %449, %450 : vector<1x8xf32>
    %cst_235 = arith.constant 0.000000e+00 : f32
    %452 = vector.broadcast %cst_235 : f32 to vector<1x8xf32>
    %453 = arith.maximumf %451, %452 : vector<1x8xf32>
    %454 = vector.broadcast %447 : vector<1x8xf32> to vector<8x8xf32>
    %455 = arith.subf %440, %454 : vector<8x8xf32>
    %cst_236 = arith.constant 9.99999974E-6 : f32
    %456 = vector.broadcast %cst_236 : f32 to vector<1x8xf32>
    %457 = arith.addf %453, %456 : vector<1x8xf32>
    %458 = math.rsqrt %457 : vector<1x8xf32>
    %459 = vector.broadcast %458 : vector<1x8xf32> to vector<8x8xf32>
    %460 = arith.mulf %455, %459 : vector<8x8xf32>
    %461 = vector.broadcast %408 : vector<8x1xf32> to vector<8x8xf32>
    %462 = arith.mulf %460, %461 : vector<8x8xf32>
    %463 = vector.broadcast %409 : vector<8x1xf32> to vector<8x8xf32>
    %464 = arith.addf %462, %463 : vector<8x8xf32>
    %cst_237 = arith.constant 5.000000e-01 : f32
    %465 = vector.broadcast %cst_237 : f32 to vector<8x8xf32>
    %466 = arith.mulf %465, %464 : vector<8x8xf32>
    %cst_238 = arith.constant 0.707106769 : f32
    %467 = vector.broadcast %cst_238 : f32 to vector<8x8xf32>
    %468 = arith.mulf %464, %467 : vector<8x8xf32>
    %469 = math.erf %468 : vector<8x8xf32>
    %cst_239 = arith.constant 1.000000e+00 : f32
    %470 = vector.broadcast %cst_239 : f32 to vector<8x8xf32>
    %471 = arith.addf %470, %469 : vector<8x8xf32>
    %472 = arith.mulf %466, %471 : vector<8x8xf32>
    %c0_240 = arith.constant 0 : index
    %c0_241 = arith.constant 0 : index
    %473 = vector.load %arg28[%c0_240, %c0_241] : memref<8x16xf32, #tpu.memory_space<vmem>>, vector<8x16xf32>
    %cst_242 = arith.constant dense<0.000000e+00> : vector<8x16xf32>
    %474 = tpu.matmul %472, %473, %cst_242 {dimension_numbers = #tpu.dot_dimension_numbers<[1], [0], [0], [1], [0, 0, 1, 1], [], []>} : vector<8x8xf32>, vector<8x16xf32>, vector<8x16xf32> -> vector<8x16xf32>
    %c0_243 = arith.constant 0 : index
    %c0_244 = arith.constant 0 : index
    %475 = vector.load %arg29[%c0_243, %c0_244] : memref<5x8xbf16, #tpu.memory_space<vmem>>, vector<5x8xbf16>
    %c0_245 = arith.constant 0 : index
    %c0_246 = arith.constant 0 : index
    %476 = vector.load %arg30[%c0_245, %c0_246] : memref<5x1xf32, #tpu.memory_space<vmem>>, vector<5x1xf32>
    %477 = arith.truncf %474 : vector<8x16xf32> to vector<8x16xbf16>
    %cst_247 = arith.constant dense<0.000000e+00> : vector<5x16xf32>
    %478 = tpu.matmul %475, %477, %cst_247 {dimension_numbers = #tpu.dot_dimension_numbers<[1], [0], [0], [1], [0, 0, 1, 1], [], []>} : vector<5x8xbf16>, vector<8x16xbf16>, vector<5x16xf32> -> vector<5x16xf32>
    %479 = vector.broadcast %476 : vector<5x1xf32> to vector<5x16xf32>
    %480 = arith.addf %478, %479 : vector<5x16xf32>
    %c0_248 = arith.constant 0 : index
    %c0_249 = arith.constant 0 : index
    %c0_250 = arith.constant 0 : index
    %481 = vector.load %arg31[%c0_248, %c0_249, %c0_250] : memref<1x5x16xf32, #tpu.memory_space<vmem>>, vector<1x5x16xf32>
    %482 = vector.shape_cast %481 : vector<1x5x16xf32> to vector<5x16xf32>
    %483 = vector.shape_cast %480 : vector<5x16xf32> to vector<1x5x16xf32>
    tpu.vector_store %arg31[%c0_248, %c0_249, %c0_250], %483 {strides = array<i32>} : memref<1x5x16xf32, #tpu.memory_space<vmem>>, vector<1x5x16xf32>,
    return
  }
  func.func @transform_0(%arg0: i32) -> (i32, i32, i32) {
    %c0_i32 = arith.constant 0 : i32
    %c0_i32_0 = arith.constant 0 : i32
    %c0_i32_1 = arith.constant 0 : i32
    return %arg0, %c0_i32, %c0_i32_0 : i32, i32, i32
  }
  func.func @transform_1(%arg0: i32) -> (i32, i32, i32) {
    %c0_i32 = arith.constant 0 : i32
    %c0_i32_0 = arith.constant 0 : i32
    %c0_i32_1 = arith.constant 0 : i32
    %c0_i32_2 = arith.constant 0 : i32
    return %c0_i32, %c0_i32_0, %c0_i32_1 : i32, i32, i32
  }
  func.func @transform_2(%arg0: i32) -> (i32, i32) {
    %c0_i32 = arith.constant 0 : i32
    %c0_i32_0 = arith.constant 0 : i32
    %c0_i32_1 = arith.constant 0 : i32
    return %c0_i32, %c0_i32_0 : i32, i32
  }
  func.func @transform_3(%arg0: i32) -> (i32, i32) {
    %c0_i32 = arith.constant 0 : i32
    %c0_i32_0 = arith.constant 0 : i32
    %c0_i32_1 = arith.constant 0 : i32
    return %c0_i32, %c0_i32_0 : i32, i32
  }
  func.func @transform_4(%arg0: i32) -> (i32, i32, i32) {
    %c0_i32 = arith.constant 0 : i32
    %c0_i32_0 = arith.constant 0 : i32
    %c0_i32_1 = arith.constant 0 : i32
    %c0_i32_2 = arith.constant 0 : i32
    return %c0_i32, %c0_i32_0, %c0_i32_1 : i32, i32, i32
  }
  func.func @transform_5(%arg0: i32) -> (i32, i32) {
    %c0_i32 = arith.constant 0 : i32
    %c0_i32_0 = arith.constant 0 : i32
    %c0_i32_1 = arith.constant 0 : i32
    return %c0_i32, %c0_i32_0 : i32, i32
  }
  func.func @transform_6(%arg0: i32) -> (i32, i32) {
    %c0_i32 = arith.constant 0 : i32
    %c0_i32_0 = arith.constant 0 : i32
    %c0_i32_1 = arith.constant 0 : i32
    return %c0_i32, %c0_i32_0 : i32, i32
  }
  func.func @transform_7(%arg0: i32) -> (i32, i32) {
    %c0_i32 = arith.constant 0 : i32
    %c0_i32_0 = arith.constant 0 : i32
    %c0_i32_1 = arith.constant 0 : i32
    return %c0_i32, %c0_i32_0 : i32, i32
  }
  func.func @transform_8(%arg0: i32) -> (i32, i32, i32) {
    %c0_i32 = arith.constant 0 : i32
    %c0_i32_0 = arith.constant 0 : i32
    %c0_i32_1 = arith.constant 0 : i32
    %c0_i32_2 = arith.constant 0 : i32
    return %c0_i32, %c0_i32_0, %c0_i32_1 : i32, i32, i32
  }
  func.func @transform_9(%arg0: i32) -> (i32, i32) {
    %c0_i32 = arith.constant 0 : i32
    %c0_i32_0 = arith.constant 0 : i32
    %c0_i32_1 = arith.constant 0 : i32
    return %c0_i32, %c0_i32_0 : i32, i32
  }
  func.func @transform_10(%arg0: i32) -> (i32, i32) {
    %c0_i32 = arith.constant 0 : i32
    %c0_i32_0 = arith.constant 0 : i32
    %c0_i32_1 = arith.constant 0 : i32
    return %c0_i32, %c0_i32_0 : i32, i32
  }
  func.func @transform_11(%arg0: i32) -> (i32, i32) {
    %c0_i32 = arith.constant 0 : i32
    %c0_i32_0 = arith.constant 0 : i32
    %c0_i32_1 = arith.constant 0 : i32
    return %c0_i32, %c0_i32_0 : i32, i32
  }
  func.func @transform_12(%arg0: i32) -> (i32, i32, i32) {
    %c0_i32 = arith.constant 0 : i32
    %c0_i32_0 = arith.constant 0 : i32
    %c0_i32_1 = arith.constant 0 : i32
    %c0_i32_2 = arith.constant 0 : i32
    return %c0_i32, %c0_i32_0, %c0_i32_1 : i32, i32, i32
  }
  func.func @transform_13(%arg0: i32) -> (i32, i32) {
    %c0_i32 = arith.constant 0 : i32
    %c0_i32_0 = arith.constant 0 : i32
    %c0_i32_1 = arith.constant 0 : i32
    return %c0_i32, %c0_i32_0 : i32, i32
  }
  func.func @transform_14(%arg0: i32) -> (i32, i32) {
    %c0_i32 = arith.constant 0 : i32
    %c0_i32_0 = arith.constant 0 : i32
    %c0_i32_1 = arith.constant 0 : i32
    return %c0_i32, %c0_i32_0 : i32, i32
  }
  func.func @transform_15(%arg0: i32) -> (i32, i32) {
    %c0_i32 = arith.constant 0 : i32
    %c0_i32_0 = arith.constant 0 : i32
    %c0_i32_1 = arith.constant 0 : i32
    return %c0_i32, %c0_i32_0 : i32, i32
  }
  func.func @transform_16(%arg0: i32) -> (i32, i32, i32) {
    %c0_i32 = arith.constant 0 : i32
    %c0_i32_0 = arith.constant 0 : i32
    %c0_i32_1 = arith.constant 0 : i32
    %c0_i32_2 = arith.constant 0 : i32
    return %c0_i32, %c0_i32_0, %c0_i32_1 : i32, i32, i32
  }
  func.func @transform_17(%arg0: i32) -> (i32, i32) {
    %c0_i32 = arith.constant 0 : i32
    %c0_i32_0 = arith.constant 0 : i32
    %c0_i32_1 = arith.constant 0 : i32
    return %c0_i32, %c0_i32_0 : i32, i32
  }
  func.func @transform_18(%arg0: i32) -> (i32, i32) {
    %c0_i32 = arith.constant 0 : i32
    %c0_i32_0 = arith.constant 0 : i32
    %c0_i32_1 = arith.constant 0 : i32
    return %c0_i32, %c0_i32_0 : i32, i32
  }
  func.func @transform_19(%arg0: i32) -> (i32, i32) {
    %c0_i32 = arith.constant 0 : i32
    %c0_i32_0 = arith.constant 0 : i32
    %c0_i32_1 = arith.constant 0 : i32
    return %c0_i32, %c0_i32_0 : i32, i32
  }
  func.func @transform_20(%arg0: i32) -> (i32, i32, i32) {
    %c0_i32 = arith.constant 0 : i32
    %c0_i32_0 = arith.constant 0 : i32
    %c0_i32_1 = arith.constant 0 : i32
    %c0_i32_2 = arith.constant 0 : i32
    return %c0_i32, %c0_i32_0, %c0_i32_1 : i32, i32, i32
  }
  func.func @transform_21(%arg0: i32) -> (i32, i32) {
    %c0_i32 = arith.constant 0 : i32
    %c0_i32_0 = arith.constant 0 : i32
    %c0_i32_1 = arith.constant 0 : i32
    return %c0_i32, %c0_i32_0 : i32, i32
  }
  func.func @transform_22(%arg0: i32) -> (i32, i32) {
    %c0_i32 = arith.constant 0 : i32
    %c0_i32_0 = arith.constant 0 : i32
    %c0_i32_1 = arith.constant 0 : i32
    return %c0_i32, %c0_i32_0 : i32, i32
  }
  func.func @transform_23(%arg0: i32) -> (i32, i32) {
    %c0_i32 = arith.constant 0 : i32
    %c0_i32_0 = arith.constant 0 : i32
    %c0_i32_1 = arith.constant 0 : i32
    return %c0_i32, %c0_i32_0 : i32, i32
  }
  func.func @transform_24(%arg0: i32) -> (i32, i32, i32) {
    %c0_i32 = arith.constant 0 : i32
    %c0_i32_0 = arith.constant 0 : i32
    %c0_i32_1 = arith.constant 0 : i32
    %c0_i32_2 = arith.constant 0 : i32
    return %c0_i32, %c0_i32_0, %c0_i32_1 : i32, i32, i32
  }
  func.func @transform_25(%arg0: i32) -> (i32, i32) {
    %c0_i32 = arith.constant 0 : i32
    %c0_i32_0 = arith.constant 0 : i32
    %c0_i32_1 = arith.constant 0 : i32
    return %c0_i32, %c0_i32_0 : i32, i32
  }
  func.func @transform_26(%arg0: i32) -> (i32, i32) {
    %c0_i32 = arith.constant 0 : i32
    %c0_i32_0 = arith.constant 0 : i32
    %c0_i32_1 = arith.constant 0 : i32
    return %c0_i32, %c0_i32_0 : i32, i32
  }
  func.func @transform_27(%arg0: i32) -> (i32, i32) {
    %c0_i32 = arith.constant 0 : i32
    %c0_i32_0 = arith.constant 0 : i32
    %c0_i32_1 = arith.constant 0 : i32
    return %c0_i32, %c0_i32_0 : i32, i32
  }
  func.func @transform_28(%arg0: i32) -> (i32, i32) {
    %c0_i32 = arith.constant 0 : i32
    %c0_i32_0 = arith.constant 0 : i32
    %c0_i32_1 = arith.constant 0 : i32
    return %c0_i32, %c0_i32_0 : i32, i32
  }
  func.func @transform_29(%arg0: i32) -> (i32, i32) {
    %c0_i32 = arith.constant 0 : i32
    %c0_i32_0 = arith.constant 0 : i32
    %c0_i32_1 = arith.constant 0 : i32
    return %c0_i32, %c0_i32_0 : i32, i32
  }
  func.func @transform_30(%arg0: i32) -> (i32, i32, i32) {
    %c0_i32 = arith.constant 0 : i32
    %c0_i32_0 = arith.constant 0 : i32
    %c0_i32_1 = arith.constant 0 : i32
    return %arg0, %c0_i32, %c0_i32_0 : i32, i32, i32
  }
}

</mosaic_0001>

<bundles_post_ra>
// kernel: tpu_custom_call.1
= control target key start
LH: loop header
LB: loop body
LE: loop exit
PB: predicated region body
PF: predicated region fallthrough
CT: control target
= control target key end

     0   :  { %s4691_s6 = smov 1   ;;  %s4692_s10 = smov 2   ;;  %s5332_s0 = inlined_call_operand.smem [shape: u32[31], index: -1, kind: input, shape index: {}] }
   0x1   :  { %s4740_s5 = sld [smem:[%s5332_s0]]   ;;  %s4693_s14 = smov 3  }
   0x2   :  { %s4745_s9 = sld [smem:[%s5332_s0 + %s4691_s6]]   ;;  %s4694_s18 = smov 4  }
   0x3   :  { %s4750_s13 = sld [smem:[%s5332_s0 + %s4692_s10]]   ;;  %s4695_s22 = smov 5  }
   0x4   :  { %s4755_s17 = sld [smem:[%s5332_s0 + %s4693_s14]]   ;;  %s4696_s26 = smov 6  }
   0x5   :  { %s4760_s21 = sld [smem:[%s5332_s0 + %s4694_s18]]   ;;  %s4697_s30 = smov 7  }
   0x6   :  { %s4765_s25 = sld [smem:[%s5332_s0 + %s4695_s22]]   ;;  %s4698_s4 = smov 8  }
   0x7   :  { %s4770_s29 = sld [smem:[%s5332_s0 + %s4696_s26]]   ;;  %s4699_s10 = smov 9  }
   0x8   :  { %s4775_s3 = sld [smem:[%s5332_s0 + %s4697_s30]]   ;;  %s4700_s15 = smov 10  }
   0x9   :  { %s4780_s8 = sld [smem:[%s5332_s0 + %s4698_s4]]   ;;  %s4701_s20 = smov 11  }
   0xa   :  { %s4785_s14 = sld [smem:[%s5332_s0 + %s4699_s10]]   ;;  %s4702_s26 = smov 12  }
   0xb   :  { %s4790_s19 = sld [smem:[%s5332_s0 + %s4700_s15]]   ;;  %s4703_s1 = smov 13  }
   0xc   :  { %s4795_s24 = sld [smem:[%s5332_s0 + %s4701_s20]]   ;;  %s4704_s7 = smov 14  }
   0xd   :  { %s4800_s30 = sld [smem:[%s5332_s0 + %s4702_s26]]   ;;  %s4705_s15 = smov 15  }
   0xe   :  { %s4805_s6 = sld [smem:[%s5332_s0 + %s4703_s1]]   ;;  %s4706_s22 = smov 16  }
   0xf   :  { %s4810_s12 = sld [smem:[%s5332_s0 + %s4704_s7]]   ;;  %s4707_s28 = smov 17  }
  0x10   :  { %s4815_s20 = sld [smem:[%s5332_s0 + %s4705_s15]]   ;;  %s4708_s7 = smov 18  }
  0x11   :  { %s4820_s27 = sld [smem:[%s5332_s0 + %s4706_s22]]   ;;  %s4709_s15 = smov 19  }
  0x12   :  { %s4825_s4 = sld [smem:[%s5332_s0 + %s4707_s28]]   ;;  %s4710_s22 = smov 20  }
  0x13   :  { %s4711_s28 = smov 21  }
  0x15   :  { %5347 = sst [smem:[#allocation2_spill]] %s4810_s12 }
  0x16   :  { %5348 = sst [smem:[#allocation3_spill]] %s4815_s20 }
  0x17   :  { %5349 = sst [smem:[#allocation4_spill]] %s4820_s27 }
  0x18   :  { %5350 = sst [smem:[#allocation5_spill]] %s4825_s4 }
  0x19   :  { %s4830_s12 = sld [smem:[%s5332_s0 + %s4708_s7]]   ;;  %s4712_s7 = smov 22  }
  0x1a   :  { %s4835_s20 = sld [smem:[%s5332_s0 + %s4709_s15]]   ;;  %s4713_s15 = smov 23  }
  0x1b   :  { %s4840_s27 = sld [smem:[%s5332_s0 + %s4710_s22]]   ;;  %s4714_s22 = smov 24  }
  0x1c   :  { %s4845_s4 = sld [smem:[%s5332_s0 + %s4711_s28]]   ;;  %s4715_s28 = smov 25  }
  0x1f   :  { %5351 = sst [smem:[#allocation6_spill]] %s4830_s12 }
  0x20   :  { %5352 = sst [smem:[#allocation7_spill]] %s4835_s20 }
  0x21   :  { %5353 = sst [smem:[#allocation8_spill]] %s4840_s27 }
  0x22   :  { %5354 = sst [smem:[#allocation9_spill]] %s4845_s4 }
  0x23   :  { %s4850_s12 = sld [smem:[%s5332_s0 + %s4712_s7]]   ;;  %s4716_s7 = smov 26  }
  0x24   :  { %s4855_s20 = sld [smem:[%s5332_s0 + %s4713_s15]]   ;;  %s4717_s15 = smov 27  }
  0x25   :  { %s4860_s27 = sld [smem:[%s5332_s0 + %s4714_s22]]   ;;  %s4718_s22 = smov 28  }
  0x26   :  { %s4865_s4 = sld [smem:[%s5332_s0 + %s4715_s28]]   ;;  %s4719_s28 = smov 29  }
  0x29   :  { %5355 = sst [smem:[#allocation10_spill]] %s4850_s12 }
  0x2a   :  { %5356 = sst [smem:[#allocation11_spill]] %s4855_s20 }
  0x2b   :  { %5357 = sst [smem:[#allocation12_spill]] %s4860_s27 }
  0x2c   :  { %5358 = sst [smem:[#allocation13_spill]] %s4865_s4 }
  0x2d   :  { %s4870_s12 = sld [smem:[%s5332_s0 + %s4716_s7]]   ;;  %s4720_s7 = smov 30  }
  0x2e   :  { %s4875_s20 = sld [smem:[%s5332_s0 + %s4717_s15]]   ;;  %s4892_s15 = smov 0  }
  0x2f   :  { %s4880_s27 = sld [smem:[%s5332_s0 + %s4718_s22]]  }
  0x30   :  { %s4885_s4 = sld [smem:[%s5332_s0 + %s4719_s28]]  }
  0x33   :  { %5359 = sst [smem:[#allocation14_spill]] %s4870_s12 }
  0x34   :  { %s4890_s12 = sld [smem:[%s5332_s0 + %s4720_s7]]  }
  0x35 LB: > { %s3875_s16 = sadd.s32 4294967295, %s4689_s15   ;;  %p3879_p0 = scmp.ge.s32.totalorder %s4689_s15, 1  ;;  %s4689_s15 = sphi %s4892_s15, %s71_s15  }
  0x36   : > { %p843_p1 = scmp.lt.s32.totalorder %s4689_s15, 3 }
  0x38   : > { %p844_p2 = pnand %p3879_p0, %p843_p1 }
  0x39   : > { %p920_p3 = scmp.lt.s32.totalorder (!%p844_p2), %s3875_s16, 1  ;;  %s4721_s22 = smov (!%p844_p2), 16   ;;  %vm936_vm0 = vcmask (!%p844_p2), 1047680   ;;  %v4722_v9 = vmov (!%p844_p2), 0.0   ;;  %vm4723_vm1 = vmmov (!%p844_p2), 0   ;;  %vm5342_vm2 = vcmask (!%p844_p2), 130048  }
  0x3a   : > { %847 = sbr.rel (%p844_p2) target bundleno = 7179 (0x1c0b), region = 140  ;;  %4137 = vmatprep.subr.bf16.mxu0 (!%p844_p2), %v4722_v9  ;;  %4139 = vmatprep.mubr.msk.bf16.mxu0 (!%p844_p2), %vm4723_vm1, %v4722_v9  ;;  %v3883_v11 = vld [vmem:[%s4745_s9 + $0x4] sm:$0xf] (!%p844_p2)  ;;  %s4724_s23 = smov (!%p844_p2), 113   ;;  %v4726_v20 = vmov (!%p844_p2), 0   ;;  %v934_v21 = vlaneseq (!%p844_p2)  ;;  %vm1184_vm9 = vcmask (!%p844_p2), 1043456  }
  0x3b   : > { %4155 = vmatprep.subr.bf16.mxu1 (!%p844_p2), %v4722_v9  ;;  %4157 = vmatprep.mubr.msk.bf16.mxu1 (!%p844_p2), %vm4723_vm1, %v4722_v9  ;;  %s5344_s26 = smov (!%p844_p2), 127   ;;  %v932_v18 = vld [vmem:[%s4750_s13] sm:$0xff] (!%p844_p2)  ;;  %v3889_v33 = vld [vmem:[%s4745_s9 + $0x8] sm:$0xf] (!%p844_p2)  ;;  %vm5341_vm10 = vcmask (!%p844_p2), 64512   ;;  %s4727_s28 = smov (!%p844_p2), 8  }
  0x3c   : > { %v933_v19 = vld [vmem:[%s4755_s17] sm:$0xff] (!%p844_p2)  ;;  %4457 = vset.pattern.permute.xlu0 (!%p844_p2), %v4726_v20  ;;  %4458 = vset.pattern.permute.xlu1 (!%p844_p2), %v4726_v20  ;;  %v4925_v22 = vand.u32 (!%p844_p2), 127, %v934_v21  ;;  %vm1521_vm11 = vcmask (!%p844_p2), 1047616   ;;  %s5343_s1 = smov (!%p844_p2), 121   ;;  %s4729_s2 = smov (!%p844_p2), 4  }
  0x3d   : > { %v962_v31 = vld [vmem:[%s4745_s9] sm:$0xf] (!%p844_p2)  ;;  %s5366_s7 = sld [smem:[#allocation2_spill]] (!%p844_p2)  ;;  %s4730_s10 = smov (!%p844_p2), 125  }
  0x3e   : > { %vm949_vm3 = vcmp.ge.s32.totalorder (!%p844_p2), %v4925_v22, 1  ;;  %vm950_vm4 = vcmp.lt.s32.totalorder (!%p844_p2), %v4925_v22, 17  ;;  %vm1055_vm7 = vcmp.lt.s32.totalorder (!%p844_p2), %v4925_v22, 15  ;;  %vm1534_vm12 = vcmp.lt.s32.totalorder (!%p844_p2), %v4925_v22, 9  ;;  %s5371_s11 = sld [smem:[#allocation3_spill]] (!%p844_p2) }
  0x3f   : > { %vm4931_vm5 = vmand (!%p844_p2), %vm949_vm3, %vm950_vm4  ;;  %vm1687_vm14 = vcmp.lt.s32.totalorder (!%p844_p2), %v4925_v22, 7  ;;  %vm2035_vm4 = vcmask (!%p844_p2), 1047584  }
  0x40   : > { %vm3885_vm6 = vmpackc.low (!%p844_p2), %vm4931_vm5, %vm4931_vm5 }
  0x41   : > { %s5393_s16 = smov (!%p920_p3, %s3875_s16), 1  ;;  %vm3890_vm8 = vmpackc.low %vm1055_vm7, %vm1055_vm7 }
  0x42   : > { %s4050_s0 = sshll.u32 %s5393_s16, 4  ;;  %vm1535_vm13 = vmand %vm949_vm3, %vm1534_vm12  ;;  %vm2226_vm12 = vcmp.lt.s32.totalorder %v4925_v22, 3 }
  0x43   : > { %s924_s18 = scalar_lea.vmem %s4740_s5, %s4050_s0  ;;  %vm5024_vm15 = vmpackc.low %vm1535_vm13, %vm1535_vm13  ;;  %s4731_s0 = smov 2  }
  0x44   : > { %v930_v0 = vld [vmem:[%s924_s18] sm:$0xff]  ;;  %v931_v1 = vld [vmem:[%s924_s18 + $0x8] sm:$0xff]  ;;  %vm5124_vm13 = vmpackc.low %vm2226_vm12, %vm2226_vm12  ;;  %s5372_s18 = sld [smem:[#allocation4_spill]] }
  0x45   : > { %v4437_v2 = vpack.i.bf16 %v931_v1, %v930_v0  ;;  %v966_v6 = vpack.c.bf16 %v931_v1, %v930_v0 }
  0x47   : > { %4438 = vrot.lane.b32.xlu0 %v4437_v2, %s4721_s22  ;;  %4138 = vmatpush3.bf16.msra.mxu0 %v966_v6 }
  0x48   : > { %4143 = vmatprep.subr.bf16.mxu0 %v4722_v9 }
  0x4a   : > { %4140 = vmatmul.mubr.msk.bf16.vlgmr.msra.gmra.mrb[0].mxu0 %vm5342_vm2, %v3883_v11 }
  0x4b   : > { %4145 = vmatprep.mubr.msk.bf16.mxu0 %vm4723_vm1, %v4722_v9 }
  0xb9   : > { %v4439_v3 = vpop.permute.xlu0 %4438 }
  0xba   : > { %v4441_v4 = vunpack.i.h.bf16 %v4439_v3  ;;  %v4440_v5 = vunpack.i.l.bf16 %v4439_v3 }
  0xbc   : > { %v939_v7 = vsel %vm936_vm0, %v4440_v5, %v930_v0  ;;  %v942_v8 = vsel %vm936_vm0, %v4441_v4, %v931_v1 }
  0xbd   : > { %v4442_v10 = vpack.i.bf16 %v942_v8, %v939_v7 }
  0xbf   : > { %4443 = vrot.lane.b32.xlu0 %v4442_v10, %s4721_s22  ;;  %v4609_v10 = vld [vmem:[%s4760_s21 + $0x8] sm:$0xff]  }
  0xc3   : > { %1138 = vperm.xlu0 %4457, %v932_v18   ;;  %v1155_v18 = vld [vmem:[%s4770_s29] sm:$0xff] }
 0x131   : > { %v4444_v12 = vpop.permute.xlu0 %4443 }
 0x132   : > { %v4446_v13 = vunpack.i.h.bf16 %v4444_v12  ;;  %v4445_v14 = vunpack.i.l.bf16 %v4444_v12 }
 0x134   : > { %v947_v15 = vsel %vm936_vm0, %v4445_v14, %v930_v0  ;;  %v948_v16 = vsel %vm936_vm0, %v4446_v13, %v931_v1 }
 0x135   : > { %v4447_v17 = vpack.i.bf16 %v948_v16, %v947_v15  ;;  %v1154_v15 = vld [vmem:[%s4765_s25 + $0x8] sm:$0xff]  ;;  %v1153_v16 = vld [vmem:[%s4765_s25] sm:$0xff] }
 0x137   : > { %4448 = vrot.lane.b32.xlu1 %v4447_v17, %s4724_s23 }
 0x13b   : > { %4453 = vrot.lane.b32.xlu1 %v4447_v17, %s5344_s26  ;;  %v1156_v17 = vld [vmem:[%s4770_s29 + $0x8] sm:$0xff] }
 0x13f   : > { %1144 = vperm.xlu1 %4458, %v933_v19  }
 0x142   : > { %v1139_v61 = vpop.permute.xlu0 %1138 }
 0x1a9   : > { %v4449_v24 = vpop.permute.xlu1 %4448 }
 0x1aa   : > { %v4451_v25 = vunpack.i.h.bf16 %v4449_v24  ;;  %v4450_v26 = vunpack.i.l.bf16 %v4449_v24 }
 0x1ac   : > { %v3886_v27 = vpack.c.bf16 %v4451_v25, %v4450_v26 }
 0x1ad   : > { %v4454_v28 = vpop.permute.xlu1 %4453 }
 0x1ae   : > { %v4456_v29 = vunpack.i.h.bf16 %v4454_v28  ;;  %v4455_v30 = vunpack.i.l.bf16 %v4454_v28  ;;  %4144 = vmatpush3.bf16.msk.msra.mxu0 %vm3885_vm6, %v3886_v27  ;;  %v4610_v28 = vld [vmem:[%s4760_s21] sm:$0xff]   ;;  %vm2060_vm6 = vcmp.lt.s32.totalorder %v4925_v22, 5 }
 0x1af   : > { %4149 = vmatprep.subr.bf16.mxu0 %v4722_v9 }
 0x1b0   : > { %v3891_v32 = vpack.c.bf16 %v4456_v29, %v4455_v30  ;;  %v4611_v30 = vld [vmem:[%s4760_s21 + $0x10] sm:$0xff]  }
 0x1b1   : > { %4146 = vmatmul.mubr.msk.bf16.vlgmr.msra.gmra.mrb[0].mxu0 %vm5342_vm2, %v962_v31 }
 0x1b2   : > { %4150 = vmatpush3.bf16.msk.msra.mxu0 %vm3890_vm8, %v3891_v32  ;;  %4151 = vmatprep.mubr.msk.bf16.mxu0 %vm4723_vm1, %v4722_v9 }
 0x1bd   : > { %4152 = vmatmul.mubr.msk.bf16.vlgmr.msra.gmra.mrb[0].mxu0 %vm5342_vm2, %v3889_v33 }
 0x1be   : > { %v1145_v63 = vpop.permute.xlu1 %1144 }
 0x290   : > { %v1105_v34 = vpop.f32.mrb[0].mxu0 }
 0x291   : > { %v1112_v35 = vsel %vm5342_vm2, %v1105_v34, 0.0  ;;  %v1119_v36 = vmul.f32 %v1105_v34, %v1105_v34  ;;  %v4153_v37 = vpop.f32.mrb[1].mxu0 }
 0x292   : > { %v1113_v38 = vrot.slane %v1112_v35, 4  ;;  %v1108_v39 = vpop.f32.mrb[2].mxu0 }
 0x293   : > { %v1120_v40 = vsel %vm5342_vm2, %v1119_v36, 0.0  ;;  %v4154_v41 = vpop.f32.mrb[3].mxu0 }
 0x294   : > { %v1114_v42 = vadd.f32 %v1113_v38, %v1112_v35  ;;  %v1121_v43 = vrot.slane %v1120_v40, 4 }
 0x296   : > { %v1115_v44 = vrot.slane %v1114_v42, 2  ;;  %v1122_v45 = vadd.f32 %v1121_v43, %v1120_v40 }
 0x298   : > { %v1116_v46 = vadd.f32 %v1115_v44, %v1114_v42  ;;  %v1123_v47 = vrot.slane %v1122_v45, 2 }
 0x29a   : > { %v1117_v48 = vrot.slane %v1116_v46, 1  ;;  %v1124_v49 = vadd.f32 %v1123_v47, %v1122_v45 }
 0x29c   : > { %v1118_v50 = vadd.f32 %v1117_v48, %v1116_v46  ;;  %v1125_v51 = vrot.slane %v1124_v49, 1 }
 0x29e   : > { %v1126_v52 = vadd.f32 %v1125_v51, %v1124_v49  ;;  %v1127_v53 = vmul.f32 0.125, %v1118_v50 }
 0x2a0   : > { %v1128_v54 = vmul.f32 0.125, %v1126_v52  ;;  %v1129_v55 = vmul.f32 %v1127_v53, %v1127_v53  ;;  %v1132_v59 = vsub.f32 %v1105_v34, %v1127_v53 }
 0x2a2   : > { %v1130_v56 = vsub.f32 %v1128_v54, %v1129_v55 }
 0x2a4   : > { %v1131_v57 = vmax.f32 %v1130_v56, 0.0 }
 0x2a6   : > { %v1133_v58 = vadd.f32 1e-05, %v1131_v57 }
 0x2a8   : > { %4633 = vrsqrt.f32 %v1133_v58 }
 0x2b2   : > { %v4634_v60 = vpop.eup %4633 }
 0x2b3   : > { %v1135_v62 = vmul.f32 %v4634_v60, %v1132_v59 }
 0x2b5   : > { %v1141_v0 = vmul.f32 %v1139_v61, %v1135_v62 }
 0x2b7   : > { %v1147_v1 = vadd.f32 %v1145_v63, %v1141_v0 }
 0x2b9   : > { %v1149_v2 = vmul.f32 0.70710677, %v1147_v1  ;;  %v1148_v4 = vmul.f32 0.5, %v1147_v1 }
 0x2bb   : > { %4635 = verf.f32 %v1149_v2 }
 0x2c5   : > { %v4636_v3 = vpop.eup %4635 }
 0x2c6   : > { %v1151_v5 = vadd.f32 1.0, %v4636_v3 }
 0x2c8   : > { %v1152_v6 = vmul.f32 %v1151_v5, %v1148_v4 }
 0x2ca   : > { %1157 = vrot.lane.b32.xlu1 %v1152_v6, %s4721_s22  ;;  %v1174_v7 = vpack.c.bf16 %v1152_v6, %v1152_v6 }
 0x2cc   : > { %v1186_v8 = vsel %vm1184_vm9, %v1174_v7, 0 }
 0x2cd   : > { %4156 = vmatpush3.bf16.msra.mxu1 %v1186_v8 }
 0x2ce   : > { %4161 = vmatprep.subr.bf16.mxu1 %v4722_v9 }
 0x2d0   : > { %4158 = vmatmul.mubr.msk.bf16.vlgmr.msra.gmra.mrb[0].mxu1 %vm5341_vm10, %v4609_v10 }
 0x2d1   : > { %4163 = vmatprep.mubr.msk.bf16.mxu1 %vm4723_vm1, %v4722_v9 }
 0x33c   : > { %v1158_v11 = vpop.permute.xlu1 %1157 }
 0x33d   : > { %v1159_v12 = vsel %vm936_vm0, %v1158_v11, %v1152_v6 }
 0x33e   : > { %1160 = vrot.lane.b32.xlu0 %v1159_v12, %s4721_s22 }
 0x3b0   : > { %v1161_v13 = vpop.permute.xlu0 %1160 }
 0x3b1   : > { %v1162_v14 = vsel %vm936_vm0, %v1161_v13, %v1152_v6 }
 0x3b2   : > { %1281 = vrot.lane.b32.xlu0 %v1162_v14, %s5344_s26  ;;  %1164 = vrot.lane.b32.xlu1 %v1162_v14, %s4724_s23  ;;  %s5374_s23 = sld [smem:[#allocation6_spill]] }
 0x3b6   : > { %1381 = vperm.xlu0 %4457, %v1154_v15   ;;  %1376 = vperm.xlu1 %4458, %v1153_v16  }
 0x3ba   : > { %1393 = vperm.xlu0 %4457, %v1156_v17   ;;  %1388 = vperm.xlu1 %4458, %v1155_v18  }
 0x424   : > { %v1282_v19 = vpop.permute.xlu0 %1281  ;;  %v1165_v20 = vpop.permute.xlu1 %1164 }
 0x425   : > { %v1284_v21 = vsel %vm1055_vm7, %v1282_v19, 0.0  ;;  %v1167_v24 = vsel %vm4931_vm5, %v1165_v20, 0.0  ;;  %v1408_v20 = vld [vmem:[%s4775_s3] sm:$0xff]  ;;  %vm2105_vm5 = vcmask 261120   ;;  %vm2061_vm7 = vmand %vm949_vm3, %vm2060_vm6  ;;  %vm2587_vm6 = vcmask 1047568  }
 0x426   : > { %v1170_v25 = vpack.c.bf16 %v1167_v24, %v1167_v24  ;;  %v1288_v26 = vpack.c.bf16 %v1284_v21, %v1284_v21  ;;  %v1409_v21 = vld [vmem:[%s4775_s3 + $0x8] sm:$0xff]  ;;  %vm5112_vm8 = vmpackc.low %vm2061_vm7, %vm2061_vm7 }
 0x427   : > { %v4328_v24 = vpack.c.bf16 %v1409_v21, %v1408_v20  ;;  %vm2612_vm7 = vmand %vm949_vm3, %vm2226_vm12  ;;  %vm2985_vm3 = vcmask 1041408   ;;  %vm3790_vm12 = vcmask 126976  }
 0x428   : > { %v1238_v27 = vsel %vm1184_vm9, %v1170_v25, 0  ;;  %v1298_v29 = vsel %vm1184_vm9, %v1288_v26, 0 }
 0x429   : > { %4162 = vmatpush3.bf16.msra.mxu1 %v1238_v27  ;;  %4329 = vmatprep.subr.bf16.mxu0 %v4328_v24 }
 0x42a   : > { %4167 = vmatprep.subr.bf16.mxu1 %v4722_v9  ;;  %4331 = vmatpush3.bf16.msra.mxu0 %v4328_v24 }
 0x42c   : > { %4164 = vmatmul.mubr.msk.bf16.vlgmr.msra.gmra.mrb[0].mxu1 %vm5341_vm10, %v4610_v28 }
 0x42d   : > { %4168 = vmatpush3.bf16.msra.mxu1 %v1298_v29  ;;  %4169 = vmatprep.mubr.msk.bf16.mxu1 %vm4723_vm1, %v4722_v9 }
 0x435   : > { %v1382_v62 = vpop.permute.xlu0 %1381  ;;  %v1377_v63 = vpop.permute.xlu1 %1376 }
 0x438   : > { %4170 = vmatmul.mubr.msk.bf16.vlgmr.msra.gmra.mrb[0].mxu1 %vm5341_vm10, %v4611_v30 }
 0x439   : > { %v1394_v5 = vpop.permute.xlu0 %1393  ;;  %v1389_v6 = vpop.permute.xlu1 %1388 }
 0x50b   : > { %v1334_v23 = vpop.f32.mrb[0].mxu1 }
 0x50c   : > { %v1352_v31 = vmul.f32 %v1334_v23, %v1334_v23  ;;  %v4171_v32 = vpop.f32.mrb[1].mxu1  ;;  %v1343_v34 = vsel %vm5342_vm2, %v1334_v23, 0.0 }
 0x50d   : > { %v1337_v33 = vpop.f32.mrb[2].mxu1 }
 0x50e   : > { %v1344_v35 = vsel %vm5342_vm2, %v1337_v33, 0.0  ;;  %v1353_v36 = vmul.f32 %v1337_v33, %v1337_v33  ;;  %v4172_v37 = vpop.f32.mrb[3].mxu1  ;;  %v1354_v39 = vsel %vm5342_vm2, %v1352_v31, 0.0 }
 0x50f   : > { %v1345_v38 = vadd.f32 %v1344_v35, %v1343_v34 }
 0x510   : > { %v1355_v40 = vsel %vm5342_vm2, %v1353_v36, 0.0 }
 0x511   : > { %v1346_v41 = vrot.slane %v1345_v38, 4  ;;  %v1356_v42 = vadd.f32 %v1355_v40, %v1354_v39 }
 0x513   : > { %v1347_v43 = vadd.f32 %v1346_v41, %v1345_v38  ;;  %v1357_v44 = vrot.slane %v1356_v42, 4 }
 0x515   : > { %v1348_v45 = vrot.slane %v1347_v43, 2  ;;  %v1358_v46 = vadd.f32 %v1357_v44, %v1356_v42 }
 0x517   : > { %v1349_v47 = vadd.f32 %v1348_v45, %v1347_v43  ;;  %v1359_v48 = vrot.slane %v1358_v46, 2 }
 0x519   : > { %v1350_v49 = vrot.slane %v1349_v47, 1  ;;  %v1360_v50 = vadd.f32 %v1359_v48, %v1358_v46  ;;  %v4612_v46 = vld [vmem:[%s4780_s8 + $0x10] sm:$0xff]   ;;  %v4614_v48 = vld [vmem:[%s4780_s8] sm:$0xff]  }
 0x51a   : > { %4182 = vmatprep.mubr.msk.bf16.mxu1 %vm5342_vm2, %v4612_v46 }
 0x51b   : > { %v1351_v51 = vadd.f32 %v1350_v49, %v1349_v47  ;;  %v1361_v52 = vrot.slane %v1360_v50, 1  ;;  %v4613_v47 = vld [vmem:[%s4780_s8 + $0x18] sm:$0xff]  }
 0x51d   : > { %v1362_v53 = vadd.f32 %v1361_v52, %v1360_v50  ;;  %v1363_v54 = vmul.f32 0.0625, %v1351_v51 }
 0x51f   : > { %v1364_v55 = vmul.f32 0.0625, %v1362_v53  ;;  %v1365_v56 = vmul.f32 %v1363_v54, %v1363_v54  ;;  %v1368_v57 = vsub.f32 %v1334_v23, %v1363_v54  ;;  %v1369_v58 = vsub.f32 %v1337_v33, %v1363_v54 }
 0x521   : > { %v1366_v59 = vsub.f32 %v1364_v55, %v1365_v56  ;;  %v1514_v55 = vld [vmem:[%s4785_s14 + $0x8] sm:$0xff]  ;;  %v1513_v56 = vld [vmem:[%s4785_s14] sm:$0xff] }
 0x523   : > { %v1367_v60 = vmax.f32 %v1366_v59, 0.0  ;;  %v1516_v59 = vld [vmem:[%s4785_s14 + $0x18] sm:$0xff] }
 0x525   : > { %v1370_v61 = vadd.f32 1e-05, %v1367_v60  ;;  %v1515_v60 = vld [vmem:[%s4785_s14 + $0x10] sm:$0xff] }
 0x527   : > { %4637 = vrsqrt.f32 %v1370_v61  ;;  %v1520_v61 = vld [vmem:[%s4790_s19 + $0x18] sm:$0xff] }
 0x531   : > { %v4638_v0 = vpop.eup %4637 }
 0x532   : > { %v1372_v1 = vmul.f32 %v4638_v0, %v1368_v57  ;;  %v1373_v2 = vmul.f32 %v4638_v0, %v1369_v58  ;;  %v1518_v57 = vld [vmem:[%s4790_s19 + $0x8] sm:$0xff]  ;;  %v1517_v58 = vld [vmem:[%s4790_s19] sm:$0xff] }
 0x534   : > { %v1385_v3 = vmul.f32 %v1382_v62, %v1373_v2  ;;  %v1384_v4 = vmul.f32 %v1377_v63, %v1372_v1  ;;  %v1519_v62 = vld [vmem:[%s4790_s19 + $0x10] sm:$0xff] }
 0x536   : > { %v1397_v7 = vadd.f32 %v1394_v5, %v1385_v3  ;;  %v1396_v8 = vadd.f32 %v1389_v6, %v1384_v4 }
 0x538   : > { %v1401_v10 = vmul.f32 0.70710677, %v1397_v7  ;;  %v1400_v11 = vmul.f32 0.70710677, %v1396_v8  ;;  %v1399_v14 = vmul.f32 0.5, %v1397_v7  ;;  %v1398_v16 = vmul.f32 0.5, %v1396_v8 }
 0x53a   : > { %4639 = verf.f32 %v1401_v10  ;;  %v4615_v10 = vld [vmem:[%s4780_s8 + $0x8] sm:$0xff]  }
 0x53b   : > { %4641 = verf.f32 %v1400_v11  ;;  %v4616_v11 = vld [vmem:[%s4780_s8 + $0x20] sm:$0xff]  }
 0x544   : > { %v4640_v12 = vpop.eup %4639 }
 0x545   : > { %v4642_v13 = vpop.eup %4641  ;;  %v1405_v15 = vadd.f32 1.0, %v4640_v12  ;;  %v4617_v12 = vld [vmem:[%s4780_s8 + $0x28] sm:$0xff]  }
 0x546   : > { %v1404_v17 = vadd.f32 1.0, %v4642_v13 }
 0x547   : > { %v1407_v18 = vmul.f32 %v1405_v15, %v1399_v14 }
 0x548   : > { %v1406_v19 = vmul.f32 %v1404_v17, %v1398_v16 }
 0x549   : > { %1413 = vrot.lane.b32.xlu0 %v1407_v18, %s4721_s22 }
 0x54a   : > { %1410 = vrot.lane.b32.xlu1 %v1406_v19, %s4721_s22 }
 0x5bb   : > { %v1414_v25 = vpop.permute.xlu0 %1413 }
 0x5bc   : > { %v1411_v26 = vpop.permute.xlu1 %1410  ;;  %v1415_v27 = vsel %vm936_vm0, %v1414_v25, %v1407_v18 }
 0x5bd   : > { %1418 = vrot.lane.b32.xlu0 %v1415_v27, %s4721_s22  ;;  %v1412_v28 = vsel %vm936_vm0, %v1411_v26, %v1406_v19 }
 0x5be   : > { %1416 = vrot.lane.b32.xlu1 %v1412_v28, %s4721_s22  ;;  %s5373_s22 = sld [smem:[#allocation5_spill]] }
 0x62f   : > { %v1419_v29 = vpop.permute.xlu0 %1418 }
 0x630   : > { %v1417_v30 = vpop.permute.xlu1 %1416  ;;  %v1421_v23 = vsel %vm936_vm0, %v1419_v29, %v1407_v18 }
 0x631   : > { %1426 = vrot.lane.b32.xlu0 %v1421_v23, %s5344_s26  ;;  %v1420_v31 = vsel %vm936_vm0, %v1417_v30, %v1406_v19  ;;  %vm5028_vm0 = vmpackc.low %vm1687_vm14, %vm1687_vm14  ;;  %vm2320_vm14 = vcmask 31744  }
 0x632   : > { %1424 = vrot.lane.b32.xlu1 %v1420_v31, %s5344_s26 }
 0x6a3   : > { %v1427_v32 = vpop.permute.xlu0 %1426 }
 0x6a4   : > { %v1431_v33 = vmax.f32 %v1407_v18, %v1427_v32  ;;  %v1425_v34 = vpop.permute.xlu1 %1424 }
 0x6a5   : > { %v1430_v35 = vmax.f32 %v1406_v19, %v1425_v34 }
 0x6a7   : > { %4177 = vmatprep.mubr.msk.f32.mxu0 %vm5342_vm2, %v1430_v35 }
 0x6a8   : > { %4178 = vmatmul.mubr.msk.f32.vlgmr.msra.gmra.mrb[4].mxu0 %vm5342_vm2, %v1431_v33 }
 0x77b   : > { %v4179_v36 = vpop.f32.mrb[4].mxu0 }
 0x77c   : > { %v1504_v37 = vpop.f32.mrb[5].mxu0 }
 0x77d   : > { %v4459_v38 = vpack.i.bf16 %v4179_v36, %v1504_v37  ;;  %v1556_v39 = vpack.c.bf16 %v4179_v36, %v1504_v37 }
 0x77f   : > { %4460 = vrot.lane.b32.xlu1 %v4459_v38, %s4727_s28  ;;  %4180 = vmatprep.subr.bf16.mxu1 %v1556_v39 }
 0x780   : > { %4181 = vmatpush3.bf16.msra.mxu1 %v1556_v39 }
 0x783   : > { %4183 = vmatmul.mubr.msk.bf16.vlgmr.msra.gmra.mrb[4].mxu1 %vm5342_vm2, %v4613_v47 }
 0x784   : > { %4188 = vmatprep.mubr.msk.bf16.mxu1 %vm5342_vm2, %v4614_v48 }
 0x7f1   : > { %v4461_v40 = vpop.permute.xlu1 %4460 }
 0x7f2   : > { %v4463_v41 = vunpack.i.h.bf16 %v4461_v40  ;;  %v4462_v42 = vunpack.i.l.bf16 %v4461_v40 }
 0x7f4   : > { %v1524_v43 = vsel %vm1521_vm11, %v4462_v42, %v1504_v37  ;;  %v1527_v44 = vsel %vm1521_vm11, %v4463_v41, %v4179_v36 }
 0x7f5   : > { %v4464_v45 = vpack.i.bf16 %v1527_v44, %v1524_v43 }
 0x7f7   : > { %4465 = vrot.lane.b32.xlu0 %v4464_v45, %s4727_s28 }
 0x869   : > { %v4466_v49 = vpop.permute.xlu0 %4465 }
 0x86a   : > { %v4468_v50 = vunpack.i.h.bf16 %v4466_v49  ;;  %v4467_v51 = vunpack.i.l.bf16 %v4466_v49 }
 0x86c   : > { %v1532_v52 = vsel %vm1521_vm11, %v4467_v51, %v1504_v37  ;;  %v1533_v53 = vsel %vm1521_vm11, %v4468_v50, %v4179_v36 }
 0x86d   : > { %v4474_v54 = vpack.i.bf16 %v1533_v53, %v1532_v52 }
 0x86f   : > { %4475 = vrot.lane.b32.xlu0 %v4474_v54, %s5344_s26  ;;  %4470 = vrot.lane.b32.xlu1 %v4474_v54, %s5343_s1  ;;  %s5378_s1 = sld [smem:[#allocation10_spill]] }
 0x873   : > { %1824 = vperm.xlu0 %4457, %v1514_v55   ;;  %1819 = vperm.xlu1 %4458, %v1513_v56  }
 0x877   : > { %1848 = vperm.xlu0 %4457, %v1518_v57   ;;  %1843 = vperm.xlu1 %4458, %v1517_v58  }
 0x87b   : > { %1834 = vperm.xlu0 %4457, %v1516_v59   ;;  %1829 = vperm.xlu1 %4458, %v1515_v60  }
 0x87f   : > { %1858 = vperm.xlu0 %4457, %v1520_v61   ;;  %1853 = vperm.xlu1 %4458, %v1519_v62  }
 0x8e1   : > { %v4476_v63 = vpop.permute.xlu0 %4475  ;;  %v4471_v0 = vpop.permute.xlu1 %4470 }
 0x8e2   : > { %v4478_v1 = vunpack.i.h.bf16 %v4476_v63  ;;  %v4477_v2 = vunpack.i.l.bf16 %v4476_v63  ;;  %v4473_v3 = vunpack.i.h.bf16 %v4471_v0  ;;  %v4472_v4 = vunpack.i.l.bf16 %v4471_v0 }
 0x8e4   : > { %v3917_v6 = vpack.c.bf16 %v4473_v3, %v4472_v4  ;;  %v3928_v8 = vpack.c.bf16 %v4478_v1, %v4477_v2 }
 0x8e6   : > { %4186 = vmatprep.subr.msk.bf16.mxu1 %vm5024_vm15, %v3917_v6 }
 0x8e7   : > { %4187 = vmatpush3.bf16.msk.msra.mxu1 %vm5024_vm15, %v3917_v6 }
 0x8e8   : > { %4192 = vmatprep.subr.msk.bf16.mxu1 %vm5028_vm0, %v3928_v8 }
 0x8ea   : > { %4189 = vmatmul.mubr.msk.bf16.vlgmr.msra.gmra.mrb[4].mxu1 %vm5342_vm2, %v4615_v10 }
 0x8eb   : > { %4193 = vmatpush3.bf16.msk.msra.mxu1 %vm5028_vm0, %v3928_v8  ;;  %4194 = vmatprep.mubr.msk.bf16.mxu1 %vm5342_vm2, %v4616_v11 }
 0x8f2   : > { %v1825_v56 = vpop.permute.xlu0 %1824  ;;  %v1820_v57 = vpop.permute.xlu1 %1819 }
 0x8f6   : > { %4195 = vmatmul.mubr.msk.bf16.vlgmr.msra.gmra.mrb[4].mxu1 %vm5342_vm2, %v4617_v12  ;;  %v1849_v60 = vpop.permute.xlu0 %1848  ;;  %v1844_v61 = vpop.permute.xlu1 %1843 }
 0x8fa   : > { %v1835_v62 = vpop.permute.xlu0 %1834  ;;  %v1830_v63 = vpop.permute.xlu1 %1829 }
 0x8fe   : > { %v1859_v12 = vpop.permute.xlu0 %1858 }
 0x9c9   : > { %v4196_v13 = vpop.f32.mrb[4].mxu1 }
 0x9ca   : > { %v1753_v14 = vpop.f32.mrb[5].mxu1  ;;  %v1787_v18 = vmul.f32 %v4196_v13, %v4196_v13  ;;  %v1775_v25 = vsel %vm5341_vm10, %v4196_v13, 0.0 }
 0x9cb   : > { %v1785_v15 = vmul.f32 %v1753_v14, %v1753_v14  ;;  %v4197_v16 = vpop.f32.mrb[6].mxu1  ;;  %v1772_v19 = vsel %vm5341_vm10, %v1753_v14, 0.0 }
 0x9cc   : > { %v1756_v17 = vpop.f32.mrb[7].mxu1  ;;  %v1788_v27 = vmul.f32 %v4197_v16, %v4197_v16  ;;  %v1792_v23 = vsel %vm5341_vm10, %v1787_v18, 0.0  ;;  %v1777_v31 = vsel %vm5341_vm10, %v4197_v16, 0.0 }
 0x9cd   : > { %v1773_v20 = vsel %vm5341_vm10, %v1756_v17, 0.0  ;;  %v1786_v21 = vmul.f32 %v1756_v17, %v1756_v17  ;;  %v1789_v26 = vsel %vm5341_vm10, %v1785_v15, 0.0 }
 0x9ce   : > { %v1774_v24 = vadd.f32 %v1773_v20, %v1772_v19  ;;  %v1794_v34 = vsel %vm5341_vm10, %v1788_v27, 0.0 }
 0x9cf   : > { %v1790_v28 = vsel %vm5341_vm10, %v1786_v21, 0.0 }
 0x9d0   : > { %v1776_v29 = vadd.f32 %v1775_v25, %v1774_v24  ;;  %v1791_v30 = vadd.f32 %v1790_v28, %v1789_v26 }
 0x9d2   : > { %v1778_v32 = vadd.f32 %v1777_v31, %v1776_v29  ;;  %v1793_v33 = vadd.f32 %v1792_v23, %v1791_v30 }
 0x9d4   : > { %v1779_v35 = vrot.slane %v1778_v32, 4  ;;  %v1795_v36 = vadd.f32 %v1794_v34, %v1793_v33 }
 0x9d6   : > { %v1780_v37 = vadd.f32 %v1779_v35, %v1778_v32  ;;  %v1796_v38 = vrot.slane %v1795_v36, 4 }
 0x9d8   : > { %v1781_v39 = vrot.slane %v1780_v37, 2  ;;  %v1797_v40 = vadd.f32 %v1796_v38, %v1795_v36 }
 0x9da   : > { %v1782_v41 = vadd.f32 %v1781_v39, %v1780_v37  ;;  %v1798_v42 = vrot.slane %v1797_v40, 2 }
 0x9dc   : > { %v1783_v43 = vrot.slane %v1782_v41, 1  ;;  %v1799_v44 = vadd.f32 %v1798_v42, %v1797_v40 }
 0x9de   : > { %v1784_v45 = vadd.f32 %v1783_v43, %v1782_v41  ;;  %v1800_v46 = vrot.slane %v1799_v44, 1 }
 0x9e0   : > { %v1801_v47 = vadd.f32 %v1800_v46, %v1799_v44  ;;  %v1802_v48 = vmul.f32 0.03125, %v1784_v45 }
 0x9e2   : > { %v1803_v49 = vmul.f32 0.03125, %v1801_v47  ;;  %v1804_v50 = vmul.f32 %v1802_v48, %v1802_v48  ;;  %v1808_v51 = vsub.f32 %v1756_v17, %v1802_v48  ;;  %v1807_v52 = vsub.f32 %v1753_v14, %v1802_v48  ;;  %v1885_v47 = vld [vmem:[%s4795_s24] sm:$0xff] }
 0x9e3   : > { %v1810_v53 = vsub.f32 %v4197_v16, %v1802_v48  ;;  %v1809_v54 = vsub.f32 %v4196_v13, %v1802_v48  ;;  %v1854_v13 = vpop.permute.xlu1 %1853  ;;  %4198 = vmatprep.subr.mxu0 %v1885_v47 }
 0x9e4   : > { %v1805_v55 = vsub.f32 %v1803_v49, %v1804_v50  ;;  %4199 = vmatpush3.msra.mxu0 %v1885_v47 }
 0x9e6   : > { %v1806_v58 = vmax.f32 %v1805_v55, 0.0 }
 0x9e8   : > { %v1811_v59 = vadd.f32 1e-05, %v1806_v58 }
 0x9ea   : > { %4643 = vrsqrt.f32 %v1811_v59 }
 0x9f4   : > { %v4644_v0 = vpop.eup %4643 }
 0x9f5   : > { %v1814_v1 = vmul.f32 %v4644_v0, %v1808_v51  ;;  %v1813_v2 = vmul.f32 %v4644_v0, %v1807_v52  ;;  %v1816_v3 = vmul.f32 %v4644_v0, %v1810_v53  ;;  %v1815_v4 = vmul.f32 %v4644_v0, %v1809_v54 }
 0x9f7   : > { %v1838_v6 = vmul.f32 %v1825_v56, %v1814_v1  ;;  %v1837_v8 = vmul.f32 %v1820_v57, %v1813_v2  ;;  %v1840_v10 = vmul.f32 %v1835_v62, %v1816_v3  ;;  %v1839_v11 = vmul.f32 %v1830_v63, %v1815_v4 }
 0x9f9   : > { %v1862_v14 = vadd.f32 %v1849_v60, %v1838_v6  ;;  %v1861_v15 = vadd.f32 %v1844_v61, %v1837_v8  ;;  %v1864_v16 = vadd.f32 %v1859_v12, %v1840_v10  ;;  %v1863_v17 = vadd.f32 %v1854_v13, %v1839_v11 }
 0x9fb   : > { %v1870_v18 = vmul.f32 0.70710677, %v1862_v14  ;;  %v1869_v19 = vmul.f32 0.70710677, %v1861_v15  ;;  %v1872_v20 = vmul.f32 0.70710677, %v1864_v16 }
 0x9fc   : > { %v1871_v21 = vmul.f32 0.70710677, %v1863_v17  ;;  %v1866_v26 = vmul.f32 0.5, %v1862_v14  ;;  %v1865_v29 = vmul.f32 0.5, %v1861_v15  ;;  %v1868_v35 = vmul.f32 0.5, %v1864_v16 }
 0x9fd   : > { %4645 = verf.f32 %v1870_v18  ;;  %v1867_v36 = vmul.f32 0.5, %v1863_v17 }
 0x9fe   : > { %4647 = verf.f32 %v1869_v19 }
 0x9ff   : > { %4649 = verf.f32 %v1872_v20 }
 0xa00   : > { %4651 = verf.f32 %v1871_v21 }
 0xa07   : > { %v4646_v24 = vpop.eup %4645 }
 0xa08   : > { %v4648_v25 = vpop.eup %4647  ;;  %v1878_v27 = vadd.f32 1.0, %v4646_v24 }
 0xa09   : > { %v4650_v28 = vpop.eup %4649  ;;  %v1877_v30 = vadd.f32 1.0, %v4648_v25  ;;  %v4618_v25 = vld [vmem:[%s4800_s30 + $0x10] sm:$0xff]  }
 0xa0a   : > { %v4652_v23 = vpop.eup %4651  ;;  %v1882_v31 = vmul.f32 %v1878_v27, %v1866_v26  ;;  %v1880_v32 = vadd.f32 1.0, %v4650_v28  ;;  %v4619_v26 = vld [vmem:[%s4800_s30 + $0x18] sm:$0xff]  }
 0xa0b   : > { %v1881_v33 = vmul.f32 %v1877_v30, %v1865_v29  ;;  %v1879_v34 = vadd.f32 1.0, %v4652_v23 }
 0xa0c   : > { %1889 = vrot.lane.b32.xlu0 %v1882_v31, %s4727_s28  ;;  %v1884_v37 = vmul.f32 %v1880_v32, %v1868_v35 }
 0xa0d   : > { %1886 = vrot.lane.b32.xlu1 %v1881_v33, %s4727_s28  ;;  %v1883_v38 = vmul.f32 %v1879_v34, %v1867_v36 }
 0xa10   : > { %1895 = vrot.lane.b32.xlu0 %v1884_v37, %s4727_s28 }
 0xa11   : > { %1892 = vrot.lane.b32.xlu1 %v1883_v38, %s4727_s28 }
 0xa7e   : > { %v1890_v39 = vpop.permute.xlu0 %1889 }
 0xa7f   : > { %v1887_v40 = vpop.permute.xlu1 %1886  ;;  %v1891_v41 = vsel %vm1521_vm11, %v1890_v39, %v1882_v31  ;;  %v2027_v39 = vld [vmem:[%s4805_s6] sm:$0xff] }
 0xa80   : > { %1900 = vrot.lane.b32.xlu0 %v1891_v41, %s4727_s28  ;;  %v1888_v42 = vsel %vm1521_vm11, %v1887_v40, %v1881_v33  ;;  %v2028_v40 = vld [vmem:[%s4805_s6 + $0x8] sm:$0xff]  ;;  %v2031_v41 = vld [vmem:[%s5366_s7] sm:$0xff] }
 0xa81   : > { %1898 = vrot.lane.b32.xlu1 %v1888_v42, %s4727_s28  ;;  %v2032_v42 = vld [vmem:[%s5366_s7 + $0x8] sm:$0xff] }
 0xa82   : > { %v1896_v43 = vpop.permute.xlu0 %1895 }
 0xa83   : > { %v1893_v44 = vpop.permute.xlu1 %1892  ;;  %v1897_v45 = vsel %vm1521_vm11, %v1896_v43, %v1884_v37  ;;  %v2029_v43 = vld [vmem:[%s4805_s6 + $0x10] sm:$0xff] }
 0xa84   : > { %1904 = vrot.lane.b32.xlu0 %v1897_v45, %s4727_s28  ;;  %v1894_v46 = vsel %vm1521_vm11, %v1893_v44, %v1883_v38  ;;  %v2030_v44 = vld [vmem:[%s4805_s6 + $0x18] sm:$0xff]  ;;  %v2033_v45 = vld [vmem:[%s5366_s7 + $0x10] sm:$0xff] }
 0xa85   : > { %1902 = vrot.lane.b32.xlu1 %v1894_v46, %s4727_s28  ;;  %v2034_v46 = vld [vmem:[%s5366_s7 + $0x18] sm:$0xff] }
 0xaf2   : > { %v1901_v48 = vpop.permute.xlu0 %1900 }
 0xaf3   : > { %v1899_v49 = vpop.permute.xlu1 %1898  ;;  %v1907_v50 = vsel %vm1521_vm11, %v1901_v48, %v1882_v31 }
 0xaf4   : > { %1916 = vrot.lane.b32.xlu0 %v1907_v50, %s5344_s26  ;;  %v1906_v51 = vsel %vm1521_vm11, %v1899_v49, %v1881_v33 }
 0xaf5   : > { %1914 = vrot.lane.b32.xlu1 %v1906_v51, %s5344_s26 }
 0xaf6   : > { %v1905_v52 = vpop.permute.xlu0 %1904 }
 0xaf7   : > { %v1903_v53 = vpop.permute.xlu1 %1902  ;;  %v1909_v54 = vsel %vm1521_vm11, %v1905_v52, %v1884_v37 }
 0xaf8   : > { %1920 = vrot.lane.b32.xlu0 %v1909_v54, %s5344_s26  ;;  %v1908_v55 = vsel %vm1521_vm11, %v1903_v53, %v1883_v38 }
 0xaf9   : > { %1918 = vrot.lane.b32.xlu1 %v1908_v55, %s5344_s26 }
 0xb66   : > { %v1917_v56 = vpop.permute.xlu0 %1916 }
 0xb67   : > { %v1927_v57 = vmax.f32 %v1882_v31, %v1917_v56  ;;  %v1915_v58 = vpop.permute.xlu1 %1914  ;;  %v4620_v31 = vld [vmem:[%s4800_s30] sm:$0xff]  }
 0xb68   : > { %v1926_v59 = vmax.f32 %v1881_v33, %v1915_v58 }
 0xb6a   : > { %4200 = vmatprep.mubr.msk.f32.mxu0 %vm5341_vm10, %v1926_v59  ;;  %v1921_v60 = vpop.permute.xlu0 %1920 }
 0xb6b   : > { %v1929_v61 = vmax.f32 %v1884_v37, %v1921_v60  ;;  %4201 = vmatmul.mubr.msk.f32.vlgmr.msra.gmra.mrb[6].mxu0 %vm5341_vm10, %v1927_v57  ;;  %v1919_v62 = vpop.permute.xlu1 %1918 }
 0xb6c   : > { %v1928_v63 = vmax.f32 %v1883_v38, %v1919_v62 }
 0xb6e   : > { %4203 = vmatprep.mubr.msk.f32.mxu0 %vm5341_vm10, %v1928_v63 }
 0xb6f   : > { %4204 = vmatmul.mubr.msk.f32.gmra.mrb[8].mxu0 %vm5341_vm10, %v1929_v61  ;;  %vm2776_vm10 = vcmp.lt.s32.totalorder %v4925_v22, 1 }
 0xb70   : > { %4210 = vmatprep.mubr.msk.bf16.mxu0 %vm2105_vm5, %v4618_v25  ;;  %vm3997_vm2 = vmpackc.low %vm2776_vm10, %vm2776_vm10  ;;  %vm2858_vm10 = vcmask 15360  }
 0xc3e   : > { %v4202_v0 = vpop.f32.mrb[6].mxu0 }
 0xc3f   : > { %v2008_v1 = vpop.f32.mrb[7].mxu0 }
 0xc40   : > { %v4479_v2 = vpack.i.bf16 %v4202_v0, %v2008_v1  ;;  %v2093_v3 = vpack.c.bf16 %v4202_v0, %v2008_v1 }
 0xc42   : > { %4480 = vrot.lane.b32.xlu1 %v4479_v2, %s4729_s2  ;;  %v4205_v4 = vpop.f32.mrb[8].mxu0  ;;  %4206 = vmatprep.subr.bf16.mxu0 %v2093_v3 }
 0xc43   : > { %v2018_v6 = vpop.f32.mrb[9].mxu0  ;;  %4207 = vmatpush3.bf16.msra.mxu0 %v2093_v3  ;;  %v4623_v3 = vld [vmem:[%s4800_s30 + $0x28] sm:$0xff]  }
 0xc44   : > { %v4484_v8 = vpack.i.bf16 %v4205_v4, %v2018_v6  ;;  %v2094_v10 = vpack.c.bf16 %v4205_v4, %v2018_v6 }
 0xc46   : > { %4485 = vrot.lane.b32.xlu0 %v4484_v8, %s4729_s2  ;;  %4208 = vmatprep.subr.bf16.mxu0 %v2094_v10 }
 0xc47   : > { %4209 = vmatpush3.bf16.msra.mxu0 %v2094_v10 }
 0xc4a   : > { %4211 = vmatmul.mubr.msk.bf16.vlgmr.msra.gmra.mrb[12].mxu0 %vm2105_vm5, %v4619_v26 }
 0xc4b   : > { %4218 = vmatprep.mubr.msk.bf16.mxu0 %vm2105_vm5, %v4620_v31 }
 0xcb4   : > { %v4481_v11 = vpop.permute.xlu1 %4480 }
 0xcb5   : > { %v4483_v12 = vunpack.i.h.bf16 %v4481_v11  ;;  %v4482_v13 = vunpack.i.l.bf16 %v4481_v11 }
 0xcb7   : > { %v2038_v14 = vsel %vm2035_vm4, %v4482_v13, %v2008_v1  ;;  %v2041_v15 = vsel %vm2035_vm4, %v4483_v12, %v4202_v0 }
 0xcb8   : > { %v4486_v16 = vpop.permute.xlu0 %4485  ;;  %v4489_v17 = vpack.i.bf16 %v2041_v15, %v2038_v14 }
 0xcb9   : > { %v4488_v18 = vunpack.i.h.bf16 %v4486_v16  ;;  %v4487_v19 = vunpack.i.l.bf16 %v4486_v16 }
 0xcba   : > { %4490 = vrot.lane.b32.xlu1 %v4489_v17, %s4729_s2 }
 0xcbb   : > { %v2044_v20 = vsel %vm2035_vm4, %v4487_v19, %v2018_v6  ;;  %v2047_v21 = vsel %vm2035_vm4, %v4488_v18, %v4205_v4 }
 0xcbc   : > { %v4494_v24 = vpack.i.bf16 %v2047_v21, %v2044_v20 }
 0xcbe   : > { %4495 = vrot.lane.b32.xlu0 %v4494_v24, %s4729_s2 }
 0xd2c   : > { %v4491_v27 = vpop.permute.xlu1 %4490 }
 0xd2d   : > { %v4493_v28 = vunpack.i.h.bf16 %v4491_v27  ;;  %v4492_v29 = vunpack.i.l.bf16 %v4491_v27 }
 0xd2f   : > { %v2056_v30 = vsel %vm2035_vm4, %v4492_v29, %v2008_v1  ;;  %v2057_v23 = vsel %vm2035_vm4, %v4493_v28, %v4202_v0  ;;  %v4621_v0 = vld [vmem:[%s4800_s30 + $0x8] sm:$0xff]   ;;  %v4622_v1 = vld [vmem:[%s4800_s30 + $0x20] sm:$0xff]  }
 0xd30   : > { %v4496_v32 = vpop.permute.xlu0 %4495  ;;  %v4499_v33 = vpack.i.bf16 %v2057_v23, %v2056_v30 }
 0xd31   : > { %v4498_v34 = vunpack.i.h.bf16 %v4496_v32  ;;  %v4497_v35 = vunpack.i.l.bf16 %v4496_v32 }
 0xd32   : > { %4500 = vrot.lane.b32.xlu1 %v4499_v33, %s4730_s10 }
 0xd33   : > { %v2058_v36 = vsel %vm2035_vm4, %v4497_v35, %v2018_v6  ;;  %v2059_v37 = vsel %vm2035_vm4, %v4498_v34, %v4205_v4 }
 0xd34   : > { %v4504_v38 = vpack.i.bf16 %v2059_v37, %v2058_v36 }
 0xd36   : > { %4505 = vrot.lane.b32.xlu0 %v4504_v38, %s4730_s10  ;;  %4510 = vrot.lane.b32.xlu1 %v4499_v33, %s5344_s26 }
 0xd3a   : > { %4515 = vrot.lane.b32.xlu0 %v4504_v38, %s5344_s26  ;;  %2368 = vperm.xlu1 %4458, %v2027_v39  }
 0xd3e   : > { %2373 = vperm.xlu0 %4457, %v2028_v40   ;;  %2392 = vperm.xlu1 %4458, %v2031_v41  }
 0xd42   : > { %2397 = vperm.xlu0 %4457, %v2032_v42   ;;  %2378 = vperm.xlu1 %4458, %v2029_v43  }
 0xd46   : > { %2383 = vperm.xlu0 %4457, %v2030_v44   ;;  %2402 = vperm.xlu1 %4458, %v2033_v45  }
 0xd4a   : > { %2407 = vperm.xlu0 %4457, %v2034_v46  }
 0xda4   : > { %v4501_v47 = vpop.permute.xlu1 %4500 }
 0xda5   : > { %v4503_v48 = vunpack.i.h.bf16 %v4501_v47  ;;  %v4502_v49 = vunpack.i.l.bf16 %v4501_v47 }
 0xda7   : > { %v3947_v51 = vpack.c.bf16 %v4503_v48, %v4502_v49 }
 0xda8   : > { %v4506_v52 = vpop.permute.xlu0 %4505  ;;  %v4511_v53 = vpop.permute.xlu1 %4510 }
 0xda9   : > { %v4508_v54 = vunpack.i.h.bf16 %v4506_v52  ;;  %v4507_v55 = vunpack.i.l.bf16 %v4506_v52  ;;  %v4513_v56 = vunpack.i.h.bf16 %v4511_v53  ;;  %v4512_v57 = vunpack.i.l.bf16 %v4511_v53  ;;  %4214 = vmatprep.subr.msk.bf16.mxu0 %vm5112_vm8, %v3947_v51 }
 0xdaa   : > { %4215 = vmatpush3.bf16.msk.msra.mxu0 %vm5112_vm8, %v3947_v51 }
 0xdab   : > { %v3950_v58 = vpack.c.bf16 %v4508_v54, %v4507_v55  ;;  %v3961_v61 = vpack.c.bf16 %v4513_v56, %v4512_v57 }
 0xdac   : > { %v4516_v59 = vpop.permute.xlu0 %4515 }
 0xdad   : > { %v4518_v62 = vunpack.i.h.bf16 %v4516_v59  ;;  %v4517_v63 = vunpack.i.l.bf16 %v4516_v59  ;;  %4216 = vmatprep.subr.msk.bf16.mxu0 %vm5112_vm8, %v3950_v58 }
 0xdae   : > { %4217 = vmatpush3.bf16.msk.msra.mxu0 %vm5112_vm8, %v3950_v58 }
 0xdaf   : > { %4222 = vmatprep.subr.msk.bf16.mxu0 %vm5124_vm13, %v3961_v61  ;;  %v3964_v2 = vpack.c.bf16 %v4518_v62, %v4517_v63 }
 0xdb1   : > { %4219 = vmatmul.mubr.msk.bf16.vlgmr.msra.gmra.mrb[12].mxu0 %vm2105_vm5, %v4621_v0 }
 0xdb2   : > { %4223 = vmatpush3.bf16.msk.msra.mxu0 %vm5124_vm13, %v3961_v61  ;;  %4226 = vmatprep.mubr.msk.bf16.mxu0 %vm2105_vm5, %v4622_v1 }
 0xdb3   : > { %4224 = vmatprep.subr.msk.bf16.mxu0 %vm5124_vm13, %v3964_v2 }
 0xdb6   : > { %4225 = vmatpush3.bf16.msk.msra.mxu0 %vm5124_vm13, %v3964_v2 }
 0xdb9   : > { %v2369_v51 = vpop.permute.xlu1 %2368 }
 0xdbd   : > { %4227 = vmatmul.mubr.msk.bf16.vlgmr.msra.gmra.mrb[12].mxu0 %vm2105_vm5, %v4623_v3  ;;  %v2374_v52 = vpop.permute.xlu0 %2373  ;;  %v2393_v55 = vpop.permute.xlu1 %2392 }
 0xdc1   : > { %v2398_v56 = vpop.permute.xlu0 %2397  ;;  %v2379_v57 = vpop.permute.xlu1 %2378 }
 0xdc5   : > { %v2384_v58 = vpop.permute.xlu0 %2383 }
 0xe90   : > { %v4228_v4 = vpop.f32.mrb[12].mxu0 }
 0xe91   : > { %v2301_v6 = vpop.f32.mrb[13].mxu0  ;;  %v2336_v12 = vmul.f32 %v4228_v4, %v4228_v4  ;;  %v2324_v17 = vsel %vm2320_vm14, %v4228_v4, 0.0 }
 0xe92   : > { %v2334_v8 = vmul.f32 %v2301_v6, %v2301_v6  ;;  %v4229_v10 = vpop.f32.mrb[14].mxu0  ;;  %v2321_v13 = vsel %vm2320_vm14, %v2301_v6, 0.0 }
 0xe93   : > { %v2304_v11 = vpop.f32.mrb[15].mxu0  ;;  %v2337_v19 = vmul.f32 %v4229_v10, %v4229_v10  ;;  %v2341_v25 = vsel %vm2320_vm14, %v2336_v12, 0.0  ;;  %v2326_v26 = vsel %vm2320_vm14, %v4229_v10, 0.0 }
 0xe94   : > { %v2322_v14 = vsel %vm2320_vm14, %v2304_v11, 0.0  ;;  %v2335_v15 = vmul.f32 %v2304_v11, %v2304_v11  ;;  %v2338_v18 = vsel %vm2320_vm14, %v2334_v8, 0.0  ;;  %v2408_v8 = vpop.permute.xlu0 %2407 }
 0xe95   : > { %v2323_v16 = vadd.f32 %v2322_v14, %v2321_v13  ;;  %v2343_v29 = vsel %vm2320_vm14, %v2337_v19, 0.0 }
 0xe96   : > { %v2339_v20 = vsel %vm2320_vm14, %v2335_v15, 0.0 }
 0xe97   : > { %v2325_v21 = vadd.f32 %v2324_v17, %v2323_v16  ;;  %v2340_v24 = vadd.f32 %v2339_v20, %v2338_v18 }
 0xe99   : > { %v2327_v27 = vadd.f32 %v2326_v26, %v2325_v21  ;;  %v2342_v28 = vadd.f32 %v2341_v25, %v2340_v24 }
 0xe9b   : > { %v2328_v30 = vrot.slane %v2327_v27, 4  ;;  %v2344_v23 = vadd.f32 %v2343_v29, %v2342_v28 }
 0xe9d   : > { %v2329_v31 = vadd.f32 %v2328_v30, %v2327_v27  ;;  %v2345_v32 = vrot.slane %v2344_v23, 4 }
 0xe9f   : > { %v2330_v33 = vrot.slane %v2329_v31, 2  ;;  %v2346_v34 = vadd.f32 %v2345_v32, %v2344_v23 }
 0xea1   : > { %v2331_v35 = vadd.f32 %v2330_v33, %v2329_v31  ;;  %v2347_v36 = vrot.slane %v2346_v34, 2 }
 0xea3   : > { %v2332_v37 = vrot.slane %v2331_v35, 1  ;;  %v2348_v38 = vadd.f32 %v2347_v36, %v2346_v34 }
 0xea5   : > { %v2333_v39 = vadd.f32 %v2332_v37, %v2331_v35  ;;  %v2349_v40 = vrot.slane %v2348_v38, 1 }
 0xea7   : > { %v2350_v41 = vadd.f32 %v2349_v40, %v2348_v38  ;;  %v2351_v42 = vmul.f32 0.03125, %v2333_v39 }
 0xea9   : > { %v2352_v43 = vmul.f32 0.03125, %v2350_v41  ;;  %v2353_v44 = vmul.f32 %v2351_v42, %v2351_v42  ;;  %v2357_v45 = vsub.f32 %v2304_v11, %v2351_v42  ;;  %v2356_v46 = vsub.f32 %v2301_v6, %v2351_v42 }
 0xeaa   : > { %v2359_v47 = vsub.f32 %v4229_v10, %v2351_v42  ;;  %v2358_v48 = vsub.f32 %v4228_v4, %v2351_v42  ;;  %v2403_v4 = vpop.permute.xlu1 %2402 }
 0xeab   : > { %v2354_v49 = vsub.f32 %v2352_v43, %v2353_v44  ;;  %v2434_v43 = vld [vmem:[%s5371_s11] sm:$0xf]  ;;  %s5375_s11 = sld [smem:[#allocation7_spill]] }
 0xeac   : > { %4230 = vmatprep.subr.msk.mxu1 %vm1184_vm9, %v2434_v43 }
 0xead   : > { %v2355_v53 = vmax.f32 %v2354_v49, 0.0  ;;  %4231 = vmatpush3.msk.msra.mxu1 %vm1184_vm9, %v2434_v43  ;;  %v2585_v43 = vld [vmem:[%s5374_s23 + $0x10] sm:$0xff] }
 0xeaf   : > { %v2360_v54 = vadd.f32 1e-05, %v2355_v53 }
 0xeb1   : > { %4653 = vrsqrt.f32 %v2360_v54  ;;  %v2972_v22 = vld [vmem:[%s5375_s11] sm:$0x3]  ;;  %s5377_s11 = sld [smem:[#allocation9_spill]] }
 0xeb2   : > { %4262 = vmatprep.subr.msk.mxu0 %vm2985_vm3, %v2972_v22 }
 0xeb3   : > { %4263 = vmatpush3.msk.msra.mxu0 %vm2985_vm3, %v2972_v22 }
 0xeb4   : > { %4270 = vmatprep.subr.bf16.mxu0 %v4722_v9 }
 0xebb   : > { %v4654_v59 = vpop.eup %4653 }
 0xebc   : > { %v2363_v61 = vmul.f32 %v4654_v59, %v2357_v45  ;;  %v2362_v62 = vmul.f32 %v4654_v59, %v2356_v46  ;;  %v2365_v63 = vmul.f32 %v4654_v59, %v2359_v47  ;;  %v2364_v0 = vmul.f32 %v4654_v59, %v2358_v48 }
 0xebe   : > { %v2387_v1 = vmul.f32 %v2374_v52, %v2363_v61  ;;  %v2386_v2 = vmul.f32 %v2369_v51, %v2362_v62  ;;  %v2389_v3 = vmul.f32 %v2384_v58, %v2365_v63  ;;  %v2388_v6 = vmul.f32 %v2379_v57, %v2364_v0 }
 0xec0   : > { %v2411_v10 = vadd.f32 %v2398_v56, %v2387_v1  ;;  %v2410_v11 = vadd.f32 %v2393_v55, %v2386_v2  ;;  %v2413_v12 = vadd.f32 %v2408_v8, %v2389_v3  ;;  %v2412_v13 = vadd.f32 %v2403_v4, %v2388_v6 }
 0xec2   : > { %v2419_v14 = vmul.f32 0.70710677, %v2411_v10  ;;  %v2418_v15 = vmul.f32 0.70710677, %v2410_v11  ;;  %v2421_v16 = vmul.f32 0.70710677, %v2413_v12 }
 0xec3   : > { %v2420_v17 = vmul.f32 0.70710677, %v2412_v13  ;;  %v2415_v20 = vmul.f32 0.5, %v2411_v10  ;;  %v2414_v25 = vmul.f32 0.5, %v2410_v11  ;;  %v2417_v31 = vmul.f32 0.5, %v2413_v12 }
 0xec4   : > { %4655 = verf.f32 %v2419_v14  ;;  %v2416_v32 = vmul.f32 0.5, %v2412_v13 }
 0xec5   : > { %4657 = verf.f32 %v2418_v15 }
 0xec6   : > { %4659 = verf.f32 %v2421_v16 }
 0xec7   : > { %4661 = verf.f32 %v2420_v17 }
 0xece   : > { %v4656_v18 = vpop.eup %4655 }
 0xecf   : > { %v4658_v19 = vpop.eup %4657  ;;  %v2427_v21 = vadd.f32 1.0, %v4656_v18 }
 0xed0   : > { %v4660_v24 = vpop.eup %4659  ;;  %v2426_v26 = vadd.f32 1.0, %v4658_v19 }
 0xed1   : > { %v4662_v27 = vpop.eup %4661  ;;  %v2431_v28 = vmul.f32 %v2427_v21, %v2415_v20  ;;  %v2429_v29 = vadd.f32 1.0, %v4660_v24  ;;  %v4624_v21 = vld [vmem:[%s5372_s18 + $0x10] sm:$0xff]   ;;  %v4625_v24 = vld [vmem:[%s5372_s18 + $0x18] sm:$0xff]  }
 0xed2   : > { %v2430_v30 = vmul.f32 %v2426_v26, %v2414_v25  ;;  %v2428_v23 = vadd.f32 1.0, %v4662_v27 }
 0xed3   : > { %2438 = vrot.lane.b32.xlu0 %v2431_v28, %s4729_s2  ;;  %v2433_v33 = vmul.f32 %v2429_v29, %v2417_v31 }
 0xed4   : > { %2435 = vrot.lane.b32.xlu1 %v2430_v30, %s4729_s2  ;;  %v2432_v34 = vmul.f32 %v2428_v23, %v2416_v32 }
 0xed7   : > { %2444 = vrot.lane.b32.xlu0 %v2433_v33, %s4729_s2 }
 0xed8   : > { %2441 = vrot.lane.b32.xlu1 %v2432_v34, %s4729_s2 }
 0xf45   : > { %v2439_v35 = vpop.permute.xlu0 %2438 }
 0xf46   : > { %v2436_v36 = vpop.permute.xlu1 %2435  ;;  %v2440_v37 = vsel %vm2035_vm4, %v2439_v35, %v2431_v28 }
 0xf47   : > { %2449 = vrot.lane.b32.xlu0 %v2440_v37, %s4729_s2  ;;  %v2437_v38 = vsel %vm2035_vm4, %v2436_v36, %v2430_v30  ;;  %v2579_v36 = vld [vmem:[%s5373_s22] sm:$0xff] }
 0xf48   : > { %2447 = vrot.lane.b32.xlu1 %v2437_v38, %s4729_s2  ;;  %v2580_v38 = vld [vmem:[%s5373_s22 + $0x8] sm:$0xff] }
 0xf49   : > { %v2445_v39 = vpop.permute.xlu0 %2444 }
 0xf4a   : > { %v2442_v40 = vpop.permute.xlu1 %2441  ;;  %v2446_v41 = vsel %vm2035_vm4, %v2445_v39, %v2433_v33  ;;  %v2583_v39 = vld [vmem:[%s5374_s23] sm:$0xff] }
 0xf4b   : > { %2453 = vrot.lane.b32.xlu0 %v2446_v41, %s4729_s2  ;;  %v2443_v42 = vsel %vm2035_vm4, %v2442_v40, %v2432_v34  ;;  %v2584_v40 = vld [vmem:[%s5374_s23 + $0x8] sm:$0xff]  ;;  %v2581_v41 = vld [vmem:[%s5373_s22 + $0x10] sm:$0xff] }
 0xf4c   : > { %2451 = vrot.lane.b32.xlu1 %v2443_v42, %s4729_s2  ;;  %v2582_v42 = vld [vmem:[%s5373_s22 + $0x18] sm:$0xff] }
 0xfb9   : > { %v2450_v44 = vpop.permute.xlu0 %2449 }
 0xfba   : > { %v2448_v45 = vpop.permute.xlu1 %2447  ;;  %v2456_v46 = vsel %vm2035_vm4, %v2450_v44, %v2431_v28  ;;  %v2586_v44 = vld [vmem:[%s5374_s23 + $0x18] sm:$0xff] }
 0xfbb   : > { %2465 = vrot.lane.b32.xlu0 %v2456_v46, %s5344_s26  ;;  %v2455_v47 = vsel %vm2035_vm4, %v2448_v45, %v2430_v30 }
 0xfbc   : > { %2463 = vrot.lane.b32.xlu1 %v2455_v47, %s5344_s26 }
 0xfbd   : > { %v2454_v48 = vpop.permute.xlu0 %2453 }
 0xfbe   : > { %v2452_v49 = vpop.permute.xlu1 %2451  ;;  %v2458_v51 = vsel %vm2035_vm4, %v2454_v48, %v2433_v33 }
 0xfbf   : > { %2469 = vrot.lane.b32.xlu0 %v2458_v51, %s5344_s26  ;;  %v2457_v52 = vsel %vm2035_vm4, %v2452_v49, %v2432_v34 }
 0xfc0   : > { %2467 = vrot.lane.b32.xlu1 %v2457_v52, %s5344_s26 }
0x102d   : > { %v2466_v53 = vpop.permute.xlu0 %2465 }
0x102e   : > { %v2476_v54 = vmax.f32 %v2431_v28, %v2466_v53  ;;  %v2464_v55 = vpop.permute.xlu1 %2463 }
0x102f   : > { %v2475_v56 = vmax.f32 %v2430_v30, %v2464_v55  ;;  %v4626_v30 = vld [vmem:[%s5372_s18] sm:$0xff]  }
0x1030   : > { %v4628_v55 = vld [vmem:[%s5372_s18 + $0x20] sm:$0xff]  }
0x1031   : > { %4232 = vmatprep.mubr.msk.f32.mxu1 %vm2320_vm14, %v2475_v56  ;;  %v2470_v57 = vpop.permute.xlu0 %2469  ;;  %v4629_v56 = vld [vmem:[%s5372_s18 + $0x28] sm:$0xff]  }
0x1032   : > { %v2478_v58 = vmax.f32 %v2433_v33, %v2470_v57  ;;  %4233 = vmatmul.mubr.msk.f32.vlgmr.msra.gmra.mrb[8].mxu1 %vm2320_vm14, %v2476_v54  ;;  %v2468_v59 = vpop.permute.xlu1 %2467  ;;  %v4627_v54 = vld [vmem:[%s5372_s18 + $0x8] sm:$0xff]  }
0x1033   : > { %v2477_v61 = vmax.f32 %v2432_v34, %v2468_v59 }
0x1035   : > { %4235 = vmatprep.mubr.msk.f32.mxu1 %vm2320_vm14, %v2477_v61 }
0x1036   : > { %4236 = vmatmul.mubr.msk.f32.gmra.mrb[10].mxu1 %vm2320_vm14, %v2478_v58 }
0x1037   : > { %4242 = vmatprep.mubr.msk.bf16.mxu1 %vm2105_vm5, %v4624_v21 }
0x1105   : > { %v4234_v62 = vpop.f32.mrb[8].mxu1 }
0x1106   : > { %v2560_v63 = vpop.f32.mrb[9].mxu1 }
0x1107   : > { %v4519_v0 = vpack.i.bf16 %v4234_v62, %v2560_v63  ;;  %v2644_v1 = vpack.c.bf16 %v4234_v62, %v2560_v63 }
0x1109   : > { %4520 = vrot.lane.b32.xlu1 %v4519_v0, %s4731_s0  ;;  %v4237_v2 = vpop.f32.mrb[10].mxu1  ;;  %4238 = vmatprep.subr.bf16.mxu1 %v2644_v1 }
0x110a   : > { %v2570_v3 = vpop.f32.mrb[11].mxu1  ;;  %4239 = vmatpush3.bf16.msra.mxu1 %v2644_v1 }
0x110b   : > { %v4524_v6 = vpack.i.bf16 %v4237_v2, %v2570_v3  ;;  %v2645_v4 = vpack.c.bf16 %v4237_v2, %v2570_v3 }
0x110d   : > { %4525 = vrot.lane.b32.xlu0 %v4524_v6, %s4731_s0  ;;  %4240 = vmatprep.subr.bf16.mxu1 %v2645_v4 }
0x110e   : > { %4241 = vmatpush3.bf16.msra.mxu1 %v2645_v4 }
0x1111   : > { %4243 = vmatmul.mubr.msk.bf16.vlgmr.msra.gmra.mrb[12].mxu1 %vm2105_vm5, %v4625_v24 }
0x1112   : > { %4250 = vmatprep.mubr.msk.bf16.mxu1 %vm2105_vm5, %v4626_v30 }
0x117b   : > { %v4521_v8 = vpop.permute.xlu1 %4520 }
0x117c   : > { %v4523_v10 = vunpack.i.h.bf16 %v4521_v8  ;;  %v4522_v11 = vunpack.i.l.bf16 %v4521_v8 }
0x117e   : > { %v2590_v12 = vsel %vm2587_vm6, %v4522_v11, %v2560_v63  ;;  %v2593_v13 = vsel %vm2587_vm6, %v4523_v10, %v4234_v62 }
0x117f   : > { %v4526_v14 = vpop.permute.xlu0 %4525  ;;  %v4529_v15 = vpack.i.bf16 %v2593_v13, %v2590_v12 }
0x1180   : > { %v4528_v16 = vunpack.i.h.bf16 %v4526_v14  ;;  %v4527_v17 = vunpack.i.l.bf16 %v4526_v14 }
0x1181   : > { %4530 = vrot.lane.b32.xlu1 %v4529_v15, %s4731_s0 }
0x1182   : > { %v2596_v18 = vsel %vm2587_vm6, %v4527_v17, %v2570_v3  ;;  %v2599_v19 = vsel %vm2587_vm6, %v4528_v16, %v4237_v2 }
0x1183   : > { %v4534_v20 = vpack.i.bf16 %v2599_v19, %v2596_v18 }
0x1185   : > { %4535 = vrot.lane.b32.xlu0 %v4534_v20, %s4731_s0  ;;  %s5376_s0 = sld [smem:[#allocation8_spill]] }
0x118b   : > { %v4632_v50 = vld [vmem:[%s5376_s0 + $0x10] sm:$0xff]  }
0x11f3   : > { %v4531_v25 = vpop.permute.xlu1 %4530 }
0x11f4   : > { %v4533_v26 = vunpack.i.h.bf16 %v4531_v25  ;;  %v4532_v27 = vunpack.i.l.bf16 %v4531_v25 }
0x11f6   : > { %v2608_v28 = vsel %vm2587_vm6, %v4532_v27, %v2560_v63  ;;  %v2609_v29 = vsel %vm2587_vm6, %v4533_v26, %v4234_v62 }
0x11f7   : > { %v4536_v23 = vpop.permute.xlu0 %4535  ;;  %v4539_v31 = vpack.i.bf16 %v2609_v29, %v2608_v28 }
0x11f8   : > { %v4538_v32 = vunpack.i.h.bf16 %v4536_v23  ;;  %v4537_v33 = vunpack.i.l.bf16 %v4536_v23 }
0x11f9   : > { %4540 = vrot.lane.b32.xlu1 %v4539_v31, %s5344_s26 }
0x11fa   : > { %v2610_v34 = vsel %vm2587_vm6, %v4537_v33, %v2570_v3  ;;  %v2611_v35 = vsel %vm2587_vm6, %v4538_v32, %v4237_v2  ;;  %vm3983_vm6 = vmpackc.low %vm2612_vm7, %vm2612_vm7 }
0x11fb   : > { %v4544_v37 = vpack.i.bf16 %v2611_v35, %v2610_v34 }
0x11fd   : > { %4545 = vrot.lane.b32.xlu0 %v4544_v37, %s5344_s26  ;;  %2906 = vperm.xlu1 %4458, %v2579_v36  }
0x1201   : > { %2911 = vperm.xlu0 %4457, %v2580_v38   ;;  %2930 = vperm.xlu1 %4458, %v2583_v39  }
0x1205   : > { %2935 = vperm.xlu0 %4457, %v2584_v40   ;;  %2916 = vperm.xlu1 %4458, %v2581_v41  }
0x1209   : > { %2921 = vperm.xlu0 %4457, %v2582_v42   ;;  %2940 = vperm.xlu1 %4458, %v2585_v43  }
0x120d   : > { %2945 = vperm.xlu0 %4457, %v2586_v44  }
0x126b   : > { %v4541_v45 = vpop.permute.xlu1 %4540 }
0x126c   : > { %v4543_v46 = vunpack.i.h.bf16 %v4541_v45  ;;  %v4542_v47 = vunpack.i.l.bf16 %v4541_v45 }
0x126e   : > { %v3984_v48 = vpack.c.bf16 %v4543_v46, %v4542_v47 }
0x126f   : > { %v4546_v49 = vpop.permute.xlu0 %4545 }
0x1270   : > { %v4548_v51 = vunpack.i.h.bf16 %v4546_v49  ;;  %v4547_v52 = vunpack.i.l.bf16 %v4546_v49  ;;  %4246 = vmatprep.subr.msk.bf16.mxu1 %vm3983_vm6, %v3984_v48 }
0x1271   : > { %4247 = vmatpush3.bf16.msk.msra.mxu1 %vm3983_vm6, %v3984_v48 }
0x1272   : > { %v3987_v53 = vpack.c.bf16 %v4548_v51, %v4547_v52 }
0x1274   : > { %4248 = vmatprep.subr.msk.bf16.mxu1 %vm3983_vm6, %v3987_v53 }
0x1275   : > { %4249 = vmatpush3.bf16.msk.msra.mxu1 %vm3983_vm6, %v3987_v53 }
0x1276   : > { %4254 = vmatprep.subr.msk.bf16.mxu1 %vm3997_vm2, %v3984_v48 }
0x1278   : > { %4251 = vmatmul.mubr.msk.bf16.vlgmr.msra.gmra.mrb[12].mxu1 %vm2105_vm5, %v4627_v54 }
0x1279   : > { %4255 = vmatpush3.bf16.msk.msra.mxu1 %vm3997_vm2, %v3984_v48  ;;  %4258 = vmatprep.mubr.msk.bf16.mxu1 %vm2105_vm5, %v4628_v55 }
0x127a   : > { %4256 = vmatprep.subr.msk.bf16.mxu1 %vm3997_vm2, %v3987_v53 }
0x127c   : > { %v2907_v40 = vpop.permute.xlu1 %2906 }
0x127d   : > { %4257 = vmatpush3.bf16.msk.msra.mxu1 %vm3997_vm2, %v3987_v53  ;;  %vm5383_vm2 = vcmask 130048  }
0x1280   : > { %v2912_v41 = vpop.permute.xlu0 %2911  ;;  %v2931_v44 = vpop.permute.xlu1 %2930 }
0x1284   : > { %4259 = vmatmul.mubr.msk.bf16.vlgmr.msra.gmra.mrb[12].mxu1 %vm2105_vm5, %v4629_v56  ;;  %v2936_v45 = vpop.permute.xlu0 %2935  ;;  %v2917_v46 = vpop.permute.xlu1 %2916 }
0x1288   : > { %v2922_v47 = vpop.permute.xlu0 %2921 }
0x1357   : > { %v4260_v57 = vpop.f32.mrb[12].mxu1 }
0x1358   : > { %v2839_v58 = vpop.f32.mrb[13].mxu1  ;;  %v2874_v63 = vmul.f32 %v4260_v57, %v4260_v57  ;;  %v2862_v6 = vsel %vm2858_vm10, %v4260_v57, 0.0 }
0x1359   : > { %v2872_v59 = vmul.f32 %v2839_v58, %v2839_v58  ;;  %v4261_v61 = vpop.f32.mrb[14].mxu1  ;;  %v2859_v0 = vsel %vm2858_vm10, %v2839_v58, 0.0 }
0x135a   : > { %v2842_v62 = vpop.f32.mrb[15].mxu1  ;;  %v2875_v8 = vmul.f32 %v4261_v61, %v4261_v61  ;;  %v2879_v13 = vsel %vm2858_vm10, %v2874_v63, 0.0  ;;  %v2864_v14 = vsel %vm2858_vm10, %v4261_v61, 0.0 }
0x135b   : > { %v2860_v1 = vsel %vm2858_vm10, %v2842_v62, 0.0  ;;  %v2873_v2 = vmul.f32 %v2842_v62, %v2842_v62  ;;  %v2876_v4 = vsel %vm2858_vm10, %v2872_v59, 0.0 }
0x135c   : > { %v2861_v3 = vadd.f32 %v2860_v1, %v2859_v0  ;;  %v2881_v17 = vsel %vm2858_vm10, %v2875_v8, 0.0 }
0x135d   : > { %v2877_v10 = vsel %vm2858_vm10, %v2873_v2, 0.0 }
0x135e   : > { %v2863_v11 = vadd.f32 %v2862_v6, %v2861_v3  ;;  %v2878_v12 = vadd.f32 %v2877_v10, %v2876_v4 }
0x1360   : > { %v2865_v15 = vadd.f32 %v2864_v14, %v2863_v11  ;;  %v2880_v16 = vadd.f32 %v2879_v13, %v2878_v12 }
0x1362   : > { %v2866_v18 = vrot.slane %v2865_v15, 4  ;;  %v2882_v19 = vadd.f32 %v2881_v17, %v2880_v16 }
0x1364   : > { %v2867_v20 = vadd.f32 %v2866_v18, %v2865_v15  ;;  %v2883_v21 = vrot.slane %v2882_v19, 4 }
0x1366   : > { %v2868_v24 = vrot.slane %v2867_v20, 2  ;;  %v2884_v25 = vadd.f32 %v2883_v21, %v2882_v19 }
0x1368   : > { %v2869_v26 = vadd.f32 %v2868_v24, %v2867_v20  ;;  %v2885_v27 = vrot.slane %v2884_v25, 2 }
0x136a   : > { %v2870_v28 = vrot.slane %v2869_v26, 1  ;;  %v2886_v29 = vadd.f32 %v2885_v27, %v2884_v25 }
0x136c   : > { %v2871_v30 = vadd.f32 %v2870_v28, %v2869_v26  ;;  %v2887_v23 = vrot.slane %v2886_v29, 1 }
0x136e   : > { %v2888_v31 = vadd.f32 %v2887_v23, %v2886_v29  ;;  %v2889_v32 = vmul.f32 0.03125, %v2871_v30 }
0x1370   : > { %v2890_v33 = vmul.f32 0.03125, %v2888_v31  ;;  %v2891_v34 = vmul.f32 %v2889_v32, %v2889_v32  ;;  %v2895_v35 = vsub.f32 %v2842_v62, %v2889_v32  ;;  %v2894_v36 = vsub.f32 %v2839_v58, %v2889_v32  ;;  %v2946_v58 = vpop.permute.xlu0 %2945 }
0x1371   : > { %v2896_v37 = vsub.f32 %v4260_v57, %v2889_v32  ;;  %v2897_v38 = vsub.f32 %v4261_v61, %v2889_v32  ;;  %v2941_v57 = vpop.permute.xlu1 %2940 }
0x1372   : > { %v2892_v39 = vsub.f32 %v2890_v33, %v2891_v34 }
0x1374   : > { %v2893_v42 = vmax.f32 %v2892_v39, 0.0 }
0x1376   : > { %v2898_v43 = vadd.f32 1e-05, %v2893_v42 }
0x1378   : > { %4663 = vrsqrt.f32 %v2898_v43 }
0x1382   : > { %v4664_v48 = vpop.eup %4663 }
0x1383   : > { %v2901_v49 = vmul.f32 %v4664_v48, %v2895_v35  ;;  %v2900_v51 = vmul.f32 %v4664_v48, %v2894_v36  ;;  %v2902_v52 = vmul.f32 %v4664_v48, %v2896_v37  ;;  %v2903_v53 = vmul.f32 %v4664_v48, %v2897_v38 }
0x1385   : > { %v2925_v54 = vmul.f32 %v2912_v41, %v2901_v49  ;;  %v2924_v55 = vmul.f32 %v2907_v40, %v2900_v51  ;;  %v2926_v56 = vmul.f32 %v2917_v46, %v2902_v52  ;;  %v2927_v22 = vmul.f32 %v2922_v47, %v2903_v53 }
0x1387   : > { %v2949_v59 = vadd.f32 %v2936_v45, %v2925_v54  ;;  %v2948_v61 = vadd.f32 %v2931_v44, %v2924_v55  ;;  %v2950_v62 = vadd.f32 %v2941_v57, %v2926_v56  ;;  %v2951_v63 = vadd.f32 %v2946_v58, %v2927_v22  ;;  %v4630_v44 = vld [vmem:[%s5376_s0 + $0x8] sm:$0xff]   ;;  %v3074_v57 = vld [vmem:[%s5377_s11] sm:$0xff] }
0x1388   : > { %v3076_v58 = vld [vmem:[%s5378_s1] sm:$0xff] }
0x1389   : > { %v2957_v0 = vmul.f32 0.70710677, %v2949_v59  ;;  %v2956_v1 = vmul.f32 0.70710677, %v2948_v61  ;;  %v2958_v2 = vmul.f32 0.70710677, %v2950_v62 }
0x138a   : > { %v2959_v3 = vmul.f32 0.70710677, %v2951_v63  ;;  %v2953_v8 = vmul.f32 0.5, %v2949_v59  ;;  %v2952_v12 = vmul.f32 0.5, %v2948_v61  ;;  %v2954_v18 = vmul.f32 0.5, %v2950_v62  ;;  %v3075_v59 = vld [vmem:[%s5377_s11 + $0x8] sm:$0xff] }
0x138b   : > { %4665 = verf.f32 %v2957_v0  ;;  %v2955_v21 = vmul.f32 0.5, %v2951_v63  ;;  %v3077_v61 = vld [vmem:[%s5378_s1 + $0x8] sm:$0xff]  ;;  %s5385_s1 = smov 121  }
0x138c   : > { %4667 = verf.f32 %v2956_v1 }
0x138d   : > { %4669 = verf.f32 %v2958_v2 }
0x138e   : > { %4671 = verf.f32 %v2959_v3 }
0x1395   : > { %v4666_v6 = vpop.eup %4665 }
0x1396   : > { %v4668_v4 = vpop.eup %4667  ;;  %v2965_v10 = vadd.f32 1.0, %v4666_v6 }
0x1397   : > { %v4670_v11 = vpop.eup %4669  ;;  %v2964_v13 = vadd.f32 1.0, %v4668_v4 }
0x1398   : > { %v4672_v14 = vpop.eup %4671  ;;  %v2969_v15 = vmul.f32 %v2965_v10, %v2953_v8  ;;  %v2966_v16 = vadd.f32 1.0, %v4670_v11 }
0x1399   : > { %v2968_v17 = vmul.f32 %v2964_v13, %v2952_v12  ;;  %v2967_v19 = vadd.f32 1.0, %v4672_v14  ;;  %v4631_v13 = vld [vmem:[%s5376_s0] sm:$0xff]   ;;  %s5384_s0 = smov 127  }
0x139a   : > { %v2970_v20 = vmul.f32 %v2966_v16, %v2954_v18 }
0x139b   : > { %4264 = vmatprep.mubr.msk.f32.mxu0 %vm2858_vm10, %v2968_v17  ;;  %v2971_v24 = vmul.f32 %v2967_v19, %v2955_v21 }
0x139c   : > { %4265 = vmatmul.mubr.msk.f32.vlgmr.msra.gmra.mrb[10].mxu0 %vm2858_vm10, %v2969_v15 }
0x139d   : > { %4267 = vmatprep.mubr.msk.f32.mxu0 %vm2858_vm10, %v2970_v20 }
0x13a0   : > { %4268 = vmatmul.mubr.msk.f32.gmra.mrb[16].mxu0 %vm2858_vm10, %v2971_v24 }
0x13a1   : > { %4274 = vmatprep.mubr.msk.bf16.mxu0 %vm4723_vm1, %v4722_v9 }
0x146f   : > { %v4266_v25 = vpop.f32.mrb[10].mxu0 }
0x1470   : > { %v3055_v26 = vpop.f32.mrb[11].mxu0 }
0x1471   : > { %v3129_v27 = vpack.c.bf16 %v4266_v25, %v3055_v26  ;;  %v4549_v28 = vpack.i.bf16 %v4266_v25, %v3055_v26 }
0x1473   : > { %4550 = vrot.lane.b32.xlu1 %v4549_v28, %s4729_s2  ;;  %v4269_v29 = vpop.f32.mrb[16].mxu0  ;;  %4271 = vmatpush3.bf16.msra.mxu0 %v3129_v27 }
0x1474   : > { %v3065_v30 = vpop.f32.mrb[17].mxu0  ;;  %4272 = vmatprep.subr.bf16.mxu0 %v4722_v9 }
0x1475   : > { %v3130_v23 = vpack.c.bf16 %v4269_v29, %v3065_v30  ;;  %v4554_v31 = vpack.i.bf16 %v4269_v29, %v3065_v30 }
0x1477   : > { %4555 = vrot.lane.b32.xlu0 %v4554_v31, %s4729_s2  ;;  %4273 = vmatpush3.bf16.msra.mxu0 %v3130_v23 }
0x1478   : > { %4278 = vmatprep.subr.bf16.mxu0 %v4722_v9 }
0x147a   : > { %4275 = vmatmul.mubr.msk.bf16.vlgmr.msra.gmra.mrb[20].mxu0 %vm2105_vm5, %v4630_v44 }
0x147b   : > { %4282 = vmatprep.mubr.msk.bf16.mxu0 %vm4723_vm1, %v4722_v9 }
0x14e5   : > { %v4551_v32 = vpop.permute.xlu1 %4550 }
0x14e6   : > { %v4553_v33 = vunpack.i.h.bf16 %v4551_v32  ;;  %v4552_v34 = vunpack.i.l.bf16 %v4551_v32 }
0x14e8   : > { %v3080_v35 = vsel %vm2035_vm4, %v4552_v34, %v3055_v26  ;;  %v3083_v36 = vsel %vm2035_vm4, %v4553_v33, %v4266_v25 }
0x14e9   : > { %v4556_v37 = vpop.permute.xlu0 %4555  ;;  %v4559_v38 = vpack.i.bf16 %v3083_v36, %v3080_v35 }
0x14ea   : > { %v4558_v39 = vunpack.i.h.bf16 %v4556_v37  ;;  %v4557_v40 = vunpack.i.l.bf16 %v4556_v37 }
0x14eb   : > { %4560 = vrot.lane.b32.xlu1 %v4559_v38, %s4729_s2 }
0x14ec   : > { %v3086_v41 = vsel %vm2035_vm4, %v4557_v40, %v3065_v30  ;;  %v3089_v42 = vsel %vm2035_vm4, %v4558_v39, %v4269_v29 }
0x14ed   : > { %v4564_v43 = vpack.i.bf16 %v3089_v42, %v3086_v41 }
0x14ef   : > { %4565 = vrot.lane.b32.xlu0 %v4564_v43, %s4729_s2  ;;  %s5379_s2 = sld [smem:[#allocation11_spill]] }
0x14f5   : > { %v3366_v18 = vld [vmem:[%s5379_s2] sm:$0xf]  ;;  %s5381_s2 = sld [smem:[#allocation14_spill]] }
0x14f6   : > { %4294 = vmatprep.subr.msk.mxu1 %vm1184_vm9, %v3366_v18 }
0x14f7   : > { %4295 = vmatpush3.msk.msra.mxu1 %vm1184_vm9, %v3366_v18 }
0x14f8   : > { %4299 = vmatprep.subr.bf16.mxu1 %v4722_v9 }
0x155d   : > { %v4561_v45 = vpop.permute.xlu1 %4560 }
0x155e   : > { %v4563_v46 = vunpack.i.h.bf16 %v4561_v45  ;;  %v4562_v47 = vunpack.i.l.bf16 %v4561_v45 }
0x1560   : > { %v3098_v48 = vsel %vm2035_vm4, %v4562_v47, %v3055_v26  ;;  %v3099_v49 = vsel %vm2035_vm4, %v4563_v46, %v4266_v25 }
0x1561   : > { %v4566_v51 = vpop.permute.xlu0 %4565  ;;  %v4569_v52 = vpack.i.bf16 %v3099_v49, %v3098_v48 }
0x1562   : > { %v4568_v53 = vunpack.i.h.bf16 %v4566_v51  ;;  %v4567_v54 = vunpack.i.l.bf16 %v4566_v51 }
0x1563   : > { %4570 = vrot.lane.b32.xlu1 %v4569_v52, %s4730_s10 }
0x1564   : > { %v3100_v55 = vsel %vm2035_vm4, %v4567_v54, %v3065_v30  ;;  %v3101_v56 = vsel %vm2035_vm4, %v4568_v53, %v4269_v29  ;;  %vm5387_vm4 = vmmov %vm5383_vm2 }
0x1565   : > { %v4574_v22 = vpack.i.bf16 %v3101_v56, %v3100_v55 }
0x1567   : > { %4580 = vrot.lane.b32.xlu1 %v4569_v52, %s5344_s26  ;;  %4575 = vrot.lane.b32.xlu0 %v4574_v22, %s4730_s10  ;;  %s5380_s10 = sld [smem:[#allocation12_spill]] }
0x156b   : > { %3334 = vperm.xlu1 %4458, %v3074_v57   ;;  %4585 = vrot.lane.b32.xlu0 %v4574_v22, %s5344_s26  ;;  %s5382_s26 = sld [smem:[#allocation13_spill]] }
0x156f   : > { %3346 = vperm.xlu1 %4458, %v3076_v58   ;;  %3339 = vperm.xlu0 %4457, %v3075_v59  }
0x1573   : > { %3351 = vperm.xlu0 %4457, %v3077_v61  }
0x15d5   : > { %v4571_v62 = vpop.permute.xlu1 %4570 }
0x15d6   : > { %v4573_v63 = vunpack.i.h.bf16 %v4571_v62  ;;  %v4572_v0 = vunpack.i.l.bf16 %v4571_v62 }
0x15d8   : > { %v4016_v1 = vpack.c.bf16 %v4573_v63, %v4572_v0 }
0x15d9   : > { %v4581_v2 = vpop.permute.xlu1 %4580  ;;  %v4576_v3 = vpop.permute.xlu0 %4575 }
0x15da   : > { %v4578_v6 = vunpack.i.h.bf16 %v4576_v3  ;;  %v4577_v4 = vunpack.i.l.bf16 %v4576_v3  ;;  %4279 = vmatpush3.bf16.msk.msra.mxu0 %vm5112_vm8, %v4016_v1  ;;  %v4583_v8 = vunpack.i.h.bf16 %v4581_v2  ;;  %v4582_v10 = vunpack.i.l.bf16 %v4581_v2 }
0x15db   : > { %4280 = vmatprep.subr.bf16.mxu0 %v4722_v9 }
0x15dc   : > { %v4019_v11 = vpack.c.bf16 %v4578_v6, %v4577_v4  ;;  %v4026_v14 = vpack.c.bf16 %v4583_v8, %v4582_v10 }
0x15dd   : > { %v4586_v12 = vpop.permute.xlu0 %4585 }
0x15de   : > { %4281 = vmatpush3.bf16.msk.msra.mxu0 %vm5112_vm8, %v4019_v11  ;;  %v4588_v15 = vunpack.i.h.bf16 %v4586_v12  ;;  %v4587_v16 = vunpack.i.l.bf16 %v4586_v12 }
0x15df   : > { %4286 = vmatprep.subr.bf16.mxu0 %v4722_v9 }
0x15e0   : > { %v4029_v17 = vpack.c.bf16 %v4588_v15, %v4587_v16 }
0x15e1   : > { %4283 = vmatmul.mubr.msk.bf16.vlgmr.msra.gmra.mrb[20].mxu0 %vm2105_vm5, %v4631_v13 }
0x15e2   : > { %4287 = vmatpush3.bf16.msk.msra.mxu0 %vm5124_vm13, %v4026_v14  ;;  %4290 = vmatprep.mubr.msk.bf16.mxu0 %vm4723_vm1, %v4722_v9 }
0x15e3   : > { %4288 = vmatprep.subr.bf16.mxu0 %v4722_v9 }
0x15e6   : > { %4289 = vmatpush3.bf16.msk.msra.mxu0 %vm5124_vm13, %v4029_v17 }
0x15e7   : > { %4317 = vmatprep.subr.mxu0 %v4722_v9 }
0x15ea   : > { %v3335_v52 = vpop.permute.xlu1 %3334 }
0x15ed   : > { %4291 = vmatmul.mubr.msk.bf16.vlgmr.msra.gmra.mrb[20].mxu0 %vm2105_vm5, %v4632_v50 }
0x15ee   : > { %4319 = vmatprep.mubr.msk.f32.mxu0 %vm4723_vm1, %v4722_v9  ;;  %v3340_v53 = vpop.permute.xlu0 %3339  ;;  %v3347_v58 = vpop.permute.xlu1 %3346 }
0x15f2   : > { %v3352_v59 = vpop.permute.xlu0 %3351 }
0x16c0   : > { %v3292_v19 = vpop.f32.mrb[20].mxu0 }
0x16c1   : > { %v3310_v20 = vmul.f32 %v3292_v19, %v3292_v19  ;;  %v4292_v21 = vpop.f32.mrb[21].mxu0  ;;  %v3301_v24 = vsel %vm2320_vm14, %v3292_v19, 0.0 }
0x16c2   : > { %v3295_v60 = vpop.f32.mrb[22].mxu0  ;;  %v4035_v21 = vld [vmem:[%s5380_s10 + $0x4] sm:$0xf] }
0x16c3   : > { %v3302_v25 = vsel %vm2320_vm14, %v3295_v60, 0.0  ;;  %v3311_v26 = vmul.f32 %v3295_v60, %v3295_v60  ;;  %v4293_v27 = vpop.f32.mrb[23].mxu0  ;;  %v3312_v29 = vsel %vm2320_vm14, %v3310_v20, 0.0 }
0x16c4   : > { %v3303_v28 = vadd.f32 %v3302_v25, %v3301_v24 }
0x16c5   : > { %v3313_v30 = vsel %vm2320_vm14, %v3311_v26, 0.0 }
0x16c6   : > { %v3304_v23 = vrot.slane %v3303_v28, 4  ;;  %v3314_v31 = vadd.f32 %v3313_v30, %v3312_v29  ;;  %v3452_v29 = vld [vmem:[%s5381_s2] sm:$0xff] }
0x16c7   : > { %v3451_v30 = vld [vmem:[%s5382_s26] sm:$0xff]  ;;  %s3882_s26 = sshll.u32 %s5393_s16, 3 }
0x16c8   : > { %v3305_v32 = vadd.f32 %v3304_v23, %v3303_v28  ;;  %v3315_v33 = vrot.slane %v3314_v31, 4  ;;  %v3737_v23 = vld [vmem:[%s4885_s4] sm:$0x1f] }
0x16ca   : > { %v3306_v34 = vrot.slane %v3305_v32, 2  ;;  %v3316_v35 = vadd.f32 %v3315_v33, %v3314_v31 }
0x16cc   : > { %v3307_v36 = vadd.f32 %v3306_v34, %v3305_v32  ;;  %v3317_v37 = vrot.slane %v3316_v35, 2 }
0x16ce   : > { %v3308_v38 = vrot.slane %v3307_v36, 1  ;;  %v3318_v39 = vadd.f32 %v3317_v37, %v3316_v35 }
0x16d0   : > { %v3309_v40 = vadd.f32 %v3308_v38, %v3307_v36  ;;  %v3319_v41 = vrot.slane %v3318_v39, 1  ;;  %v3475_v38 = vld [vmem:[%s5380_s10] sm:$0xf] }
0x16d2   : > { %v3320_v42 = vadd.f32 %v3319_v41, %v3318_v39  ;;  %v3321_v43 = vmul.f32 0.0625, %v3309_v40  ;;  %v4041_v40 = vld [vmem:[%s5380_s10 + $0x8] sm:$0xf]  ;;  %v3662_v41 = vld [vmem:[%s4875_s20] sm:$0xff] }
0x16d3   : > { %4318 = vmatpush3.msra.mxu0 %v3662_v41 }
0x16d4   : > { %v3322_v44 = vmul.f32 0.0625, %v3320_v42  ;;  %v3323_v45 = vmul.f32 %v3321_v43, %v3321_v43  ;;  %v3326_v46 = vsub.f32 %v3292_v19, %v3321_v43  ;;  %v3327_v47 = vsub.f32 %v3295_v60, %v3321_v43  ;;  %4322 = vmatprep.subr.bf16.mxu0 %v4722_v9 }
0x16d6   : > { %v3324_v48 = vsub.f32 %v3322_v44, %v3323_v45 }
0x16d8   : > { %v3325_v49 = vmax.f32 %v3324_v48, 0.0 }
0x16da   : > { %v3328_v51 = vadd.f32 1e-05, %v3325_v49 }
0x16dc   : > { %4673 = vrsqrt.f32 %v3328_v51 }
0x16e6   : > { %v4674_v54 = vpop.eup %4673 }
0x16e7   : > { %v3330_v55 = vmul.f32 %v4674_v54, %v3326_v46  ;;  %v3331_v56 = vmul.f32 %v4674_v54, %v3327_v47 }
0x16e9   : > { %v3343_v22 = vmul.f32 %v3340_v53, %v3331_v56  ;;  %v3342_v57 = vmul.f32 %v3335_v52, %v3330_v55 }
0x16eb   : > { %v3355_v61 = vadd.f32 %v3352_v59, %v3343_v22  ;;  %v3354_v62 = vadd.f32 %v3347_v58, %v3342_v57 }
0x16ed   : > { %v3359_v63 = vmul.f32 0.70710677, %v3355_v61  ;;  %v3358_v0 = vmul.f32 0.70710677, %v3354_v62  ;;  %v3357_v3 = vmul.f32 0.5, %v3355_v61  ;;  %v3356_v4 = vmul.f32 0.5, %v3354_v62 }
0x16ef   : > { %4675 = verf.f32 %v3359_v63 }
0x16f0   : > { %4677 = verf.f32 %v3358_v0 }
0x16f9   : > { %v4676_v1 = vpop.eup %4675 }
0x16fa   : > { %v4678_v2 = vpop.eup %4677  ;;  %v3363_v6 = vadd.f32 1.0, %v4676_v1 }
0x16fb   : > { %v3362_v8 = vadd.f32 1.0, %v4678_v2 }
0x16fc   : > { %v3365_v10 = vmul.f32 %v3363_v6, %v3357_v3 }
0x16fd   : > { %v3364_v11 = vmul.f32 %v3362_v8, %v3356_v4 }
0x16ff   : > { %4296 = vmatprep.mubr.msk.f32.mxu1 %vm2320_vm14, %v3364_v11 }
0x1700   : > { %4297 = vmatmul.mubr.msk.f32.vlgmr.msra.gmra.mrb[16].mxu1 %vm2320_vm14, %v3365_v10 }
0x1701   : > { %4301 = vmatprep.mubr.msk.bf16.mxu1 %vm4723_vm1, %v4722_v9 }
0x17d3   : > { %v4298_v12 = vpop.f32.mrb[16].mxu1 }
0x17d4   : > { %v3442_v13 = vpop.f32.mrb[17].mxu1 }
0x17d5   : > { %v4589_v14 = vpack.i.bf16 %v4298_v12, %v3442_v13  ;;  %v3479_v15 = vpack.c.bf16 %v4298_v12, %v3442_v13 }
0x17d7   : > { %4590 = vrot.lane.b32.xlu1 %v4589_v14, %s4727_s28  ;;  %4300 = vmatpush3.bf16.msra.mxu1 %v3479_v15 }
0x17d8   : > { %4305 = vmatprep.subr.bf16.mxu1 %v4722_v9 }
0x17da   : > { %4302 = vmatmul.mubr.msk.bf16.vlgmr.msra.gmra.mrb[20].mxu1 %vm5383_vm2, %v4035_v21 }
0x17db   : > { %4307 = vmatprep.mubr.msk.bf16.mxu1 %vm4723_vm1, %v4722_v9 }
0x1849   : > { %v4591_v16 = vpop.permute.xlu1 %4590 }
0x184a   : > { %v4593_v17 = vunpack.i.h.bf16 %v4591_v16  ;;  %v4592_v50 = vunpack.i.l.bf16 %v4591_v16 }
0x184c   : > { %v3458_v18 = vsel %vm1521_vm11, %v4593_v17, %v4298_v12  ;;  %v3455_v19 = vsel %vm1521_vm11, %v4592_v50, %v3442_v13 }
0x184d   : > { %v4594_v20 = vpack.i.bf16 %v3458_v18, %v3455_v19 }
0x184f   : > { %4595 = vrot.lane.b32.xlu0 %v4594_v20, %s4727_s28  ;;  %v3736_v20 = vld [vmem:[%s4880_s27] sm:$0x7]  ;;  %s928_s28 = scalar_lea.vmem %s4890_s12, %s3882_s26 }
0x18c1   : > { %v4596_v60 = vpop.permute.xlu0 %4595 }
0x18c2   : > { %v4598_v24 = vunpack.i.h.bf16 %v4596_v60  ;;  %v4597_v25 = vunpack.i.l.bf16 %v4596_v60 }
0x18c4   : > { %v3464_v26 = vsel %vm1521_vm11, %v4598_v24, %v4298_v12  ;;  %v3463_v27 = vsel %vm1521_vm11, %v4597_v25, %v3442_v13  ;;  %vm5386_vm11 = vmmov %vm5383_vm2 }
0x18c5   : > { %v4604_v28 = vpack.i.bf16 %v3464_v26, %v3463_v27 }
0x18c7   : > { %4605 = vrot.lane.b32.xlu0 %v4604_v28, %s5384_s0  ;;  %4600 = vrot.lane.b32.xlu1 %v4604_v28, %s5385_s1 }
0x18cb   : > { %3653 = vperm.xlu0 %4457, %v3452_v29   ;;  %3647 = vperm.xlu1 %4458, %v3451_v30  }
0x18cf   : > { %3741 = vperm.xlu1 %4458, %v3737_v23  }
0x1939   : > { %v4606_v31 = vpop.permute.xlu0 %4605  ;;  %v4601_v32 = vpop.permute.xlu1 %4600 }
0x193a   : > { %v4603_v33 = vunpack.i.h.bf16 %v4601_v32  ;;  %v4602_v34 = vunpack.i.l.bf16 %v4601_v32  ;;  %v4608_v35 = vunpack.i.h.bf16 %v4606_v31  ;;  %v4607_v36 = vunpack.i.l.bf16 %v4606_v31 }
0x193c   : > { %v4038_v37 = vpack.c.bf16 %v4603_v33, %v4602_v34  ;;  %v4043_v39 = vpack.c.bf16 %v4608_v35, %v4607_v36 }
0x193e   : > { %4306 = vmatpush3.bf16.msk.msra.mxu1 %vm5024_vm15, %v4038_v37  ;;  %vm5388_vm15 = vcmask 64512  }
0x193f   : > { %4311 = vmatprep.subr.bf16.mxu1 %v4722_v9  ;;  %vm5389_vm5 = vmmov %vm5388_vm15 }
0x1941   : > { %4308 = vmatmul.mubr.msk.bf16.vlgmr.msra.gmra.mrb[20].mxu1 %vm5386_vm11, %v3475_v38 }
0x1942   : > { %4312 = vmatpush3.bf16.msk.msra.mxu1 %vm5028_vm0, %v4043_v39  ;;  %4313 = vmatprep.mubr.msk.bf16.mxu1 %vm4723_vm1, %v4722_v9  ;;  %vm5390_vm0 = vmmov %vm5389_vm5 }
0x1943   : > { %vm5391_vm8 = vmmov %vm5390_vm0 }
0x194a   : > { %v3648_v4 = vpop.permute.xlu1 %3647  ;;  %v3654_v10 = vpop.permute.xlu0 %3653 }
0x194d   : > { %4314 = vmatmul.mubr.msk.bf16.vlgmr.msra.gmra.mrb[20].mxu1 %vm5387_vm4, %v4041_v40 }
0x194e   : > { %v3742_v21 = vpop.permute.xlu1 %3741 }
0x1a20   : > { %v3614_v5 = vpop.f32.mrb[20].mxu1 }
0x1a21   : > { %v3621_v42 = vsel %vm5388_vm15, %v3614_v5, 0.0  ;;  %v3628_v43 = vmul.f32 %v3614_v5, %v3614_v5  ;;  %v4315_v44 = vpop.f32.mrb[21].mxu1 }
0x1a22   : > { %v3622_v45 = vrot.slane %v3621_v42, 4  ;;  %v3617_v46 = vpop.f32.mrb[22].mxu1 }
0x1a23   : > { %v3629_v7 = vsel %vm5389_vm5, %v3628_v43, 0.0  ;;  %v4316_v47 = vpop.f32.mrb[23].mxu1 }
0x1a24   : > { %v3623_v48 = vadd.f32 %v3622_v45, %v3621_v42  ;;  %v3630_v49 = vrot.slane %v3629_v7, 4 }
0x1a26   : > { %v3624_v51 = vrot.slane %v3623_v48, 2  ;;  %v3631_v52 = vadd.f32 %v3630_v49, %v3629_v7 }
0x1a28   : > { %v3625_v53 = vadd.f32 %v3624_v51, %v3623_v48  ;;  %v3632_v54 = vrot.slane %v3631_v52, 2 }
0x1a2a   : > { %v3626_v55 = vrot.slane %v3625_v53, 1  ;;  %v3633_v56 = vadd.f32 %v3632_v54, %v3631_v52 }
0x1a2c   : > { %v3627_v22 = vadd.f32 %v3626_v55, %v3625_v53  ;;  %v3634_v57 = vrot.slane %v3633_v56, 1 }
0x1a2e   : > { %v3635_v58 = vadd.f32 %v3634_v57, %v3633_v56  ;;  %v3636_v59 = vmul.f32 0.125, %v3627_v22 }
0x1a30   : > { %v3637_v61 = vmul.f32 0.125, %v3635_v58  ;;  %v3638_v62 = vmul.f32 %v3636_v59, %v3636_v59  ;;  %v3641_v2 = vsub.f32 %v3614_v5, %v3636_v59 }
0x1a32   : > { %v3639_v63 = vsub.f32 %v3637_v61, %v3638_v62 }
0x1a34   : > { %v3640_v0 = vmax.f32 %v3639_v63, 0.0 }
0x1a36   : > { %v3642_v1 = vadd.f32 1e-05, %v3640_v0 }
0x1a38   : > { %4679 = vrsqrt.f32 %v3642_v1 }
0x1a42   : > { %v4680_v3 = vpop.eup %4679 }
0x1a43   : > { %v3644_v6 = vmul.f32 %v4680_v3, %v3641_v2 }
0x1a45   : > { %v3650_v8 = vmul.f32 %v3648_v4, %v3644_v6 }
0x1a47   : > { %v3656_v11 = vadd.f32 %v3654_v10, %v3650_v8 }
0x1a49   : > { %v3658_v12 = vmul.f32 0.70710677, %v3656_v11  ;;  %v3657_v14 = vmul.f32 0.5, %v3656_v11 }
0x1a4b   : > { %4681 = verf.f32 %v3658_v12 }
0x1a55   : > { %v4682_v13 = vpop.eup %4681 }
0x1a56   : > { %v3660_v15 = vadd.f32 1.0, %v4682_v13 }
0x1a58   : > { %v3661_v16 = vmul.f32 %v3660_v15, %v3657_v14 }
0x1a5a   : > { %4320 = vmatmul.mubr.msk.f32.vlgmr.msra.gmra.mrb[18].mxu0 %vm5390_vm0, %v3661_v16 }
0x1a5b   : > { %4324 = vmatprep.mubr.msk.bf16.mxu0 %vm4723_vm1, %v4722_v9 }
0x1b2d   : > { %v3732_v17 = vpop.f32.mrb[18].mxu0 }
0x1b2e   : > { %v3738_v50 = vpack.c.bf16 %v3732_v17, %v3732_v17  ;;  %v4321_v18 = vpop.f32.mrb[19].mxu0 }
0x1b30   : > { %v3748_v19 = vsel %vm1184_vm9, %v3738_v50, 0 }
0x1b31   : > { %4323 = vmatpush3.bf16.msra.mxu0 %v3748_v19 }
0x1b34   : > { %4325 = vmatmul.mubr.msk.bf16.vlgmr.msra.gmra.mrb[24].mxu0 %vm5391_vm8, %v3736_v20 }
0x1c07   : > { %v3784_v60 = vpop.f32.mrb[24].mxu0 }
0x1c08   : > { %v3785_v24 = vadd.f32 %v3784_v60, %v3742_v21  ;;  %v4326_v25 = vpop.f32.mrb[25].mxu0 }
0x1c09   : > { %v3787_v26 = vpop.f32.mrb[26].mxu0 }
0x1c0a   : > { %3791 = vst.msk [vmem:[%s928_s28] sm:$0x1f] %vm3790_vm12, %v3785_v24  ;;  %v4327_v27 = vpop.f32.mrb[27].mxu0 }
0x1c0b PF: > { %s71_s15 = sadd.s32 1, %s4689_s15  }
0x1c0c   : > { %p68_p4 = scmp.ge.s32.totalorder %s71_s15, 4  }
0x1c0e   :  { %70 = sbr.rel (!%p68_p4) target bundleno = 53 (0x35), region = 214 }

</bundles_post_ra>
